<compile_context>
chip_gen: v5e
topology: v5e:2x2
jax: 0.10.0
libtpu: 0.0.40
codegen_flags: <defaults>
</compile_context>

<pallas_src>
import functools

import jax
import jax.numpy as jnp
from jax.experimental import pallas as pl
from jax.experimental.pallas import tpu as pltpu

NUM_LAYERS = 5


def lstm_stack_kernel(x_ref, wcat_ref, b_ref, fcw_ref, fcb_ref, out_ref,
                      *, bp, t_len, hidden):
    """Wavefront-scheduled 5-layer LSTM stack + final FC.

    x_ref    : (T, Bp, D)   time-major input, batch padded to Bp (multiple of 8)
    wcat_ref : (L, 2H, 4H)  bf16 fused [Wx; Wh] weights, gate order [i, f, g, o],
                            cell-gate (g) columns pre-scaled by 2
    b_ref    : (L, 1, 4H)   f32 fused biases (g columns pre-scaled by 2)
    fcw_ref  : (1, H)       final FC weight (as a row)
    fcb_ref  : (1, 1)       final FC bias
    out_ref  : (Bp, 1)
    """
    H = hidden
    L = NUM_LAYERS

    # Hoist the (small) weight/bias loads; ~20 vregs of bf16 weights can stay
    # resident for the whole kernel.
    w = [wcat_ref[l] for l in range(L)]
    bias = [b_ref[l] for l in range(L)]

    zeros = jnp.zeros((bp, H), jnp.float32)
    h = [zeros] * L   # per-layer hidden state (values, never stored to VMEM)
    c = [zeros] * L   # per-layer cell state

    # Wavefront: at step s, layer l processes timestep t = s - l.  Layer l
    # consumes layer l-1's hidden state produced at the PREVIOUS wavefront step
    # (same timestep t), so we snapshot h before updating.  Static unroll keeps
    # the tiny trip counts fully visible to the LLO scheduler.
    for s in range(t_len + L - 1):
        h_prev = list(h)
        for l in range(max(0, s - t_len + 1), min(L, s + 1)):
            t = s - l
            x_in = x_ref[t] if l == 0 else h_prev[l - 1]          # (Bp, H) f32
            u = jnp.concatenate([x_in, h_prev[l]], axis=-1)       # (Bp, 2H) f32
            gates = jnp.dot(u.astype(jnp.bfloat16), w[l],
                            preferred_element_type=jnp.float32) + bias[l]
            sig = jax.nn.sigmoid(gates)        # one EUP pass over all 4H lanes
            i_g = sig[:, 0:H]
            f_g = sig[:, H:2 * H]
            g_g = 2.0 * sig[:, 2 * H:3 * H] - 1.0   # == tanh of the raw cell gate
            o_g = sig[:, 3 * H:4 * H]
            c_new = c[l] * f_g + i_g * g_g
            c[l] = c_new
            h[l] = o_g * jnp.tanh(c_new)            # second (and last) EUP push
        # TODO(synk): nn.Dropout(0.1) between layers needs RNG in training mode;
        # treated as identity (matches PyTorch eval()).

    # Final FC on the top layer's last-timestep hidden state: (Bp,H)x(H,1) done
    # as a lane reduction on the VPU/XLU instead of a 1-lane MXU matmul.
    last_h = h[L - 1]
    out_ref[...] = (jnp.sum(last_h * fcw_ref[...], axis=-1, keepdims=True)
                    + fcb_ref[...])


def multilayer_model_forward(x, wx, wh, b, fcw, fcb):
    """x: (B,T,D); wx: (L,D,4H); wh: (L,H,4H); b: (L,1,4H); fcw: (1,H); fcb: (1,1).

    Gate order along the 4H axis is [input, forget, cell, output].
    """
    B, T, D = x.shape
    L, H, G = wh.shape
    assert G == 4 * H
    assert L == NUM_LAYERS
    assert D == H, (
        "MultiLayer_Model only type-checks when input_dim == hidden_size "
        f"(got D={D}, H={H})")

    Bp = max(8, ((B + 7) // 8) * 8)

    # Single fused pad+transpose to time-major (T, Bp, D): each timestep is a
    # full sublane-aligned (8, D) tile.  This is the only wrapper-side layout op
    # (no 2-D reshape, no extra HBM round-trip beyond the pad itself).
    x_tm = (jnp.zeros((T, Bp, D), jnp.float32)
            .at[:, :B, :].set(jnp.transpose(x.astype(jnp.float32), (1, 0, 2))))

    # Fused (2H, 4H) weight per layer; pre-scale the cell-gate (g) columns of
    # weights and bias by 2 so the kernel gets tanh via 2*sigmoid(2x) - 1 from a
    # single full-width sigmoid pass.  Weights stored bf16 (MXU operands); bias
    # stays f32 (added after the f32-accumulated matmul).
    wcat = jnp.concatenate([wx, wh], axis=1).astype(jnp.float32)       # (L,2H,4H)
    wcat = wcat.at[:, :, 2 * H:3 * H].multiply(2.0)
    wcat_bf16 = wcat.astype(jnp.bfloat16)
    b_scaled = b.astype(jnp.float32).at[:, :, 2 * H:3 * H].multiply(2.0)

    cost = pl.CostEstimate(
        flops=int(2 * L * T * Bp * (2 * H) * G + 2 * Bp * H),
        transcendentals=int(L * T * Bp * 5 * H),   # sigmoid(4H) + tanh(H) per step
        bytes_accessed=int(4 * x_tm.size + 2 * wcat_bf16.size
                           + 4 * (b_scaled.size + fcw.size + fcb.size + Bp)),
    )

    vmem = pl.BlockSpec(memory_space=pltpu.MemorySpace.VMEM)
    kernel = functools.partial(lstm_stack_kernel, bp=Bp, t_len=T, hidden=H)
    out = pl.pallas_call(
        kernel,
        out_shape=jax.ShapeDtypeStruct((Bp, 1), jnp.float32),
        in_specs=[vmem] * 5,
        out_specs=vmem,
        cost_estimate=cost,
    )(x_tm, wcat_bf16, b_scaled,
      fcw.astype(jnp.float32), fcb.astype(jnp.float32))
    return out[:B]


def reference_forward(x, wx, wh, b, fcw, fcb):
    """Pure f32 JAX reference mirroring the PyTorch forward (dropout = identity)."""
    B, T, D = x.shape
    L, H, _ = wh.shape
    seq = x.astype(jnp.float32)
    for l in range(L):
        h = jnp.zeros((B, H), jnp.float32)
        c = jnp.zeros((B, H), jnp.float32)
        hs = []
        for t in range(T):
            u = jnp.concatenate([seq[:, t, :], h], axis=-1)
            gates = u @ jnp.concatenate([wx[l], wh[l]], axis=0) + b[l]
            i_g = jax.nn.sigmoid(gates[:, 0:H])
            f_g = jax.nn.sigmoid(gates[:, H:2 * H])
            g_g = jnp.tanh(gates[:, 2 * H:3 * H])
            o_g = jax.nn.sigmoid(gates[:, 3 * H:4 * H])
            c = c * f_g + i_g * g_g
            h = o_g * jnp.tanh(c)
            hs.append(h)
        seq = jnp.stack(hs, axis=1)
    return jnp.sum(seq[:, -1, :] * fcw, axis=-1, keepdims=True) + fcb


if __name__ == "__main__":
    # Small shapes consistent with the module: timestep=8, input_dim=hidden_size=32.
    B, T, D, H = 2, 8, 32, 32
    L, G = NUM_LAYERS, 4 * H

    key = jax.random.PRNGKey(0)
    kx, kwx, kwh, kb, kfw, kfb = jax.random.split(key, 6)

    x = jax.random.normal(kx, (B, T, D), dtype=jnp.float32)

    # Fused gate weights (gate order [input, forget, cell, output]), stored so we
    # compute u @ W (transposed relative to PyTorch nn.Linear's (H, D+H)).
    scale = 1.0 / jnp.sqrt(jnp.float32(D + H))
    wx = jax.random.uniform(kwx, (L, D, G), minval=-scale, maxval=scale,
                            dtype=jnp.float32)
    wh = jax.random.uniform(kwh, (L, H, G), minval=-scale, maxval=scale,
                            dtype=jnp.float32)
    b = jax.random.uniform(kb, (L, 1, G), minval=-scale, maxval=scale,
                           dtype=jnp.float32)
    fc_scale = 1.0 / jnp.sqrt(jnp.float32(H))
    fcw = jax.random.uniform(kfw, (1, H), minval=-fc_scale, maxval=fc_scale,
                             dtype=jnp.float32)
    fcb = jax.random.uniform(kfb, (1, 1), minval=-fc_scale, maxval=fc_scale,
                             dtype=jnp.float32)

    out = jax.block_until_ready(multilayer_model_forward(x, wx, wh, b, fcw, fcb))
    ref = reference_forward(x, wx, wh, b, fcw, fcb)

    assert out.shape == (B, 1)
    # bf16 MXU operands (f32 accumulation) + tanh-via-sigmoid identity introduce
    # small numeric drift vs the pure-f32 reference (typically ~1e-3).
    err = float(jnp.max(jnp.abs(out - ref)))
    assert err < 5e-2, (err, out, ref)

    print("KERNEL_OK")
</pallas_src>

<mosaic_0001>
module attributes {stable_mosaic.version = 11 : i64} {
  func.func @lstm_stack_kernel(%arg0: memref<8x8x32xf32, #tpu.memory_space<vmem>>, %arg1: memref<5x64x128xbf16, #tpu.memory_space<vmem>>, %arg2: memref<5x1x128xf32, #tpu.memory_space<vmem>>, %arg3: memref<1x32xf32, #tpu.memory_space<vmem>>, %arg4: memref<1x1xf32, #tpu.memory_space<vmem>>, %arg5: memref<8x1xf32, #tpu.memory_space<vmem>>) attributes {dimension_semantics = [], scalar_prefetch = 0 : i64, scratch_operands = 0 : i64, tpu.core_type = #tpu.core_type<tc>} {
    %c0 = arith.constant 0 : index
    %c0_0 = arith.constant 0 : index
    %c0_1 = arith.constant 0 : index
    %0 = vector.load %arg1[%c0, %c0_0, %c0_1] : memref<5x64x128xbf16, #tpu.memory_space<vmem>>, vector<1x64x128xbf16>
    %1 = vector.shape_cast %0 : vector<1x64x128xbf16> to vector<64x128xbf16>
    %c1 = arith.constant 1 : index
    %c0_2 = arith.constant 0 : index
    %c0_3 = arith.constant 0 : index
    %2 = vector.load %arg1[%c1, %c0_2, %c0_3] : memref<5x64x128xbf16, #tpu.memory_space<vmem>>, vector<1x64x128xbf16>
    %3 = vector.shape_cast %2 : vector<1x64x128xbf16> to vector<64x128xbf16>
    %c2 = arith.constant 2 : index
    %c0_4 = arith.constant 0 : index
    %c0_5 = arith.constant 0 : index
    %4 = vector.load %arg1[%c2, %c0_4, %c0_5] : memref<5x64x128xbf16, #tpu.memory_space<vmem>>, vector<1x64x128xbf16>
    %5 = vector.shape_cast %4 : vector<1x64x128xbf16> to vector<64x128xbf16>
    %c3 = arith.constant 3 : index
    %c0_6 = arith.constant 0 : index
    %c0_7 = arith.constant 0 : index
    %6 = vector.load %arg1[%c3, %c0_6, %c0_7] : memref<5x64x128xbf16, #tpu.memory_space<vmem>>, vector<1x64x128xbf16>
    %7 = vector.shape_cast %6 : vector<1x64x128xbf16> to vector<64x128xbf16>
    %c4 = arith.constant 4 : index
    %c0_8 = arith.constant 0 : index
    %c0_9 = arith.constant 0 : index
    %8 = vector.load %arg1[%c4, %c0_8, %c0_9] : memref<5x64x128xbf16, #tpu.memory_space<vmem>>, vector<1x64x128xbf16>
    %9 = vector.shape_cast %8 : vector<1x64x128xbf16> to vector<64x128xbf16>
    %c0_10 = arith.constant 0 : index
    %c0_11 = arith.constant 0 : index
    %c0_12 = arith.constant 0 : index
    %10 = vector.load %arg2[%c0_10, %c0_11, %c0_12] : memref<5x1x128xf32, #tpu.memory_space<vmem>>, vector<1x1x128xf32>
    %11 = vector.shape_cast %10 : vector<1x1x128xf32> to vector<1x128xf32>
    %c1_13 = arith.constant 1 : index
    %c0_14 = arith.constant 0 : index
    %c0_15 = arith.constant 0 : index
    %12 = vector.load %arg2[%c1_13, %c0_14, %c0_15] : memref<5x1x128xf32, #tpu.memory_space<vmem>>, vector<1x1x128xf32>
    %13 = vector.shape_cast %12 : vector<1x1x128xf32> to vector<1x128xf32>
    %c2_16 = arith.constant 2 : index
    %c0_17 = arith.constant 0 : index
    %c0_18 = arith.constant 0 : index
    %14 = vector.load %arg2[%c2_16, %c0_17, %c0_18] : memref<5x1x128xf32, #tpu.memory_space<vmem>>, vector<1x1x128xf32>
    %15 = vector.shape_cast %14 : vector<1x1x128xf32> to vector<1x128xf32>
    %c3_19 = arith.constant 3 : index
    %c0_20 = arith.constant 0 : index
    %c0_21 = arith.constant 0 : index
    %16 = vector.load %arg2[%c3_19, %c0_20, %c0_21] : memref<5x1x128xf32, #tpu.memory_space<vmem>>, vector<1x1x128xf32>
    %17 = vector.shape_cast %16 : vector<1x1x128xf32> to vector<1x128xf32>
    %c4_22 = arith.constant 4 : index
    %c0_23 = arith.constant 0 : index
    %c0_24 = arith.constant 0 : index
    %18 = vector.load %arg2[%c4_22, %c0_23, %c0_24] : memref<5x1x128xf32, #tpu.memory_space<vmem>>, vector<1x1x128xf32>
    %19 = vector.shape_cast %18 : vector<1x1x128xf32> to vector<1x128xf32>
    %cst = arith.constant 0.000000e+00 : f32
    %20 = vector.broadcast %cst : f32 to vector<8x32xf32>
    %c0_25 = arith.constant 0 : index
    %c0_26 = arith.constant 0 : index
    %c0_27 = arith.constant 0 : index
    %21 = vector.load %arg0[%c0_25, %c0_26, %c0_27] : memref<8x8x32xf32, #tpu.memory_space<vmem>>, vector<1x8x32xf32>
    %22 = vector.shape_cast %21 : vector<1x8x32xf32> to vector<8x32xf32>
    %23 = tpu.concatenate %22, %20 in 1 : vector<8x32xf32>, vector<8x32xf32> -> vector<8x64xf32>
    %24 = arith.truncf %23 : vector<8x64xf32> to vector<8x64xbf16>
    %cst_28 = arith.constant dense<0.000000e+00> : vector<8x128xf32>
    %25 = tpu.matmul %24, %1, %cst_28 {dimension_numbers = #tpu.dot_dimension_numbers<[1], [0], [0], [1], [0, 0, 1, 1], [], []>} : vector<8x64xbf16>, vector<64x128xbf16>, vector<8x128xf32> -> vector<8x128xf32>
    %26 = vector.broadcast %11 : vector<1x128xf32> to vector<8x128xf32>
    %27 = arith.addf %25, %26 : vector<8x128xf32>
    %28 = arith.negf %27 : vector<8x128xf32>
    %29 = math.exp %28 : vector<8x128xf32>
    %cst_29 = arith.constant 1.000000e+00 : f32
    %30 = vector.broadcast %cst_29 : f32 to vector<8x128xf32>
    %31 = arith.addf %30, %29 : vector<8x128xf32>
    %32 = arith.divf %30, %31 : vector<8x128xf32>
    %33 = vector.extract_strided_slice %32 {offsets = [0, 0], sizes = [8, 32], strides = [1, 1]} : vector<8x128xf32> to vector<8x32xf32>
    %34 = vector.extract_strided_slice %32 {offsets = [0, 32], sizes = [8, 32], strides = [1, 1]} : vector<8x128xf32> to vector<8x32xf32>
    %35 = vector.extract_strided_slice %32 {offsets = [0, 64], sizes = [8, 32], strides = [1, 1]} : vector<8x128xf32> to vector<8x32xf32>
    %cst_30 = arith.constant 2.000000e+00 : f32
    %36 = vector.broadcast %cst_30 : f32 to vector<8x32xf32>
    %37 = arith.mulf %36, %35 : vector<8x32xf32>
    %cst_31 = arith.constant 1.000000e+00 : f32
    %38 = vector.broadcast %cst_31 : f32 to vector<8x32xf32>
    %39 = arith.subf %37, %38 : vector<8x32xf32>
    %40 = vector.extract_strided_slice %32 {offsets = [0, 96], sizes = [8, 32], strides = [1, 1]} : vector<8x128xf32> to vector<8x32xf32>
    %41 = arith.mulf %20, %34 : vector<8x32xf32>
    %42 = arith.mulf %33, %39 : vector<8x32xf32>
    %43 = arith.addf %41, %42 : vector<8x32xf32>
    %44 = math.tanh %43 : vector<8x32xf32>
    %45 = arith.mulf %40, %44 : vector<8x32xf32>
    %c1_32 = arith.constant 1 : index
    %c0_33 = arith.constant 0 : index
    %c0_34 = arith.constant 0 : index
    %46 = vector.load %arg0[%c1_32, %c0_33, %c0_34] : memref<8x8x32xf32, #tpu.memory_space<vmem>>, vector<1x8x32xf32>
    %47 = vector.shape_cast %46 : vector<1x8x32xf32> to vector<8x32xf32>
    %48 = tpu.concatenate %47, %45 in 1 : vector<8x32xf32>, vector<8x32xf32> -> vector<8x64xf32>
    %49 = arith.truncf %48 : vector<8x64xf32> to vector<8x64xbf16>
    %cst_35 = arith.constant dense<0.000000e+00> : vector<8x128xf32>
    %50 = tpu.matmul %49, %1, %cst_35 {dimension_numbers = #tpu.dot_dimension_numbers<[1], [0], [0], [1], [0, 0, 1, 1], [], []>} : vector<8x64xbf16>, vector<64x128xbf16>, vector<8x128xf32> -> vector<8x128xf32>
    %51 = vector.broadcast %11 : vector<1x128xf32> to vector<8x128xf32>
    %52 = arith.addf %50, %51 : vector<8x128xf32>
    %53 = arith.negf %52 : vector<8x128xf32>
    %54 = math.exp %53 : vector<8x128xf32>
    %cst_36 = arith.constant 1.000000e+00 : f32
    %55 = vector.broadcast %cst_36 : f32 to vector<8x128xf32>
    %56 = arith.addf %55, %54 : vector<8x128xf32>
    %57 = arith.divf %55, %56 : vector<8x128xf32>
    %58 = vector.extract_strided_slice %57 {offsets = [0, 0], sizes = [8, 32], strides = [1, 1]} : vector<8x128xf32> to vector<8x32xf32>
    %59 = vector.extract_strided_slice %57 {offsets = [0, 32], sizes = [8, 32], strides = [1, 1]} : vector<8x128xf32> to vector<8x32xf32>
    %60 = vector.extract_strided_slice %57 {offsets = [0, 64], sizes = [8, 32], strides = [1, 1]} : vector<8x128xf32> to vector<8x32xf32>
    %cst_37 = arith.constant 2.000000e+00 : f32
    %61 = vector.broadcast %cst_37 : f32 to vector<8x32xf32>
    %62 = arith.mulf %61, %60 : vector<8x32xf32>
    %cst_38 = arith.constant 1.000000e+00 : f32
    %63 = vector.broadcast %cst_38 : f32 to vector<8x32xf32>
    %64 = arith.subf %62, %63 : vector<8x32xf32>
    %65 = vector.extract_strided_slice %57 {offsets = [0, 96], sizes = [8, 32], strides = [1, 1]} : vector<8x128xf32> to vector<8x32xf32>
    %66 = arith.mulf %43, %59 : vector<8x32xf32>
    %67 = arith.mulf %58, %64 : vector<8x32xf32>
    %68 = arith.addf %66, %67 : vector<8x32xf32>
    %69 = math.tanh %68 : vector<8x32xf32>
    %70 = arith.mulf %65, %69 : vector<8x32xf32>
    %71 = tpu.concatenate %45, %20 in 1 : vector<8x32xf32>, vector<8x32xf32> -> vector<8x64xf32>
    %72 = arith.truncf %71 : vector<8x64xf32> to vector<8x64xbf16>
    %cst_39 = arith.constant dense<0.000000e+00> : vector<8x128xf32>
    %73 = tpu.matmul %72, %3, %cst_39 {dimension_numbers = #tpu.dot_dimension_numbers<[1], [0], [0], [1], [0, 0, 1, 1], [], []>} : vector<8x64xbf16>, vector<64x128xbf16>, vector<8x128xf32> -> vector<8x128xf32>
    %74 = vector.broadcast %13 : vector<1x128xf32> to vector<8x128xf32>
    %75 = arith.addf %73, %74 : vector<8x128xf32>
    %76 = arith.negf %75 : vector<8x128xf32>
    %77 = math.exp %76 : vector<8x128xf32>
    %cst_40 = arith.constant 1.000000e+00 : f32
    %78 = vector.broadcast %cst_40 : f32 to vector<8x128xf32>
    %79 = arith.addf %78, %77 : vector<8x128xf32>
    %80 = arith.divf %78, %79 : vector<8x128xf32>
    %81 = vector.extract_strided_slice %80 {offsets = [0, 0], sizes = [8, 32], strides = [1, 1]} : vector<8x128xf32> to vector<8x32xf32>
    %82 = vector.extract_strided_slice %80 {offsets = [0, 32], sizes = [8, 32], strides = [1, 1]} : vector<8x128xf32> to vector<8x32xf32>
    %83 = vector.extract_strided_slice %80 {offsets = [0, 64], sizes = [8, 32], strides = [1, 1]} : vector<8x128xf32> to vector<8x32xf32>
    %cst_41 = arith.constant 2.000000e+00 : f32
    %84 = vector.broadcast %cst_41 : f32 to vector<8x32xf32>
    %85 = arith.mulf %84, %83 : vector<8x32xf32>
    %cst_42 = arith.constant 1.000000e+00 : f32
    %86 = vector.broadcast %cst_42 : f32 to vector<8x32xf32>
    %87 = arith.subf %85, %86 : vector<8x32xf32>
    %88 = vector.extract_strided_slice %80 {offsets = [0, 96], sizes = [8, 32], strides = [1, 1]} : vector<8x128xf32> to vector<8x32xf32>
    %89 = arith.mulf %20, %82 : vector<8x32xf32>
    %90 = arith.mulf %81, %87 : vector<8x32xf32>
    %91 = arith.addf %89, %90 : vector<8x32xf32>
    %92 = math.tanh %91 : vector<8x32xf32>
    %93 = arith.mulf %88, %92 : vector<8x32xf32>
    %c2_43 = arith.constant 2 : index
    %c0_44 = arith.constant 0 : index
    %c0_45 = arith.constant 0 : index
    %94 = vector.load %arg0[%c2_43, %c0_44, %c0_45] : memref<8x8x32xf32, #tpu.memory_space<vmem>>, vector<1x8x32xf32>
    %95 = vector.shape_cast %94 : vector<1x8x32xf32> to vector<8x32xf32>
    %96 = tpu.concatenate %95, %70 in 1 : vector<8x32xf32>, vector<8x32xf32> -> vector<8x64xf32>
    %97 = arith.truncf %96 : vector<8x64xf32> to vector<8x64xbf16>
    %cst_46 = arith.constant dense<0.000000e+00> : vector<8x128xf32>
    %98 = tpu.matmul %97, %1, %cst_46 {dimension_numbers = #tpu.dot_dimension_numbers<[1], [0], [0], [1], [0, 0, 1, 1], [], []>} : vector<8x64xbf16>, vector<64x128xbf16>, vector<8x128xf32> -> vector<8x128xf32>
    %99 = vector.broadcast %11 : vector<1x128xf32> to vector<8x128xf32>
    %100 = arith.addf %98, %99 : vector<8x128xf32>
    %101 = arith.negf %100 : vector<8x128xf32>
    %102 = math.exp %101 : vector<8x128xf32>
    %cst_47 = arith.constant 1.000000e+00 : f32
    %103 = vector.broadcast %cst_47 : f32 to vector<8x128xf32>
    %104 = arith.addf %103, %102 : vector<8x128xf32>
    %105 = arith.divf %103, %104 : vector<8x128xf32>
    %106 = vector.extract_strided_slice %105 {offsets = [0, 0], sizes = [8, 32], strides = [1, 1]} : vector<8x128xf32> to vector<8x32xf32>
    %107 = vector.extract_strided_slice %105 {offsets = [0, 32], sizes = [8, 32], strides = [1, 1]} : vector<8x128xf32> to vector<8x32xf32>
    %108 = vector.extract_strided_slice %105 {offsets = [0, 64], sizes = [8, 32], strides = [1, 1]} : vector<8x128xf32> to vector<8x32xf32>
    %cst_48 = arith.constant 2.000000e+00 : f32
    %109 = vector.broadcast %cst_48 : f32 to vector<8x32xf32>
    %110 = arith.mulf %109, %108 : vector<8x32xf32>
    %cst_49 = arith.constant 1.000000e+00 : f32
    %111 = vector.broadcast %cst_49 : f32 to vector<8x32xf32>
    %112 = arith.subf %110, %111 : vector<8x32xf32>
    %113 = vector.extract_strided_slice %105 {offsets = [0, 96], sizes = [8, 32], strides = [1, 1]} : vector<8x128xf32> to vector<8x32xf32>
    %114 = arith.mulf %68, %107 : vector<8x32xf32>
    %115 = arith.mulf %106, %112 : vector<8x32xf32>
    %116 = arith.addf %114, %115 : vector<8x32xf32>
    %117 = math.tanh %116 : vector<8x32xf32>
    %118 = arith.mulf %113, %117 : vector<8x32xf32>
    %119 = tpu.concatenate %70, %93 in 1 : vector<8x32xf32>, vector<8x32xf32> -> vector<8x64xf32>
    %120 = arith.truncf %119 : vector<8x64xf32> to vector<8x64xbf16>
    %cst_50 = arith.constant dense<0.000000e+00> : vector<8x128xf32>
    %121 = tpu.matmul %120, %3, %cst_50 {dimension_numbers = #tpu.dot_dimension_numbers<[1], [0], [0], [1], [0, 0, 1, 1], [], []>} : vector<8x64xbf16>, vector<64x128xbf16>, vector<8x128xf32> -> vector<8x128xf32>
    %122 = vector.broadcast %13 : vector<1x128xf32> to vector<8x128xf32>
    %123 = arith.addf %121, %122 : vector<8x128xf32>
    %124 = arith.negf %123 : vector<8x128xf32>
    %125 = math.exp %124 : vector<8x128xf32>
    %cst_51 = arith.constant 1.000000e+00 : f32
    %126 = vector.broadcast %cst_51 : f32 to vector<8x128xf32>
    %127 = arith.addf %126, %125 : vector<8x128xf32>
    %128 = arith.divf %126, %127 : vector<8x128xf32>
    %129 = vector.extract_strided_slice %128 {offsets = [0, 0], sizes = [8, 32], strides = [1, 1]} : vector<8x128xf32> to vector<8x32xf32>
    %130 = vector.extract_strided_slice %128 {offsets = [0, 32], sizes = [8, 32], strides = [1, 1]} : vector<8x128xf32> to vector<8x32xf32>
    %131 = vector.extract_strided_slice %128 {offsets = [0, 64], sizes = [8, 32], strides = [1, 1]} : vector<8x128xf32> to vector<8x32xf32>
    %cst_52 = arith.constant 2.000000e+00 : f32
    %132 = vector.broadcast %cst_52 : f32 to vector<8x32xf32>
    %133 = arith.mulf %132, %131 : vector<8x32xf32>
    %cst_53 = arith.constant 1.000000e+00 : f32
    %134 = vector.broadcast %cst_53 : f32 to vector<8x32xf32>
    %135 = arith.subf %133, %134 : vector<8x32xf32>
    %136 = vector.extract_strided_slice %128 {offsets = [0, 96], sizes = [8, 32], strides = [1, 1]} : vector<8x128xf32> to vector<8x32xf32>
    %137 = arith.mulf %91, %130 : vector<8x32xf32>
    %138 = arith.mulf %129, %135 : vector<8x32xf32>
    %139 = arith.addf %137, %138 : vector<8x32xf32>
    %140 = math.tanh %139 : vector<8x32xf32>
    %141 = arith.mulf %136, %140 : vector<8x32xf32>
    %142 = tpu.concatenate %93, %20 in 1 : vector<8x32xf32>, vector<8x32xf32> -> vector<8x64xf32>
    %143 = arith.truncf %142 : vector<8x64xf32> to vector<8x64xbf16>
    %cst_54 = arith.constant dense<0.000000e+00> : vector<8x128xf32>
    %144 = tpu.matmul %143, %5, %cst_54 {dimension_numbers = #tpu.dot_dimension_numbers<[1], [0], [0], [1], [0, 0, 1, 1], [], []>} : vector<8x64xbf16>, vector<64x128xbf16>, vector<8x128xf32> -> vector<8x128xf32>
    %145 = vector.broadcast %15 : vector<1x128xf32> to vector<8x128xf32>
    %146 = arith.addf %144, %145 : vector<8x128xf32>
    %147 = arith.negf %146 : vector<8x128xf32>
    %148 = math.exp %147 : vector<8x128xf32>
    %cst_55 = arith.constant 1.000000e+00 : f32
    %149 = vector.broadcast %cst_55 : f32 to vector<8x128xf32>
    %150 = arith.addf %149, %148 : vector<8x128xf32>
    %151 = arith.divf %149, %150 : vector<8x128xf32>
    %152 = vector.extract_strided_slice %151 {offsets = [0, 0], sizes = [8, 32], strides = [1, 1]} : vector<8x128xf32> to vector<8x32xf32>
    %153 = vector.extract_strided_slice %151 {offsets = [0, 32], sizes = [8, 32], strides = [1, 1]} : vector<8x128xf32> to vector<8x32xf32>
    %154 = vector.extract_strided_slice %151 {offsets = [0, 64], sizes = [8, 32], strides = [1, 1]} : vector<8x128xf32> to vector<8x32xf32>
    %cst_56 = arith.constant 2.000000e+00 : f32
    %155 = vector.broadcast %cst_56 : f32 to vector<8x32xf32>
    %156 = arith.mulf %155, %154 : vector<8x32xf32>
    %cst_57 = arith.constant 1.000000e+00 : f32
    %157 = vector.broadcast %cst_57 : f32 to vector<8x32xf32>
    %158 = arith.subf %156, %157 : vector<8x32xf32>
    %159 = vector.extract_strided_slice %151 {offsets = [0, 96], sizes = [8, 32], strides = [1, 1]} : vector<8x128xf32> to vector<8x32xf32>
    %160 = arith.mulf %20, %153 : vector<8x32xf32>
    %161 = arith.mulf %152, %158 : vector<8x32xf32>
    %162 = arith.addf %160, %161 : vector<8x32xf32>
    %163 = math.tanh %162 : vector<8x32xf32>
    %164 = arith.mulf %159, %163 : vector<8x32xf32>
    %c3_58 = arith.constant 3 : index
    %c0_59 = arith.constant 0 : index
    %c0_60 = arith.constant 0 : index
    %165 = vector.load %arg0[%c3_58, %c0_59, %c0_60] : memref<8x8x32xf32, #tpu.memory_space<vmem>>, vector<1x8x32xf32>
    %166 = vector.shape_cast %165 : vector<1x8x32xf32> to vector<8x32xf32>
    %167 = tpu.concatenate %166, %118 in 1 : vector<8x32xf32>, vector<8x32xf32> -> vector<8x64xf32>
    %168 = arith.truncf %167 : vector<8x64xf32> to vector<8x64xbf16>
    %cst_61 = arith.constant dense<0.000000e+00> : vector<8x128xf32>
    %169 = tpu.matmul %168, %1, %cst_61 {dimension_numbers = #tpu.dot_dimension_numbers<[1], [0], [0], [1], [0, 0, 1, 1], [], []>} : vector<8x64xbf16>, vector<64x128xbf16>, vector<8x128xf32> -> vector<8x128xf32>
    %170 = vector.broadcast %11 : vector<1x128xf32> to vector<8x128xf32>
    %171 = arith.addf %169, %170 : vector<8x128xf32>
    %172 = arith.negf %171 : vector<8x128xf32>
    %173 = math.exp %172 : vector<8x128xf32>
    %cst_62 = arith.constant 1.000000e+00 : f32
    %174 = vector.broadcast %cst_62 : f32 to vector<8x128xf32>
    %175 = arith.addf %174, %173 : vector<8x128xf32>
    %176 = arith.divf %174, %175 : vector<8x128xf32>
    %177 = vector.extract_strided_slice %176 {offsets = [0, 0], sizes = [8, 32], strides = [1, 1]} : vector<8x128xf32> to vector<8x32xf32>
    %178 = vector.extract_strided_slice %176 {offsets = [0, 32], sizes = [8, 32], strides = [1, 1]} : vector<8x128xf32> to vector<8x32xf32>
    %179 = vector.extract_strided_slice %176 {offsets = [0, 64], sizes = [8, 32], strides = [1, 1]} : vector<8x128xf32> to vector<8x32xf32>
    %cst_63 = arith.constant 2.000000e+00 : f32
    %180 = vector.broadcast %cst_63 : f32 to vector<8x32xf32>
    %181 = arith.mulf %180, %179 : vector<8x32xf32>
    %cst_64 = arith.constant 1.000000e+00 : f32
    %182 = vector.broadcast %cst_64 : f32 to vector<8x32xf32>
    %183 = arith.subf %181, %182 : vector<8x32xf32>
    %184 = vector.extract_strided_slice %176 {offsets = [0, 96], sizes = [8, 32], strides = [1, 1]} : vector<8x128xf32> to vector<8x32xf32>
    %185 = arith.mulf %116, %178 : vector<8x32xf32>
    %186 = arith.mulf %177, %183 : vector<8x32xf32>
    %187 = arith.addf %185, %186 : vector<8x32xf32>
    %188 = math.tanh %187 : vector<8x32xf32>
    %189 = arith.mulf %184, %188 : vector<8x32xf32>
    %190 = tpu.concatenate %118, %141 in 1 : vector<8x32xf32>, vector<8x32xf32> -> vector<8x64xf32>
    %191 = arith.truncf %190 : vector<8x64xf32> to vector<8x64xbf16>
    %cst_65 = arith.constant dense<0.000000e+00> : vector<8x128xf32>
    %192 = tpu.matmul %191, %3, %cst_65 {dimension_numbers = #tpu.dot_dimension_numbers<[1], [0], [0], [1], [0, 0, 1, 1], [], []>} : vector<8x64xbf16>, vector<64x128xbf16>, vector<8x128xf32> -> vector<8x128xf32>
    %193 = vector.broadcast %13 : vector<1x128xf32> to vector<8x128xf32>
    %194 = arith.addf %192, %193 : vector<8x128xf32>
    %195 = arith.negf %194 : vector<8x128xf32>
    %196 = math.exp %195 : vector<8x128xf32>
    %cst_66 = arith.constant 1.000000e+00 : f32
    %197 = vector.broadcast %cst_66 : f32 to vector<8x128xf32>
    %198 = arith.addf %197, %196 : vector<8x128xf32>
    %199 = arith.divf %197, %198 : vector<8x128xf32>
    %200 = vector.extract_strided_slice %199 {offsets = [0, 0], sizes = [8, 32], strides = [1, 1]} : vector<8x128xf32> to vector<8x32xf32>
    %201 = vector.extract_strided_slice %199 {offsets = [0, 32], sizes = [8, 32], strides = [1, 1]} : vector<8x128xf32> to vector<8x32xf32>
    %202 = vector.extract_strided_slice %199 {offsets = [0, 64], sizes = [8, 32], strides = [1, 1]} : vector<8x128xf32> to vector<8x32xf32>
    %cst_67 = arith.constant 2.000000e+00 : f32
    %203 = vector.broadcast %cst_67 : f32 to vector<8x32xf32>
    %204 = arith.mulf %203, %202 : vector<8x32xf32>
    %cst_68 = arith.constant 1.000000e+00 : f32
    %205 = vector.broadcast %cst_68 : f32 to vector<8x32xf32>
    %206 = arith.subf %204, %205 : vector<8x32xf32>
    %207 = vector.extract_strided_slice %199 {offsets = [0, 96], sizes = [8, 32], strides = [1, 1]} : vector<8x128xf32> to vector<8x32xf32>
    %208 = arith.mulf %139, %201 : vector<8x32xf32>
    %209 = arith.mulf %200, %206 : vector<8x32xf32>
    %210 = arith.addf %208, %209 : vector<8x32xf32>
    %211 = math.tanh %210 : vector<8x32xf32>
    %212 = arith.mulf %207, %211 : vector<8x32xf32>
    %213 = tpu.concatenate %141, %164 in 1 : vector<8x32xf32>, vector<8x32xf32> -> vector<8x64xf32>
    %214 = arith.truncf %213 : vector<8x64xf32> to vector<8x64xbf16>
    %cst_69 = arith.constant dense<0.000000e+00> : vector<8x128xf32>
    %215 = tpu.matmul %214, %5, %cst_69 {dimension_numbers = #tpu.dot_dimension_numbers<[1], [0], [0], [1], [0, 0, 1, 1], [], []>} : vector<8x64xbf16>, vector<64x128xbf16>, vector<8x128xf32> -> vector<8x128xf32>
    %216 = vector.broadcast %15 : vector<1x128xf32> to vector<8x128xf32>
    %217 = arith.addf %215, %216 : vector<8x128xf32>
    %218 = arith.negf %217 : vector<8x128xf32>
    %219 = math.exp %218 : vector<8x128xf32>
    %cst_70 = arith.constant 1.000000e+00 : f32
    %220 = vector.broadcast %cst_70 : f32 to vector<8x128xf32>
    %221 = arith.addf %220, %219 : vector<8x128xf32>
    %222 = arith.divf %220, %221 : vector<8x128xf32>
    %223 = vector.extract_strided_slice %222 {offsets = [0, 0], sizes = [8, 32], strides = [1, 1]} : vector<8x128xf32> to vector<8x32xf32>
    %224 = vector.extract_strided_slice %222 {offsets = [0, 32], sizes = [8, 32], strides = [1, 1]} : vector<8x128xf32> to vector<8x32xf32>
    %225 = vector.extract_strided_slice %222 {offsets = [0, 64], sizes = [8, 32], strides = [1, 1]} : vector<8x128xf32> to vector<8x32xf32>
    %cst_71 = arith.constant 2.000000e+00 : f32
    %226 = vector.broadcast %cst_71 : f32 to vector<8x32xf32>
    %227 = arith.mulf %226, %225 : vector<8x32xf32>
    %cst_72 = arith.constant 1.000000e+00 : f32
    %228 = vector.broadcast %cst_72 : f32 to vector<8x32xf32>
    %229 = arith.subf %227, %228 : vector<8x32xf32>
    %230 = vector.extract_strided_slice %222 {offsets = [0, 96], sizes = [8, 32], strides = [1, 1]} : vector<8x128xf32> to vector<8x32xf32>
    %231 = arith.mulf %162, %224 : vector<8x32xf32>
    %232 = arith.mulf %223, %229 : vector<8x32xf32>
    %233 = arith.addf %231, %232 : vector<8x32xf32>
    %234 = math.tanh %233 : vector<8x32xf32>
    %235 = arith.mulf %230, %234 : vector<8x32xf32>
    %236 = tpu.concatenate %164, %20 in 1 : vector<8x32xf32>, vector<8x32xf32> -> vector<8x64xf32>
    %237 = arith.truncf %236 : vector<8x64xf32> to vector<8x64xbf16>
    %cst_73 = arith.constant dense<0.000000e+00> : vector<8x128xf32>
    %238 = tpu.matmul %237, %7, %cst_73 {dimension_numbers = #tpu.dot_dimension_numbers<[1], [0], [0], [1], [0, 0, 1, 1], [], []>} : vector<8x64xbf16>, vector<64x128xbf16>, vector<8x128xf32> -> vector<8x128xf32>
    %239 = vector.broadcast %17 : vector<1x128xf32> to vector<8x128xf32>
    %240 = arith.addf %238, %239 : vector<8x128xf32>
    %241 = arith.negf %240 : vector<8x128xf32>
    %242 = math.exp %241 : vector<8x128xf32>
    %cst_74 = arith.constant 1.000000e+00 : f32
    %243 = vector.broadcast %cst_74 : f32 to vector<8x128xf32>
    %244 = arith.addf %243, %242 : vector<8x128xf32>
    %245 = arith.divf %243, %244 : vector<8x128xf32>
    %246 = vector.extract_strided_slice %245 {offsets = [0, 0], sizes = [8, 32], strides = [1, 1]} : vector<8x128xf32> to vector<8x32xf32>
    %247 = vector.extract_strided_slice %245 {offsets = [0, 32], sizes = [8, 32], strides = [1, 1]} : vector<8x128xf32> to vector<8x32xf32>
    %248 = vector.extract_strided_slice %245 {offsets = [0, 64], sizes = [8, 32], strides = [1, 1]} : vector<8x128xf32> to vector<8x32xf32>
    %cst_75 = arith.constant 2.000000e+00 : f32
    %249 = vector.broadcast %cst_75 : f32 to vector<8x32xf32>
    %250 = arith.mulf %249, %248 : vector<8x32xf32>
    %cst_76 = arith.constant 1.000000e+00 : f32
    %251 = vector.broadcast %cst_76 : f32 to vector<8x32xf32>
    %252 = arith.subf %250, %251 : vector<8x32xf32>
    %253 = vector.extract_strided_slice %245 {offsets = [0, 96], sizes = [8, 32], strides = [1, 1]} : vector<8x128xf32> to vector<8x32xf32>
    %254 = arith.mulf %20, %247 : vector<8x32xf32>
    %255 = arith.mulf %246, %252 : vector<8x32xf32>
    %256 = arith.addf %254, %255 : vector<8x32xf32>
    %257 = math.tanh %256 : vector<8x32xf32>
    %258 = arith.mulf %253, %257 : vector<8x32xf32>
    %c4_77 = arith.constant 4 : index
    %c0_78 = arith.constant 0 : index
    %c0_79 = arith.constant 0 : index
    %259 = vector.load %arg0[%c4_77, %c0_78, %c0_79] : memref<8x8x32xf32, #tpu.memory_space<vmem>>, vector<1x8x32xf32>
    %260 = vector.shape_cast %259 : vector<1x8x32xf32> to vector<8x32xf32>
    %261 = tpu.concatenate %260, %189 in 1 : vector<8x32xf32>, vector<8x32xf32> -> vector<8x64xf32>
    %262 = arith.truncf %261 : vector<8x64xf32> to vector<8x64xbf16>
    %cst_80 = arith.constant dense<0.000000e+00> : vector<8x128xf32>
    %263 = tpu.matmul %262, %1, %cst_80 {dimension_numbers = #tpu.dot_dimension_numbers<[1], [0], [0], [1], [0, 0, 1, 1], [], []>} : vector<8x64xbf16>, vector<64x128xbf16>, vector<8x128xf32> -> vector<8x128xf32>
    %264 = vector.broadcast %11 : vector<1x128xf32> to vector<8x128xf32>
    %265 = arith.addf %263, %264 : vector<8x128xf32>
    %266 = arith.negf %265 : vector<8x128xf32>
    %267 = math.exp %266 : vector<8x128xf32>
    %cst_81 = arith.constant 1.000000e+00 : f32
    %268 = vector.broadcast %cst_81 : f32 to vector<8x128xf32>
    %269 = arith.addf %268, %267 : vector<8x128xf32>
    %270 = arith.divf %268, %269 : vector<8x128xf32>
    %271 = vector.extract_strided_slice %270 {offsets = [0, 0], sizes = [8, 32], strides = [1, 1]} : vector<8x128xf32> to vector<8x32xf32>
    %272 = vector.extract_strided_slice %270 {offsets = [0, 32], sizes = [8, 32], strides = [1, 1]} : vector<8x128xf32> to vector<8x32xf32>
    %273 = vector.extract_strided_slice %270 {offsets = [0, 64], sizes = [8, 32], strides = [1, 1]} : vector<8x128xf32> to vector<8x32xf32>
    %cst_82 = arith.constant 2.000000e+00 : f32
    %274 = vector.broadcast %cst_82 : f32 to vector<8x32xf32>
    %275 = arith.mulf %274, %273 : vector<8x32xf32>
    %cst_83 = arith.constant 1.000000e+00 : f32
    %276 = vector.broadcast %cst_83 : f32 to vector<8x32xf32>
    %277 = arith.subf %275, %276 : vector<8x32xf32>
    %278 = vector.extract_strided_slice %270 {offsets = [0, 96], sizes = [8, 32], strides = [1, 1]} : vector<8x128xf32> to vector<8x32xf32>
    %279 = arith.mulf %187, %272 : vector<8x32xf32>
    %280 = arith.mulf %271, %277 : vector<8x32xf32>
    %281 = arith.addf %279, %280 : vector<8x32xf32>
    %282 = math.tanh %281 : vector<8x32xf32>
    %283 = arith.mulf %278, %282 : vector<8x32xf32>
    %284 = tpu.concatenate %189, %212 in 1 : vector<8x32xf32>, vector<8x32xf32> -> vector<8x64xf32>
    %285 = arith.truncf %284 : vector<8x64xf32> to vector<8x64xbf16>
    %cst_84 = arith.constant dense<0.000000e+00> : vector<8x128xf32>
    %286 = tpu.matmul %285, %3, %cst_84 {dimension_numbers = #tpu.dot_dimension_numbers<[1], [0], [0], [1], [0, 0, 1, 1], [], []>} : vector<8x64xbf16>, vector<64x128xbf16>, vector<8x128xf32> -> vector<8x128xf32>
    %287 = vector.broadcast %13 : vector<1x128xf32> to vector<8x128xf32>
    %288 = arith.addf %286, %287 : vector<8x128xf32>
    %289 = arith.negf %288 : vector<8x128xf32>
    %290 = math.exp %289 : vector<8x128xf32>
    %cst_85 = arith.constant 1.000000e+00 : f32
    %291 = vector.broadcast %cst_85 : f32 to vector<8x128xf32>
    %292 = arith.addf %291, %290 : vector<8x128xf32>
    %293 = arith.divf %291, %292 : vector<8x128xf32>
    %294 = vector.extract_strided_slice %293 {offsets = [0, 0], sizes = [8, 32], strides = [1, 1]} : vector<8x128xf32> to vector<8x32xf32>
    %295 = vector.extract_strided_slice %293 {offsets = [0, 32], sizes = [8, 32], strides = [1, 1]} : vector<8x128xf32> to vector<8x32xf32>
    %296 = vector.extract_strided_slice %293 {offsets = [0, 64], sizes = [8, 32], strides = [1, 1]} : vector<8x128xf32> to vector<8x32xf32>
    %cst_86 = arith.constant 2.000000e+00 : f32
    %297 = vector.broadcast %cst_86 : f32 to vector<8x32xf32>
    %298 = arith.mulf %297, %296 : vector<8x32xf32>
    %cst_87 = arith.constant 1.000000e+00 : f32
    %299 = vector.broadcast %cst_87 : f32 to vector<8x32xf32>
    %300 = arith.subf %298, %299 : vector<8x32xf32>
    %301 = vector.extract_strided_slice %293 {offsets = [0, 96], sizes = [8, 32], strides = [1, 1]} : vector<8x128xf32> to vector<8x32xf32>
    %302 = arith.mulf %210, %295 : vector<8x32xf32>
    %303 = arith.mulf %294, %300 : vector<8x32xf32>
    %304 = arith.addf %302, %303 : vector<8x32xf32>
    %305 = math.tanh %304 : vector<8x32xf32>
    %306 = arith.mulf %301, %305 : vector<8x32xf32>
    %307 = tpu.concatenate %212, %235 in 1 : vector<8x32xf32>, vector<8x32xf32> -> vector<8x64xf32>
    %308 = arith.truncf %307 : vector<8x64xf32> to vector<8x64xbf16>
    %cst_88 = arith.constant dense<0.000000e+00> : vector<8x128xf32>
    %309 = tpu.matmul %308, %5, %cst_88 {dimension_numbers = #tpu.dot_dimension_numbers<[1], [0], [0], [1], [0, 0, 1, 1], [], []>} : vector<8x64xbf16>, vector<64x128xbf16>, vector<8x128xf32> -> vector<8x128xf32>
    %310 = vector.broadcast %15 : vector<1x128xf32> to vector<8x128xf32>
    %311 = arith.addf %309, %310 : vector<8x128xf32>
    %312 = arith.negf %311 : vector<8x128xf32>
    %313 = math.exp %312 : vector<8x128xf32>
    %cst_89 = arith.constant 1.000000e+00 : f32
    %314 = vector.broadcast %cst_89 : f32 to vector<8x128xf32>
    %315 = arith.addf %314, %313 : vector<8x128xf32>
    %316 = arith.divf %314, %315 : vector<8x128xf32>
    %317 = vector.extract_strided_slice %316 {offsets = [0, 0], sizes = [8, 32], strides = [1, 1]} : vector<8x128xf32> to vector<8x32xf32>
    %318 = vector.extract_strided_slice %316 {offsets = [0, 32], sizes = [8, 32], strides = [1, 1]} : vector<8x128xf32> to vector<8x32xf32>
    %319 = vector.extract_strided_slice %316 {offsets = [0, 64], sizes = [8, 32], strides = [1, 1]} : vector<8x128xf32> to vector<8x32xf32>
    %cst_90 = arith.constant 2.000000e+00 : f32
    %320 = vector.broadcast %cst_90 : f32 to vector<8x32xf32>
    %321 = arith.mulf %320, %319 : vector<8x32xf32>
    %cst_91 = arith.constant 1.000000e+00 : f32
    %322 = vector.broadcast %cst_91 : f32 to vector<8x32xf32>
    %323 = arith.subf %321, %322 : vector<8x32xf32>
    %324 = vector.extract_strided_slice %316 {offsets = [0, 96], sizes = [8, 32], strides = [1, 1]} : vector<8x128xf32> to vector<8x32xf32>
    %325 = arith.mulf %233, %318 : vector<8x32xf32>
    %326 = arith.mulf %317, %323 : vector<8x32xf32>
    %327 = arith.addf %325, %326 : vector<8x32xf32>
    %328 = math.tanh %327 : vector<8x32xf32>
    %329 = arith.mulf %324, %328 : vector<8x32xf32>
    %330 = tpu.concatenate %235, %258 in 1 : vector<8x32xf32>, vector<8x32xf32> -> vector<8x64xf32>
    %331 = arith.truncf %330 : vector<8x64xf32> to vector<8x64xbf16>
    %cst_92 = arith.constant dense<0.000000e+00> : vector<8x128xf32>
    %332 = tpu.matmul %331, %7, %cst_92 {dimension_numbers = #tpu.dot_dimension_numbers<[1], [0], [0], [1], [0, 0, 1, 1], [], []>} : vector<8x64xbf16>, vector<64x128xbf16>, vector<8x128xf32> -> vector<8x128xf32>
    %333 = vector.broadcast %17 : vector<1x128xf32> to vector<8x128xf32>
    %334 = arith.addf %332, %333 : vector<8x128xf32>
    %335 = arith.negf %334 : vector<8x128xf32>
    %336 = math.exp %335 : vector<8x128xf32>
    %cst_93 = arith.constant 1.000000e+00 : f32
    %337 = vector.broadcast %cst_93 : f32 to vector<8x128xf32>
    %338 = arith.addf %337, %336 : vector<8x128xf32>
    %339 = arith.divf %337, %338 : vector<8x128xf32>
    %340 = vector.extract_strided_slice %339 {offsets = [0, 0], sizes = [8, 32], strides = [1, 1]} : vector<8x128xf32> to vector<8x32xf32>
    %341 = vector.extract_strided_slice %339 {offsets = [0, 32], sizes = [8, 32], strides = [1, 1]} : vector<8x128xf32> to vector<8x32xf32>
    %342 = vector.extract_strided_slice %339 {offsets = [0, 64], sizes = [8, 32], strides = [1, 1]} : vector<8x128xf32> to vector<8x32xf32>
    %cst_94 = arith.constant 2.000000e+00 : f32
    %343 = vector.broadcast %cst_94 : f32 to vector<8x32xf32>
    %344 = arith.mulf %343, %342 : vector<8x32xf32>
    %cst_95 = arith.constant 1.000000e+00 : f32
    %345 = vector.broadcast %cst_95 : f32 to vector<8x32xf32>
    %346 = arith.subf %344, %345 : vector<8x32xf32>
    %347 = vector.extract_strided_slice %339 {offsets = [0, 96], sizes = [8, 32], strides = [1, 1]} : vector<8x128xf32> to vector<8x32xf32>
    %348 = arith.mulf %256, %341 : vector<8x32xf32>
    %349 = arith.mulf %340, %346 : vector<8x32xf32>
    %350 = arith.addf %348, %349 : vector<8x32xf32>
    %351 = math.tanh %350 : vector<8x32xf32>
    %352 = arith.mulf %347, %351 : vector<8x32xf32>
    %353 = tpu.concatenate %258, %20 in 1 : vector<8x32xf32>, vector<8x32xf32> -> vector<8x64xf32>
    %354 = arith.truncf %353 : vector<8x64xf32> to vector<8x64xbf16>
    %cst_96 = arith.constant dense<0.000000e+00> : vector<8x128xf32>
    %355 = tpu.matmul %354, %9, %cst_96 {dimension_numbers = #tpu.dot_dimension_numbers<[1], [0], [0], [1], [0, 0, 1, 1], [], []>} : vector<8x64xbf16>, vector<64x128xbf16>, vector<8x128xf32> -> vector<8x128xf32>
    %356 = vector.broadcast %19 : vector<1x128xf32> to vector<8x128xf32>
    %357 = arith.addf %355, %356 : vector<8x128xf32>
    %358 = arith.negf %357 : vector<8x128xf32>
    %359 = math.exp %358 : vector<8x128xf32>
    %cst_97 = arith.constant 1.000000e+00 : f32
    %360 = vector.broadcast %cst_97 : f32 to vector<8x128xf32>
    %361 = arith.addf %360, %359 : vector<8x128xf32>
    %362 = arith.divf %360, %361 : vector<8x128xf32>
    %363 = vector.extract_strided_slice %362 {offsets = [0, 0], sizes = [8, 32], strides = [1, 1]} : vector<8x128xf32> to vector<8x32xf32>
    %364 = vector.extract_strided_slice %362 {offsets = [0, 32], sizes = [8, 32], strides = [1, 1]} : vector<8x128xf32> to vector<8x32xf32>
    %365 = vector.extract_strided_slice %362 {offsets = [0, 64], sizes = [8, 32], strides = [1, 1]} : vector<8x128xf32> to vector<8x32xf32>
    %cst_98 = arith.constant 2.000000e+00 : f32
    %366 = vector.broadcast %cst_98 : f32 to vector<8x32xf32>
    %367 = arith.mulf %366, %365 : vector<8x32xf32>
    %cst_99 = arith.constant 1.000000e+00 : f32
    %368 = vector.broadcast %cst_99 : f32 to vector<8x32xf32>
    %369 = arith.subf %367, %368 : vector<8x32xf32>
    %370 = vector.extract_strided_slice %362 {offsets = [0, 96], sizes = [8, 32], strides = [1, 1]} : vector<8x128xf32> to vector<8x32xf32>
    %371 = arith.mulf %20, %364 : vector<8x32xf32>
    %372 = arith.mulf %363, %369 : vector<8x32xf32>
    %373 = arith.addf %371, %372 : vector<8x32xf32>
    %374 = math.tanh %373 : vector<8x32xf32>
    %375 = arith.mulf %370, %374 : vector<8x32xf32>
    %c5 = arith.constant 5 : index
    %c0_100 = arith.constant 0 : index
    %c0_101 = arith.constant 0 : index
    %376 = vector.load %arg0[%c5, %c0_100, %c0_101] : memref<8x8x32xf32, #tpu.memory_space<vmem>>, vector<1x8x32xf32>
    %377 = vector.shape_cast %376 : vector<1x8x32xf32> to vector<8x32xf32>
    %378 = tpu.concatenate %377, %283 in 1 : vector<8x32xf32>, vector<8x32xf32> -> vector<8x64xf32>
    %379 = arith.truncf %378 : vector<8x64xf32> to vector<8x64xbf16>
    %cst_102 = arith.constant dense<0.000000e+00> : vector<8x128xf32>
    %380 = tpu.matmul %379, %1, %cst_102 {dimension_numbers = #tpu.dot_dimension_numbers<[1], [0], [0], [1], [0, 0, 1, 1], [], []>} : vector<8x64xbf16>, vector<64x128xbf16>, vector<8x128xf32> -> vector<8x128xf32>
    %381 = vector.broadcast %11 : vector<1x128xf32> to vector<8x128xf32>
    %382 = arith.addf %380, %381 : vector<8x128xf32>
    %383 = arith.negf %382 : vector<8x128xf32>
    %384 = math.exp %383 : vector<8x128xf32>
    %cst_103 = arith.constant 1.000000e+00 : f32
    %385 = vector.broadcast %cst_103 : f32 to vector<8x128xf32>
    %386 = arith.addf %385, %384 : vector<8x128xf32>
    %387 = arith.divf %385, %386 : vector<8x128xf32>
    %388 = vector.extract_strided_slice %387 {offsets = [0, 0], sizes = [8, 32], strides = [1, 1]} : vector<8x128xf32> to vector<8x32xf32>
    %389 = vector.extract_strided_slice %387 {offsets = [0, 32], sizes = [8, 32], strides = [1, 1]} : vector<8x128xf32> to vector<8x32xf32>
    %390 = vector.extract_strided_slice %387 {offsets = [0, 64], sizes = [8, 32], strides = [1, 1]} : vector<8x128xf32> to vector<8x32xf32>
    %cst_104 = arith.constant 2.000000e+00 : f32
    %391 = vector.broadcast %cst_104 : f32 to vector<8x32xf32>
    %392 = arith.mulf %391, %390 : vector<8x32xf32>
    %cst_105 = arith.constant 1.000000e+00 : f32
    %393 = vector.broadcast %cst_105 : f32 to vector<8x32xf32>
    %394 = arith.subf %392, %393 : vector<8x32xf32>
    %395 = vector.extract_strided_slice %387 {offsets = [0, 96], sizes = [8, 32], strides = [1, 1]} : vector<8x128xf32> to vector<8x32xf32>
    %396 = arith.mulf %281, %389 : vector<8x32xf32>
    %397 = arith.mulf %388, %394 : vector<8x32xf32>
    %398 = arith.addf %396, %397 : vector<8x32xf32>
    %399 = math.tanh %398 : vector<8x32xf32>
    %400 = arith.mulf %395, %399 : vector<8x32xf32>
    %401 = tpu.concatenate %283, %306 in 1 : vector<8x32xf32>, vector<8x32xf32> -> vector<8x64xf32>
    %402 = arith.truncf %401 : vector<8x64xf32> to vector<8x64xbf16>
    %cst_106 = arith.constant dense<0.000000e+00> : vector<8x128xf32>
    %403 = tpu.matmul %402, %3, %cst_106 {dimension_numbers = #tpu.dot_dimension_numbers<[1], [0], [0], [1], [0, 0, 1, 1], [], []>} : vector<8x64xbf16>, vector<64x128xbf16>, vector<8x128xf32> -> vector<8x128xf32>
    %404 = vector.broadcast %13 : vector<1x128xf32> to vector<8x128xf32>
    %405 = arith.addf %403, %404 : vector<8x128xf32>
    %406 = arith.negf %405 : vector<8x128xf32>
    %407 = math.exp %406 : vector<8x128xf32>
    %cst_107 = arith.constant 1.000000e+00 : f32
    %408 = vector.broadcast %cst_107 : f32 to vector<8x128xf32>
    %409 = arith.addf %408, %407 : vector<8x128xf32>
    %410 = arith.divf %408, %409 : vector<8x128xf32>
    %411 = vector.extract_strided_slice %410 {offsets = [0, 0], sizes = [8, 32], strides = [1, 1]} : vector<8x128xf32> to vector<8x32xf32>
    %412 = vector.extract_strided_slice %410 {offsets = [0, 32], sizes = [8, 32], strides = [1, 1]} : vector<8x128xf32> to vector<8x32xf32>
    %413 = vector.extract_strided_slice %410 {offsets = [0, 64], sizes = [8, 32], strides = [1, 1]} : vector<8x128xf32> to vector<8x32xf32>
    %cst_108 = arith.constant 2.000000e+00 : f32
    %414 = vector.broadcast %cst_108 : f32 to vector<8x32xf32>
    %415 = arith.mulf %414, %413 : vector<8x32xf32>
    %cst_109 = arith.constant 1.000000e+00 : f32
    %416 = vector.broadcast %cst_109 : f32 to vector<8x32xf32>
    %417 = arith.subf %415, %416 : vector<8x32xf32>
    %418 = vector.extract_strided_slice %410 {offsets = [0, 96], sizes = [8, 32], strides = [1, 1]} : vector<8x128xf32> to vector<8x32xf32>
    %419 = arith.mulf %304, %412 : vector<8x32xf32>
    %420 = arith.mulf %411, %417 : vector<8x32xf32>
    %421 = arith.addf %419, %420 : vector<8x32xf32>
    %422 = math.tanh %421 : vector<8x32xf32>
    %423 = arith.mulf %418, %422 : vector<8x32xf32>
    %424 = tpu.concatenate %306, %329 in 1 : vector<8x32xf32>, vector<8x32xf32> -> vector<8x64xf32>
    %425 = arith.truncf %424 : vector<8x64xf32> to vector<8x64xbf16>
    %cst_110 = arith.constant dense<0.000000e+00> : vector<8x128xf32>
    %426 = tpu.matmul %425, %5, %cst_110 {dimension_numbers = #tpu.dot_dimension_numbers<[1], [0], [0], [1], [0, 0, 1, 1], [], []>} : vector<8x64xbf16>, vector<64x128xbf16>, vector<8x128xf32> -> vector<8x128xf32>
    %427 = vector.broadcast %15 : vector<1x128xf32> to vector<8x128xf32>
    %428 = arith.addf %426, %427 : vector<8x128xf32>
    %429 = arith.negf %428 : vector<8x128xf32>
    %430 = math.exp %429 : vector<8x128xf32>
    %cst_111 = arith.constant 1.000000e+00 : f32
    %431 = vector.broadcast %cst_111 : f32 to vector<8x128xf32>
    %432 = arith.addf %431, %430 : vector<8x128xf32>
    %433 = arith.divf %431, %432 : vector<8x128xf32>
    %434 = vector.extract_strided_slice %433 {offsets = [0, 0], sizes = [8, 32], strides = [1, 1]} : vector<8x128xf32> to vector<8x32xf32>
    %435 = vector.extract_strided_slice %433 {offsets = [0, 32], sizes = [8, 32], strides = [1, 1]} : vector<8x128xf32> to vector<8x32xf32>
    %436 = vector.extract_strided_slice %433 {offsets = [0, 64], sizes = [8, 32], strides = [1, 1]} : vector<8x128xf32> to vector<8x32xf32>
    %cst_112 = arith.constant 2.000000e+00 : f32
    %437 = vector.broadcast %cst_112 : f32 to vector<8x32xf32>
    %438 = arith.mulf %437, %436 : vector<8x32xf32>
    %cst_113 = arith.constant 1.000000e+00 : f32
    %439 = vector.broadcast %cst_113 : f32 to vector<8x32xf32>
    %440 = arith.subf %438, %439 : vector<8x32xf32>
    %441 = vector.extract_strided_slice %433 {offsets = [0, 96], sizes = [8, 32], strides = [1, 1]} : vector<8x128xf32> to vector<8x32xf32>
    %442 = arith.mulf %327, %435 : vector<8x32xf32>
    %443 = arith.mulf %434, %440 : vector<8x32xf32>
    %444 = arith.addf %442, %443 : vector<8x32xf32>
    %445 = math.tanh %444 : vector<8x32xf32>
    %446 = arith.mulf %441, %445 : vector<8x32xf32>
    %447 = tpu.concatenate %329, %352 in 1 : vector<8x32xf32>, vector<8x32xf32> -> vector<8x64xf32>
    %448 = arith.truncf %447 : vector<8x64xf32> to vector<8x64xbf16>
    %cst_114 = arith.constant dense<0.000000e+00> : vector<8x128xf32>
    %449 = tpu.matmul %448, %7, %cst_114 {dimension_numbers = #tpu.dot_dimension_numbers<[1], [0], [0], [1], [0, 0, 1, 1], [], []>} : vector<8x64xbf16>, vector<64x128xbf16>, vector<8x128xf32> -> vector<8x128xf32>
    %450 = vector.broadcast %17 : vector<1x128xf32> to vector<8x128xf32>
    %451 = arith.addf %449, %450 : vector<8x128xf32>
    %452 = arith.negf %451 : vector<8x128xf32>
    %453 = math.exp %452 : vector<8x128xf32>
    %cst_115 = arith.constant 1.000000e+00 : f32
    %454 = vector.broadcast %cst_115 : f32 to vector<8x128xf32>
    %455 = arith.addf %454, %453 : vector<8x128xf32>
    %456 = arith.divf %454, %455 : vector<8x128xf32>
    %457 = vector.extract_strided_slice %456 {offsets = [0, 0], sizes = [8, 32], strides = [1, 1]} : vector<8x128xf32> to vector<8x32xf32>
    %458 = vector.extract_strided_slice %456 {offsets = [0, 32], sizes = [8, 32], strides = [1, 1]} : vector<8x128xf32> to vector<8x32xf32>
    %459 = vector.extract_strided_slice %456 {offsets = [0, 64], sizes = [8, 32], strides = [1, 1]} : vector<8x128xf32> to vector<8x32xf32>
    %cst_116 = arith.constant 2.000000e+00 : f32
    %460 = vector.broadcast %cst_116 : f32 to vector<8x32xf32>
    %461 = arith.mulf %460, %459 : vector<8x32xf32>
    %cst_117 = arith.constant 1.000000e+00 : f32
    %462 = vector.broadcast %cst_117 : f32 to vector<8x32xf32>
    %463 = arith.subf %461, %462 : vector<8x32xf32>
    %464 = vector.extract_strided_slice %456 {offsets = [0, 96], sizes = [8, 32], strides = [1, 1]} : vector<8x128xf32> to vector<8x32xf32>
    %465 = arith.mulf %350, %458 : vector<8x32xf32>
    %466 = arith.mulf %457, %463 : vector<8x32xf32>
    %467 = arith.addf %465, %466 : vector<8x32xf32>
    %468 = math.tanh %467 : vector<8x32xf32>
    %469 = arith.mulf %464, %468 : vector<8x32xf32>
    %470 = tpu.concatenate %352, %375 in 1 : vector<8x32xf32>, vector<8x32xf32> -> vector<8x64xf32>
    %471 = arith.truncf %470 : vector<8x64xf32> to vector<8x64xbf16>
    %cst_118 = arith.constant dense<0.000000e+00> : vector<8x128xf32>
    %472 = tpu.matmul %471, %9, %cst_118 {dimension_numbers = #tpu.dot_dimension_numbers<[1], [0], [0], [1], [0, 0, 1, 1], [], []>} : vector<8x64xbf16>, vector<64x128xbf16>, vector<8x128xf32> -> vector<8x128xf32>
    %473 = vector.broadcast %19 : vector<1x128xf32> to vector<8x128xf32>
    %474 = arith.addf %472, %473 : vector<8x128xf32>
    %475 = arith.negf %474 : vector<8x128xf32>
    %476 = math.exp %475 : vector<8x128xf32>
    %cst_119 = arith.constant 1.000000e+00 : f32
    %477 = vector.broadcast %cst_119 : f32 to vector<8x128xf32>
    %478 = arith.addf %477, %476 : vector<8x128xf32>
    %479 = arith.divf %477, %478 : vector<8x128xf32>
    %480 = vector.extract_strided_slice %479 {offsets = [0, 0], sizes = [8, 32], strides = [1, 1]} : vector<8x128xf32> to vector<8x32xf32>
    %481 = vector.extract_strided_slice %479 {offsets = [0, 32], sizes = [8, 32], strides = [1, 1]} : vector<8x128xf32> to vector<8x32xf32>
    %482 = vector.extract_strided_slice %479 {offsets = [0, 64], sizes = [8, 32], strides = [1, 1]} : vector<8x128xf32> to vector<8x32xf32>
    %cst_120 = arith.constant 2.000000e+00 : f32
    %483 = vector.broadcast %cst_120 : f32 to vector<8x32xf32>
    %484 = arith.mulf %483, %482 : vector<8x32xf32>
    %cst_121 = arith.constant 1.000000e+00 : f32
    %485 = vector.broadcast %cst_121 : f32 to vector<8x32xf32>
    %486 = arith.subf %484, %485 : vector<8x32xf32>
    %487 = vector.extract_strided_slice %479 {offsets = [0, 96], sizes = [8, 32], strides = [1, 1]} : vector<8x128xf32> to vector<8x32xf32>
    %488 = arith.mulf %373, %481 : vector<8x32xf32>
    %489 = arith.mulf %480, %486 : vector<8x32xf32>
    %490 = arith.addf %488, %489 : vector<8x32xf32>
    %491 = math.tanh %490 : vector<8x32xf32>
    %492 = arith.mulf %487, %491 : vector<8x32xf32>
    %c6 = arith.constant 6 : index
    %c0_122 = arith.constant 0 : index
    %c0_123 = arith.constant 0 : index
    %493 = vector.load %arg0[%c6, %c0_122, %c0_123] : memref<8x8x32xf32, #tpu.memory_space<vmem>>, vector<1x8x32xf32>
    %494 = vector.shape_cast %493 : vector<1x8x32xf32> to vector<8x32xf32>
    %495 = tpu.concatenate %494, %400 in 1 : vector<8x32xf32>, vector<8x32xf32> -> vector<8x64xf32>
    %496 = arith.truncf %495 : vector<8x64xf32> to vector<8x64xbf16>
    %cst_124 = arith.constant dense<0.000000e+00> : vector<8x128xf32>
    %497 = tpu.matmul %496, %1, %cst_124 {dimension_numbers = #tpu.dot_dimension_numbers<[1], [0], [0], [1], [0, 0, 1, 1], [], []>} : vector<8x64xbf16>, vector<64x128xbf16>, vector<8x128xf32> -> vector<8x128xf32>
    %498 = vector.broadcast %11 : vector<1x128xf32> to vector<8x128xf32>
    %499 = arith.addf %497, %498 : vector<8x128xf32>
    %500 = arith.negf %499 : vector<8x128xf32>
    %501 = math.exp %500 : vector<8x128xf32>
    %cst_125 = arith.constant 1.000000e+00 : f32
    %502 = vector.broadcast %cst_125 : f32 to vector<8x128xf32>
    %503 = arith.addf %502, %501 : vector<8x128xf32>
    %504 = arith.divf %502, %503 : vector<8x128xf32>
    %505 = vector.extract_strided_slice %504 {offsets = [0, 0], sizes = [8, 32], strides = [1, 1]} : vector<8x128xf32> to vector<8x32xf32>
    %506 = vector.extract_strided_slice %504 {offsets = [0, 32], sizes = [8, 32], strides = [1, 1]} : vector<8x128xf32> to vector<8x32xf32>
    %507 = vector.extract_strided_slice %504 {offsets = [0, 64], sizes = [8, 32], strides = [1, 1]} : vector<8x128xf32> to vector<8x32xf32>
    %cst_126 = arith.constant 2.000000e+00 : f32
    %508 = vector.broadcast %cst_126 : f32 to vector<8x32xf32>
    %509 = arith.mulf %508, %507 : vector<8x32xf32>
    %cst_127 = arith.constant 1.000000e+00 : f32
    %510 = vector.broadcast %cst_127 : f32 to vector<8x32xf32>
    %511 = arith.subf %509, %510 : vector<8x32xf32>
    %512 = vector.extract_strided_slice %504 {offsets = [0, 96], sizes = [8, 32], strides = [1, 1]} : vector<8x128xf32> to vector<8x32xf32>
    %513 = arith.mulf %398, %506 : vector<8x32xf32>
    %514 = arith.mulf %505, %511 : vector<8x32xf32>
    %515 = arith.addf %513, %514 : vector<8x32xf32>
    %516 = math.tanh %515 : vector<8x32xf32>
    %517 = arith.mulf %512, %516 : vector<8x32xf32>
    %518 = tpu.concatenate %400, %423 in 1 : vector<8x32xf32>, vector<8x32xf32> -> vector<8x64xf32>
    %519 = arith.truncf %518 : vector<8x64xf32> to vector<8x64xbf16>
    %cst_128 = arith.constant dense<0.000000e+00> : vector<8x128xf32>
    %520 = tpu.matmul %519, %3, %cst_128 {dimension_numbers = #tpu.dot_dimension_numbers<[1], [0], [0], [1], [0, 0, 1, 1], [], []>} : vector<8x64xbf16>, vector<64x128xbf16>, vector<8x128xf32> -> vector<8x128xf32>
    %521 = vector.broadcast %13 : vector<1x128xf32> to vector<8x128xf32>
    %522 = arith.addf %520, %521 : vector<8x128xf32>
    %523 = arith.negf %522 : vector<8x128xf32>
    %524 = math.exp %523 : vector<8x128xf32>
    %cst_129 = arith.constant 1.000000e+00 : f32
    %525 = vector.broadcast %cst_129 : f32 to vector<8x128xf32>
    %526 = arith.addf %525, %524 : vector<8x128xf32>
    %527 = arith.divf %525, %526 : vector<8x128xf32>
    %528 = vector.extract_strided_slice %527 {offsets = [0, 0], sizes = [8, 32], strides = [1, 1]} : vector<8x128xf32> to vector<8x32xf32>
    %529 = vector.extract_strided_slice %527 {offsets = [0, 32], sizes = [8, 32], strides = [1, 1]} : vector<8x128xf32> to vector<8x32xf32>
    %530 = vector.extract_strided_slice %527 {offsets = [0, 64], sizes = [8, 32], strides = [1, 1]} : vector<8x128xf32> to vector<8x32xf32>
    %cst_130 = arith.constant 2.000000e+00 : f32
    %531 = vector.broadcast %cst_130 : f32 to vector<8x32xf32>
    %532 = arith.mulf %531, %530 : vector<8x32xf32>
    %cst_131 = arith.constant 1.000000e+00 : f32
    %533 = vector.broadcast %cst_131 : f32 to vector<8x32xf32>
    %534 = arith.subf %532, %533 : vector<8x32xf32>
    %535 = vector.extract_strided_slice %527 {offsets = [0, 96], sizes = [8, 32], strides = [1, 1]} : vector<8x128xf32> to vector<8x32xf32>
    %536 = arith.mulf %421, %529 : vector<8x32xf32>
    %537 = arith.mulf %528, %534 : vector<8x32xf32>
    %538 = arith.addf %536, %537 : vector<8x32xf32>
    %539 = math.tanh %538 : vector<8x32xf32>
    %540 = arith.mulf %535, %539 : vector<8x32xf32>
    %541 = tpu.concatenate %423, %446 in 1 : vector<8x32xf32>, vector<8x32xf32> -> vector<8x64xf32>
    %542 = arith.truncf %541 : vector<8x64xf32> to vector<8x64xbf16>
    %cst_132 = arith.constant dense<0.000000e+00> : vector<8x128xf32>
    %543 = tpu.matmul %542, %5, %cst_132 {dimension_numbers = #tpu.dot_dimension_numbers<[1], [0], [0], [1], [0, 0, 1, 1], [], []>} : vector<8x64xbf16>, vector<64x128xbf16>, vector<8x128xf32> -> vector<8x128xf32>
    %544 = vector.broadcast %15 : vector<1x128xf32> to vector<8x128xf32>
    %545 = arith.addf %543, %544 : vector<8x128xf32>
    %546 = arith.negf %545 : vector<8x128xf32>
    %547 = math.exp %546 : vector<8x128xf32>
    %cst_133 = arith.constant 1.000000e+00 : f32
    %548 = vector.broadcast %cst_133 : f32 to vector<8x128xf32>
    %549 = arith.addf %548, %547 : vector<8x128xf32>
    %550 = arith.divf %548, %549 : vector<8x128xf32>
    %551 = vector.extract_strided_slice %550 {offsets = [0, 0], sizes = [8, 32], strides = [1, 1]} : vector<8x128xf32> to vector<8x32xf32>
    %552 = vector.extract_strided_slice %550 {offsets = [0, 32], sizes = [8, 32], strides = [1, 1]} : vector<8x128xf32> to vector<8x32xf32>
    %553 = vector.extract_strided_slice %550 {offsets = [0, 64], sizes = [8, 32], strides = [1, 1]} : vector<8x128xf32> to vector<8x32xf32>
    %cst_134 = arith.constant 2.000000e+00 : f32
    %554 = vector.broadcast %cst_134 : f32 to vector<8x32xf32>
    %555 = arith.mulf %554, %553 : vector<8x32xf32>
    %cst_135 = arith.constant 1.000000e+00 : f32
    %556 = vector.broadcast %cst_135 : f32 to vector<8x32xf32>
    %557 = arith.subf %555, %556 : vector<8x32xf32>
    %558 = vector.extract_strided_slice %550 {offsets = [0, 96], sizes = [8, 32], strides = [1, 1]} : vector<8x128xf32> to vector<8x32xf32>
    %559 = arith.mulf %444, %552 : vector<8x32xf32>
    %560 = arith.mulf %551, %557 : vector<8x32xf32>
    %561 = arith.addf %559, %560 : vector<8x32xf32>
    %562 = math.tanh %561 : vector<8x32xf32>
    %563 = arith.mulf %558, %562 : vector<8x32xf32>
    %564 = tpu.concatenate %446, %469 in 1 : vector<8x32xf32>, vector<8x32xf32> -> vector<8x64xf32>
    %565 = arith.truncf %564 : vector<8x64xf32> to vector<8x64xbf16>
    %cst_136 = arith.constant dense<0.000000e+00> : vector<8x128xf32>
    %566 = tpu.matmul %565, %7, %cst_136 {dimension_numbers = #tpu.dot_dimension_numbers<[1], [0], [0], [1], [0, 0, 1, 1], [], []>} : vector<8x64xbf16>, vector<64x128xbf16>, vector<8x128xf32> -> vector<8x128xf32>
    %567 = vector.broadcast %17 : vector<1x128xf32> to vector<8x128xf32>
    %568 = arith.addf %566, %567 : vector<8x128xf32>
    %569 = arith.negf %568 : vector<8x128xf32>
    %570 = math.exp %569 : vector<8x128xf32>
    %cst_137 = arith.constant 1.000000e+00 : f32
    %571 = vector.broadcast %cst_137 : f32 to vector<8x128xf32>
    %572 = arith.addf %571, %570 : vector<8x128xf32>
    %573 = arith.divf %571, %572 : vector<8x128xf32>
    %574 = vector.extract_strided_slice %573 {offsets = [0, 0], sizes = [8, 32], strides = [1, 1]} : vector<8x128xf32> to vector<8x32xf32>
    %575 = vector.extract_strided_slice %573 {offsets = [0, 32], sizes = [8, 32], strides = [1, 1]} : vector<8x128xf32> to vector<8x32xf32>
    %576 = vector.extract_strided_slice %573 {offsets = [0, 64], sizes = [8, 32], strides = [1, 1]} : vector<8x128xf32> to vector<8x32xf32>
    %cst_138 = arith.constant 2.000000e+00 : f32
    %577 = vector.broadcast %cst_138 : f32 to vector<8x32xf32>
    %578 = arith.mulf %577, %576 : vector<8x32xf32>
    %cst_139 = arith.constant 1.000000e+00 : f32
    %579 = vector.broadcast %cst_139 : f32 to vector<8x32xf32>
    %580 = arith.subf %578, %579 : vector<8x32xf32>
    %581 = vector.extract_strided_slice %573 {offsets = [0, 96], sizes = [8, 32], strides = [1, 1]} : vector<8x128xf32> to vector<8x32xf32>
    %582 = arith.mulf %467, %575 : vector<8x32xf32>
    %583 = arith.mulf %574, %580 : vector<8x32xf32>
    %584 = arith.addf %582, %583 : vector<8x32xf32>
    %585 = math.tanh %584 : vector<8x32xf32>
    %586 = arith.mulf %581, %585 : vector<8x32xf32>
    %587 = tpu.concatenate %469, %492 in 1 : vector<8x32xf32>, vector<8x32xf32> -> vector<8x64xf32>
    %588 = arith.truncf %587 : vector<8x64xf32> to vector<8x64xbf16>
    %cst_140 = arith.constant dense<0.000000e+00> : vector<8x128xf32>
    %589 = tpu.matmul %588, %9, %cst_140 {dimension_numbers = #tpu.dot_dimension_numbers<[1], [0], [0], [1], [0, 0, 1, 1], [], []>} : vector<8x64xbf16>, vector<64x128xbf16>, vector<8x128xf32> -> vector<8x128xf32>
    %590 = vector.broadcast %19 : vector<1x128xf32> to vector<8x128xf32>
    %591 = arith.addf %589, %590 : vector<8x128xf32>
    %592 = arith.negf %591 : vector<8x128xf32>
    %593 = math.exp %592 : vector<8x128xf32>
    %cst_141 = arith.constant 1.000000e+00 : f32
    %594 = vector.broadcast %cst_141 : f32 to vector<8x128xf32>
    %595 = arith.addf %594, %593 : vector<8x128xf32>
    %596 = arith.divf %594, %595 : vector<8x128xf32>
    %597 = vector.extract_strided_slice %596 {offsets = [0, 0], sizes = [8, 32], strides = [1, 1]} : vector<8x128xf32> to vector<8x32xf32>
    %598 = vector.extract_strided_slice %596 {offsets = [0, 32], sizes = [8, 32], strides = [1, 1]} : vector<8x128xf32> to vector<8x32xf32>
    %599 = vector.extract_strided_slice %596 {offsets = [0, 64], sizes = [8, 32], strides = [1, 1]} : vector<8x128xf32> to vector<8x32xf32>
    %cst_142 = arith.constant 2.000000e+00 : f32
    %600 = vector.broadcast %cst_142 : f32 to vector<8x32xf32>
    %601 = arith.mulf %600, %599 : vector<8x32xf32>
    %cst_143 = arith.constant 1.000000e+00 : f32
    %602 = vector.broadcast %cst_143 : f32 to vector<8x32xf32>
    %603 = arith.subf %601, %602 : vector<8x32xf32>
    %604 = vector.extract_strided_slice %596 {offsets = [0, 96], sizes = [8, 32], strides = [1, 1]} : vector<8x128xf32> to vector<8x32xf32>
    %605 = arith.mulf %490, %598 : vector<8x32xf32>
    %606 = arith.mulf %597, %603 : vector<8x32xf32>
    %607 = arith.addf %605, %606 : vector<8x32xf32>
    %608 = math.tanh %607 : vector<8x32xf32>
    %609 = arith.mulf %604, %608 : vector<8x32xf32>
    %c7 = arith.constant 7 : index
    %c0_144 = arith.constant 0 : index
    %c0_145 = arith.constant 0 : index
    %610 = vector.load %arg0[%c7, %c0_144, %c0_145] : memref<8x8x32xf32, #tpu.memory_space<vmem>>, vector<1x8x32xf32>
    %611 = vector.shape_cast %610 : vector<1x8x32xf32> to vector<8x32xf32>
    %612 = tpu.concatenate %611, %517 in 1 : vector<8x32xf32>, vector<8x32xf32> -> vector<8x64xf32>
    %613 = arith.truncf %612 : vector<8x64xf32> to vector<8x64xbf16>
    %cst_146 = arith.constant dense<0.000000e+00> : vector<8x128xf32>
    %614 = tpu.matmul %613, %1, %cst_146 {dimension_numbers = #tpu.dot_dimension_numbers<[1], [0], [0], [1], [0, 0, 1, 1], [], []>} : vector<8x64xbf16>, vector<64x128xbf16>, vector<8x128xf32> -> vector<8x128xf32>
    %615 = vector.broadcast %11 : vector<1x128xf32> to vector<8x128xf32>
    %616 = arith.addf %614, %615 : vector<8x128xf32>
    %617 = arith.negf %616 : vector<8x128xf32>
    %618 = math.exp %617 : vector<8x128xf32>
    %cst_147 = arith.constant 1.000000e+00 : f32
    %619 = vector.broadcast %cst_147 : f32 to vector<8x128xf32>
    %620 = arith.addf %619, %618 : vector<8x128xf32>
    %621 = arith.divf %619, %620 : vector<8x128xf32>
    %622 = vector.extract_strided_slice %621 {offsets = [0, 0], sizes = [8, 32], strides = [1, 1]} : vector<8x128xf32> to vector<8x32xf32>
    %623 = vector.extract_strided_slice %621 {offsets = [0, 32], sizes = [8, 32], strides = [1, 1]} : vector<8x128xf32> to vector<8x32xf32>
    %624 = vector.extract_strided_slice %621 {offsets = [0, 64], sizes = [8, 32], strides = [1, 1]} : vector<8x128xf32> to vector<8x32xf32>
    %cst_148 = arith.constant 2.000000e+00 : f32
    %625 = vector.broadcast %cst_148 : f32 to vector<8x32xf32>
    %626 = arith.mulf %625, %624 : vector<8x32xf32>
    %cst_149 = arith.constant 1.000000e+00 : f32
    %627 = vector.broadcast %cst_149 : f32 to vector<8x32xf32>
    %628 = arith.subf %626, %627 : vector<8x32xf32>
    %629 = vector.extract_strided_slice %621 {offsets = [0, 96], sizes = [8, 32], strides = [1, 1]} : vector<8x128xf32> to vector<8x32xf32>
    %630 = arith.mulf %515, %623 : vector<8x32xf32>
    %631 = arith.mulf %622, %628 : vector<8x32xf32>
    %632 = arith.addf %630, %631 : vector<8x32xf32>
    %633 = math.tanh %632 : vector<8x32xf32>
    %634 = arith.mulf %629, %633 : vector<8x32xf32>
    %635 = tpu.concatenate %517, %540 in 1 : vector<8x32xf32>, vector<8x32xf32> -> vector<8x64xf32>
    %636 = arith.truncf %635 : vector<8x64xf32> to vector<8x64xbf16>
    %cst_150 = arith.constant dense<0.000000e+00> : vector<8x128xf32>
    %637 = tpu.matmul %636, %3, %cst_150 {dimension_numbers = #tpu.dot_dimension_numbers<[1], [0], [0], [1], [0, 0, 1, 1], [], []>} : vector<8x64xbf16>, vector<64x128xbf16>, vector<8x128xf32> -> vector<8x128xf32>
    %638 = vector.broadcast %13 : vector<1x128xf32> to vector<8x128xf32>
    %639 = arith.addf %637, %638 : vector<8x128xf32>
    %640 = arith.negf %639 : vector<8x128xf32>
    %641 = math.exp %640 : vector<8x128xf32>
    %cst_151 = arith.constant 1.000000e+00 : f32
    %642 = vector.broadcast %cst_151 : f32 to vector<8x128xf32>
    %643 = arith.addf %642, %641 : vector<8x128xf32>
    %644 = arith.divf %642, %643 : vector<8x128xf32>
    %645 = vector.extract_strided_slice %644 {offsets = [0, 0], sizes = [8, 32], strides = [1, 1]} : vector<8x128xf32> to vector<8x32xf32>
    %646 = vector.extract_strided_slice %644 {offsets = [0, 32], sizes = [8, 32], strides = [1, 1]} : vector<8x128xf32> to vector<8x32xf32>
    %647 = vector.extract_strided_slice %644 {offsets = [0, 64], sizes = [8, 32], strides = [1, 1]} : vector<8x128xf32> to vector<8x32xf32>
    %cst_152 = arith.constant 2.000000e+00 : f32
    %648 = vector.broadcast %cst_152 : f32 to vector<8x32xf32>
    %649 = arith.mulf %648, %647 : vector<8x32xf32>
    %cst_153 = arith.constant 1.000000e+00 : f32
    %650 = vector.broadcast %cst_153 : f32 to vector<8x32xf32>
    %651 = arith.subf %649, %650 : vector<8x32xf32>
    %652 = vector.extract_strided_slice %644 {offsets = [0, 96], sizes = [8, 32], strides = [1, 1]} : vector<8x128xf32> to vector<8x32xf32>
    %653 = arith.mulf %538, %646 : vector<8x32xf32>
    %654 = arith.mulf %645, %651 : vector<8x32xf32>
    %655 = arith.addf %653, %654 : vector<8x32xf32>
    %656 = math.tanh %655 : vector<8x32xf32>
    %657 = arith.mulf %652, %656 : vector<8x32xf32>
    %658 = tpu.concatenate %540, %563 in 1 : vector<8x32xf32>, vector<8x32xf32> -> vector<8x64xf32>
    %659 = arith.truncf %658 : vector<8x64xf32> to vector<8x64xbf16>
    %cst_154 = arith.constant dense<0.000000e+00> : vector<8x128xf32>
    %660 = tpu.matmul %659, %5, %cst_154 {dimension_numbers = #tpu.dot_dimension_numbers<[1], [0], [0], [1], [0, 0, 1, 1], [], []>} : vector<8x64xbf16>, vector<64x128xbf16>, vector<8x128xf32> -> vector<8x128xf32>
    %661 = vector.broadcast %15 : vector<1x128xf32> to vector<8x128xf32>
    %662 = arith.addf %660, %661 : vector<8x128xf32>
    %663 = arith.negf %662 : vector<8x128xf32>
    %664 = math.exp %663 : vector<8x128xf32>
    %cst_155 = arith.constant 1.000000e+00 : f32
    %665 = vector.broadcast %cst_155 : f32 to vector<8x128xf32>
    %666 = arith.addf %665, %664 : vector<8x128xf32>
    %667 = arith.divf %665, %666 : vector<8x128xf32>
    %668 = vector.extract_strided_slice %667 {offsets = [0, 0], sizes = [8, 32], strides = [1, 1]} : vector<8x128xf32> to vector<8x32xf32>
    %669 = vector.extract_strided_slice %667 {offsets = [0, 32], sizes = [8, 32], strides = [1, 1]} : vector<8x128xf32> to vector<8x32xf32>
    %670 = vector.extract_strided_slice %667 {offsets = [0, 64], sizes = [8, 32], strides = [1, 1]} : vector<8x128xf32> to vector<8x32xf32>
    %cst_156 = arith.constant 2.000000e+00 : f32
    %671 = vector.broadcast %cst_156 : f32 to vector<8x32xf32>
    %672 = arith.mulf %671, %670 : vector<8x32xf32>
    %cst_157 = arith.constant 1.000000e+00 : f32
    %673 = vector.broadcast %cst_157 : f32 to vector<8x32xf32>
    %674 = arith.subf %672, %673 : vector<8x32xf32>
    %675 = vector.extract_strided_slice %667 {offsets = [0, 96], sizes = [8, 32], strides = [1, 1]} : vector<8x128xf32> to vector<8x32xf32>
    %676 = arith.mulf %561, %669 : vector<8x32xf32>
    %677 = arith.mulf %668, %674 : vector<8x32xf32>
    %678 = arith.addf %676, %677 : vector<8x32xf32>
    %679 = math.tanh %678 : vector<8x32xf32>
    %680 = arith.mulf %675, %679 : vector<8x32xf32>
    %681 = tpu.concatenate %563, %586 in 1 : vector<8x32xf32>, vector<8x32xf32> -> vector<8x64xf32>
    %682 = arith.truncf %681 : vector<8x64xf32> to vector<8x64xbf16>
    %cst_158 = arith.constant dense<0.000000e+00> : vector<8x128xf32>
    %683 = tpu.matmul %682, %7, %cst_158 {dimension_numbers = #tpu.dot_dimension_numbers<[1], [0], [0], [1], [0, 0, 1, 1], [], []>} : vector<8x64xbf16>, vector<64x128xbf16>, vector<8x128xf32> -> vector<8x128xf32>
    %684 = vector.broadcast %17 : vector<1x128xf32> to vector<8x128xf32>
    %685 = arith.addf %683, %684 : vector<8x128xf32>
    %686 = arith.negf %685 : vector<8x128xf32>
    %687 = math.exp %686 : vector<8x128xf32>
    %cst_159 = arith.constant 1.000000e+00 : f32
    %688 = vector.broadcast %cst_159 : f32 to vector<8x128xf32>
    %689 = arith.addf %688, %687 : vector<8x128xf32>
    %690 = arith.divf %688, %689 : vector<8x128xf32>
    %691 = vector.extract_strided_slice %690 {offsets = [0, 0], sizes = [8, 32], strides = [1, 1]} : vector<8x128xf32> to vector<8x32xf32>
    %692 = vector.extract_strided_slice %690 {offsets = [0, 32], sizes = [8, 32], strides = [1, 1]} : vector<8x128xf32> to vector<8x32xf32>
    %693 = vector.extract_strided_slice %690 {offsets = [0, 64], sizes = [8, 32], strides = [1, 1]} : vector<8x128xf32> to vector<8x32xf32>
    %cst_160 = arith.constant 2.000000e+00 : f32
    %694 = vector.broadcast %cst_160 : f32 to vector<8x32xf32>
    %695 = arith.mulf %694, %693 : vector<8x32xf32>
    %cst_161 = arith.constant 1.000000e+00 : f32
    %696 = vector.broadcast %cst_161 : f32 to vector<8x32xf32>
    %697 = arith.subf %695, %696 : vector<8x32xf32>
    %698 = vector.extract_strided_slice %690 {offsets = [0, 96], sizes = [8, 32], strides = [1, 1]} : vector<8x128xf32> to vector<8x32xf32>
    %699 = arith.mulf %584, %692 : vector<8x32xf32>
    %700 = arith.mulf %691, %697 : vector<8x32xf32>
    %701 = arith.addf %699, %700 : vector<8x32xf32>
    %702 = math.tanh %701 : vector<8x32xf32>
    %703 = arith.mulf %698, %702 : vector<8x32xf32>
    %704 = tpu.concatenate %586, %609 in 1 : vector<8x32xf32>, vector<8x32xf32> -> vector<8x64xf32>
    %705 = arith.truncf %704 : vector<8x64xf32> to vector<8x64xbf16>
    %cst_162 = arith.constant dense<0.000000e+00> : vector<8x128xf32>
    %706 = tpu.matmul %705, %9, %cst_162 {dimension_numbers = #tpu.dot_dimension_numbers<[1], [0], [0], [1], [0, 0, 1, 1], [], []>} : vector<8x64xbf16>, vector<64x128xbf16>, vector<8x128xf32> -> vector<8x128xf32>
    %707 = vector.broadcast %19 : vector<1x128xf32> to vector<8x128xf32>
    %708 = arith.addf %706, %707 : vector<8x128xf32>
    %709 = arith.negf %708 : vector<8x128xf32>
    %710 = math.exp %709 : vector<8x128xf32>
    %cst_163 = arith.constant 1.000000e+00 : f32
    %711 = vector.broadcast %cst_163 : f32 to vector<8x128xf32>
    %712 = arith.addf %711, %710 : vector<8x128xf32>
    %713 = arith.divf %711, %712 : vector<8x128xf32>
    %714 = vector.extract_strided_slice %713 {offsets = [0, 0], sizes = [8, 32], strides = [1, 1]} : vector<8x128xf32> to vector<8x32xf32>
    %715 = vector.extract_strided_slice %713 {offsets = [0, 32], sizes = [8, 32], strides = [1, 1]} : vector<8x128xf32> to vector<8x32xf32>
    %716 = vector.extract_strided_slice %713 {offsets = [0, 64], sizes = [8, 32], strides = [1, 1]} : vector<8x128xf32> to vector<8x32xf32>
    %cst_164 = arith.constant 2.000000e+00 : f32
    %717 = vector.broadcast %cst_164 : f32 to vector<8x32xf32>
    %718 = arith.mulf %717, %716 : vector<8x32xf32>
    %cst_165 = arith.constant 1.000000e+00 : f32
    %719 = vector.broadcast %cst_165 : f32 to vector<8x32xf32>
    %720 = arith.subf %718, %719 : vector<8x32xf32>
    %721 = vector.extract_strided_slice %713 {offsets = [0, 96], sizes = [8, 32], strides = [1, 1]} : vector<8x128xf32> to vector<8x32xf32>
    %722 = arith.mulf %607, %715 : vector<8x32xf32>
    %723 = arith.mulf %714, %720 : vector<8x32xf32>
    %724 = arith.addf %722, %723 : vector<8x32xf32>
    %725 = math.tanh %724 : vector<8x32xf32>
    %726 = arith.mulf %721, %725 : vector<8x32xf32>
    %727 = tpu.concatenate %634, %657 in 1 : vector<8x32xf32>, vector<8x32xf32> -> vector<8x64xf32>
    %728 = arith.truncf %727 : vector<8x64xf32> to vector<8x64xbf16>
    %cst_166 = arith.constant dense<0.000000e+00> : vector<8x128xf32>
    %729 = tpu.matmul %728, %3, %cst_166 {dimension_numbers = #tpu.dot_dimension_numbers<[1], [0], [0], [1], [0, 0, 1, 1], [], []>} : vector<8x64xbf16>, vector<64x128xbf16>, vector<8x128xf32> -> vector<8x128xf32>
    %730 = vector.broadcast %13 : vector<1x128xf32> to vector<8x128xf32>
    %731 = arith.addf %729, %730 : vector<8x128xf32>
    %732 = arith.negf %731 : vector<8x128xf32>
    %733 = math.exp %732 : vector<8x128xf32>
    %cst_167 = arith.constant 1.000000e+00 : f32
    %734 = vector.broadcast %cst_167 : f32 to vector<8x128xf32>
    %735 = arith.addf %734, %733 : vector<8x128xf32>
    %736 = arith.divf %734, %735 : vector<8x128xf32>
    %737 = vector.extract_strided_slice %736 {offsets = [0, 0], sizes = [8, 32], strides = [1, 1]} : vector<8x128xf32> to vector<8x32xf32>
    %738 = vector.extract_strided_slice %736 {offsets = [0, 32], sizes = [8, 32], strides = [1, 1]} : vector<8x128xf32> to vector<8x32xf32>
    %739 = vector.extract_strided_slice %736 {offsets = [0, 64], sizes = [8, 32], strides = [1, 1]} : vector<8x128xf32> to vector<8x32xf32>
    %cst_168 = arith.constant 2.000000e+00 : f32
    %740 = vector.broadcast %cst_168 : f32 to vector<8x32xf32>
    %741 = arith.mulf %740, %739 : vector<8x32xf32>
    %cst_169 = arith.constant 1.000000e+00 : f32
    %742 = vector.broadcast %cst_169 : f32 to vector<8x32xf32>
    %743 = arith.subf %741, %742 : vector<8x32xf32>
    %744 = vector.extract_strided_slice %736 {offsets = [0, 96], sizes = [8, 32], strides = [1, 1]} : vector<8x128xf32> to vector<8x32xf32>
    %745 = arith.mulf %655, %738 : vector<8x32xf32>
    %746 = arith.mulf %737, %743 : vector<8x32xf32>
    %747 = arith.addf %745, %746 : vector<8x32xf32>
    %748 = math.tanh %747 : vector<8x32xf32>
    %749 = arith.mulf %744, %748 : vector<8x32xf32>
    %750 = tpu.concatenate %657, %680 in 1 : vector<8x32xf32>, vector<8x32xf32> -> vector<8x64xf32>
    %751 = arith.truncf %750 : vector<8x64xf32> to vector<8x64xbf16>
    %cst_170 = arith.constant dense<0.000000e+00> : vector<8x128xf32>
    %752 = tpu.matmul %751, %5, %cst_170 {dimension_numbers = #tpu.dot_dimension_numbers<[1], [0], [0], [1], [0, 0, 1, 1], [], []>} : vector<8x64xbf16>, vector<64x128xbf16>, vector<8x128xf32> -> vector<8x128xf32>
    %753 = vector.broadcast %15 : vector<1x128xf32> to vector<8x128xf32>
    %754 = arith.addf %752, %753 : vector<8x128xf32>
    %755 = arith.negf %754 : vector<8x128xf32>
    %756 = math.exp %755 : vector<8x128xf32>
    %cst_171 = arith.constant 1.000000e+00 : f32
    %757 = vector.broadcast %cst_171 : f32 to vector<8x128xf32>
    %758 = arith.addf %757, %756 : vector<8x128xf32>
    %759 = arith.divf %757, %758 : vector<8x128xf32>
    %760 = vector.extract_strided_slice %759 {offsets = [0, 0], sizes = [8, 32], strides = [1, 1]} : vector<8x128xf32> to vector<8x32xf32>
    %761 = vector.extract_strided_slice %759 {offsets = [0, 32], sizes = [8, 32], strides = [1, 1]} : vector<8x128xf32> to vector<8x32xf32>
    %762 = vector.extract_strided_slice %759 {offsets = [0, 64], sizes = [8, 32], strides = [1, 1]} : vector<8x128xf32> to vector<8x32xf32>
    %cst_172 = arith.constant 2.000000e+00 : f32
    %763 = vector.broadcast %cst_172 : f32 to vector<8x32xf32>
    %764 = arith.mulf %763, %762 : vector<8x32xf32>
    %cst_173 = arith.constant 1.000000e+00 : f32
    %765 = vector.broadcast %cst_173 : f32 to vector<8x32xf32>
    %766 = arith.subf %764, %765 : vector<8x32xf32>
    %767 = vector.extract_strided_slice %759 {offsets = [0, 96], sizes = [8, 32], strides = [1, 1]} : vector<8x128xf32> to vector<8x32xf32>
    %768 = arith.mulf %678, %761 : vector<8x32xf32>
    %769 = arith.mulf %760, %766 : vector<8x32xf32>
    %770 = arith.addf %768, %769 : vector<8x32xf32>
    %771 = math.tanh %770 : vector<8x32xf32>
    %772 = arith.mulf %767, %771 : vector<8x32xf32>
    %773 = tpu.concatenate %680, %703 in 1 : vector<8x32xf32>, vector<8x32xf32> -> vector<8x64xf32>
    %774 = arith.truncf %773 : vector<8x64xf32> to vector<8x64xbf16>
    %cst_174 = arith.constant dense<0.000000e+00> : vector<8x128xf32>
    %775 = tpu.matmul %774, %7, %cst_174 {dimension_numbers = #tpu.dot_dimension_numbers<[1], [0], [0], [1], [0, 0, 1, 1], [], []>} : vector<8x64xbf16>, vector<64x128xbf16>, vector<8x128xf32> -> vector<8x128xf32>
    %776 = vector.broadcast %17 : vector<1x128xf32> to vector<8x128xf32>
    %777 = arith.addf %775, %776 : vector<8x128xf32>
    %778 = arith.negf %777 : vector<8x128xf32>
    %779 = math.exp %778 : vector<8x128xf32>
    %cst_175 = arith.constant 1.000000e+00 : f32
    %780 = vector.broadcast %cst_175 : f32 to vector<8x128xf32>
    %781 = arith.addf %780, %779 : vector<8x128xf32>
    %782 = arith.divf %780, %781 : vector<8x128xf32>
    %783 = vector.extract_strided_slice %782 {offsets = [0, 0], sizes = [8, 32], strides = [1, 1]} : vector<8x128xf32> to vector<8x32xf32>
    %784 = vector.extract_strided_slice %782 {offsets = [0, 32], sizes = [8, 32], strides = [1, 1]} : vector<8x128xf32> to vector<8x32xf32>
    %785 = vector.extract_strided_slice %782 {offsets = [0, 64], sizes = [8, 32], strides = [1, 1]} : vector<8x128xf32> to vector<8x32xf32>
    %cst_176 = arith.constant 2.000000e+00 : f32
    %786 = vector.broadcast %cst_176 : f32 to vector<8x32xf32>
    %787 = arith.mulf %786, %785 : vector<8x32xf32>
    %cst_177 = arith.constant 1.000000e+00 : f32
    %788 = vector.broadcast %cst_177 : f32 to vector<8x32xf32>
    %789 = arith.subf %787, %788 : vector<8x32xf32>
    %790 = vector.extract_strided_slice %782 {offsets = [0, 96], sizes = [8, 32], strides = [1, 1]} : vector<8x128xf32> to vector<8x32xf32>
    %791 = arith.mulf %701, %784 : vector<8x32xf32>
    %792 = arith.mulf %783, %789 : vector<8x32xf32>
    %793 = arith.addf %791, %792 : vector<8x32xf32>
    %794 = math.tanh %793 : vector<8x32xf32>
    %795 = arith.mulf %790, %794 : vector<8x32xf32>
    %796 = tpu.concatenate %703, %726 in 1 : vector<8x32xf32>, vector<8x32xf32> -> vector<8x64xf32>
    %797 = arith.truncf %796 : vector<8x64xf32> to vector<8x64xbf16>
    %cst_178 = arith.constant dense<0.000000e+00> : vector<8x128xf32>
    %798 = tpu.matmul %797, %9, %cst_178 {dimension_numbers = #tpu.dot_dimension_numbers<[1], [0], [0], [1], [0, 0, 1, 1], [], []>} : vector<8x64xbf16>, vector<64x128xbf16>, vector<8x128xf32> -> vector<8x128xf32>
    %799 = vector.broadcast %19 : vector<1x128xf32> to vector<8x128xf32>
    %800 = arith.addf %798, %799 : vector<8x128xf32>
    %801 = arith.negf %800 : vector<8x128xf32>
    %802 = math.exp %801 : vector<8x128xf32>
    %cst_179 = arith.constant 1.000000e+00 : f32
    %803 = vector.broadcast %cst_179 : f32 to vector<8x128xf32>
    %804 = arith.addf %803, %802 : vector<8x128xf32>
    %805 = arith.divf %803, %804 : vector<8x128xf32>
    %806 = vector.extract_strided_slice %805 {offsets = [0, 0], sizes = [8, 32], strides = [1, 1]} : vector<8x128xf32> to vector<8x32xf32>
    %807 = vector.extract_strided_slice %805 {offsets = [0, 32], sizes = [8, 32], strides = [1, 1]} : vector<8x128xf32> to vector<8x32xf32>
    %808 = vector.extract_strided_slice %805 {offsets = [0, 64], sizes = [8, 32], strides = [1, 1]} : vector<8x128xf32> to vector<8x32xf32>
    %cst_180 = arith.constant 2.000000e+00 : f32
    %809 = vector.broadcast %cst_180 : f32 to vector<8x32xf32>
    %810 = arith.mulf %809, %808 : vector<8x32xf32>
    %cst_181 = arith.constant 1.000000e+00 : f32
    %811 = vector.broadcast %cst_181 : f32 to vector<8x32xf32>
    %812 = arith.subf %810, %811 : vector<8x32xf32>
    %813 = vector.extract_strided_slice %805 {offsets = [0, 96], sizes = [8, 32], strides = [1, 1]} : vector<8x128xf32> to vector<8x32xf32>
    %814 = arith.mulf %724, %807 : vector<8x32xf32>
    %815 = arith.mulf %806, %812 : vector<8x32xf32>
    %816 = arith.addf %814, %815 : vector<8x32xf32>
    %817 = math.tanh %816 : vector<8x32xf32>
    %818 = arith.mulf %813, %817 : vector<8x32xf32>
    %819 = tpu.concatenate %749, %772 in 1 : vector<8x32xf32>, vector<8x32xf32> -> vector<8x64xf32>
    %820 = arith.truncf %819 : vector<8x64xf32> to vector<8x64xbf16>
    %cst_182 = arith.constant dense<0.000000e+00> : vector<8x128xf32>
    %821 = tpu.matmul %820, %5, %cst_182 {dimension_numbers = #tpu.dot_dimension_numbers<[1], [0], [0], [1], [0, 0, 1, 1], [], []>} : vector<8x64xbf16>, vector<64x128xbf16>, vector<8x128xf32> -> vector<8x128xf32>
    %822 = vector.broadcast %15 : vector<1x128xf32> to vector<8x128xf32>
    %823 = arith.addf %821, %822 : vector<8x128xf32>
    %824 = arith.negf %823 : vector<8x128xf32>
    %825 = math.exp %824 : vector<8x128xf32>
    %cst_183 = arith.constant 1.000000e+00 : f32
    %826 = vector.broadcast %cst_183 : f32 to vector<8x128xf32>
    %827 = arith.addf %826, %825 : vector<8x128xf32>
    %828 = arith.divf %826, %827 : vector<8x128xf32>
    %829 = vector.extract_strided_slice %828 {offsets = [0, 0], sizes = [8, 32], strides = [1, 1]} : vector<8x128xf32> to vector<8x32xf32>
    %830 = vector.extract_strided_slice %828 {offsets = [0, 32], sizes = [8, 32], strides = [1, 1]} : vector<8x128xf32> to vector<8x32xf32>
    %831 = vector.extract_strided_slice %828 {offsets = [0, 64], sizes = [8, 32], strides = [1, 1]} : vector<8x128xf32> to vector<8x32xf32>
    %cst_184 = arith.constant 2.000000e+00 : f32
    %832 = vector.broadcast %cst_184 : f32 to vector<8x32xf32>
    %833 = arith.mulf %832, %831 : vector<8x32xf32>
    %cst_185 = arith.constant 1.000000e+00 : f32
    %834 = vector.broadcast %cst_185 : f32 to vector<8x32xf32>
    %835 = arith.subf %833, %834 : vector<8x32xf32>
    %836 = vector.extract_strided_slice %828 {offsets = [0, 96], sizes = [8, 32], strides = [1, 1]} : vector<8x128xf32> to vector<8x32xf32>
    %837 = arith.mulf %770, %830 : vector<8x32xf32>
    %838 = arith.mulf %829, %835 : vector<8x32xf32>
    %839 = arith.addf %837, %838 : vector<8x32xf32>
    %840 = math.tanh %839 : vector<8x32xf32>
    %841 = arith.mulf %836, %840 : vector<8x32xf32>
    %842 = tpu.concatenate %772, %795 in 1 : vector<8x32xf32>, vector<8x32xf32> -> vector<8x64xf32>
    %843 = arith.truncf %842 : vector<8x64xf32> to vector<8x64xbf16>
    %cst_186 = arith.constant dense<0.000000e+00> : vector<8x128xf32>
    %844 = tpu.matmul %843, %7, %cst_186 {dimension_numbers = #tpu.dot_dimension_numbers<[1], [0], [0], [1], [0, 0, 1, 1], [], []>} : vector<8x64xbf16>, vector<64x128xbf16>, vector<8x128xf32> -> vector<8x128xf32>
    %845 = vector.broadcast %17 : vector<1x128xf32> to vector<8x128xf32>
    %846 = arith.addf %844, %845 : vector<8x128xf32>
    %847 = arith.negf %846 : vector<8x128xf32>
    %848 = math.exp %847 : vector<8x128xf32>
    %cst_187 = arith.constant 1.000000e+00 : f32
    %849 = vector.broadcast %cst_187 : f32 to vector<8x128xf32>
    %850 = arith.addf %849, %848 : vector<8x128xf32>
    %851 = arith.divf %849, %850 : vector<8x128xf32>
    %852 = vector.extract_strided_slice %851 {offsets = [0, 0], sizes = [8, 32], strides = [1, 1]} : vector<8x128xf32> to vector<8x32xf32>
    %853 = vector.extract_strided_slice %851 {offsets = [0, 32], sizes = [8, 32], strides = [1, 1]} : vector<8x128xf32> to vector<8x32xf32>
    %854 = vector.extract_strided_slice %851 {offsets = [0, 64], sizes = [8, 32], strides = [1, 1]} : vector<8x128xf32> to vector<8x32xf32>
    %cst_188 = arith.constant 2.000000e+00 : f32
    %855 = vector.broadcast %cst_188 : f32 to vector<8x32xf32>
    %856 = arith.mulf %855, %854 : vector<8x32xf32>
    %cst_189 = arith.constant 1.000000e+00 : f32
    %857 = vector.broadcast %cst_189 : f32 to vector<8x32xf32>
    %858 = arith.subf %856, %857 : vector<8x32xf32>
    %859 = vector.extract_strided_slice %851 {offsets = [0, 96], sizes = [8, 32], strides = [1, 1]} : vector<8x128xf32> to vector<8x32xf32>
    %860 = arith.mulf %793, %853 : vector<8x32xf32>
    %861 = arith.mulf %852, %858 : vector<8x32xf32>
    %862 = arith.addf %860, %861 : vector<8x32xf32>
    %863 = math.tanh %862 : vector<8x32xf32>
    %864 = arith.mulf %859, %863 : vector<8x32xf32>
    %865 = tpu.concatenate %795, %818 in 1 : vector<8x32xf32>, vector<8x32xf32> -> vector<8x64xf32>
    %866 = arith.truncf %865 : vector<8x64xf32> to vector<8x64xbf16>
    %cst_190 = arith.constant dense<0.000000e+00> : vector<8x128xf32>
    %867 = tpu.matmul %866, %9, %cst_190 {dimension_numbers = #tpu.dot_dimension_numbers<[1], [0], [0], [1], [0, 0, 1, 1], [], []>} : vector<8x64xbf16>, vector<64x128xbf16>, vector<8x128xf32> -> vector<8x128xf32>
    %868 = vector.broadcast %19 : vector<1x128xf32> to vector<8x128xf32>
    %869 = arith.addf %867, %868 : vector<8x128xf32>
    %870 = arith.negf %869 : vector<8x128xf32>
    %871 = math.exp %870 : vector<8x128xf32>
    %cst_191 = arith.constant 1.000000e+00 : f32
    %872 = vector.broadcast %cst_191 : f32 to vector<8x128xf32>
    %873 = arith.addf %872, %871 : vector<8x128xf32>
    %874 = arith.divf %872, %873 : vector<8x128xf32>
    %875 = vector.extract_strided_slice %874 {offsets = [0, 0], sizes = [8, 32], strides = [1, 1]} : vector<8x128xf32> to vector<8x32xf32>
    %876 = vector.extract_strided_slice %874 {offsets = [0, 32], sizes = [8, 32], strides = [1, 1]} : vector<8x128xf32> to vector<8x32xf32>
    %877 = vector.extract_strided_slice %874 {offsets = [0, 64], sizes = [8, 32], strides = [1, 1]} : vector<8x128xf32> to vector<8x32xf32>
    %cst_192 = arith.constant 2.000000e+00 : f32
    %878 = vector.broadcast %cst_192 : f32 to vector<8x32xf32>
    %879 = arith.mulf %878, %877 : vector<8x32xf32>
    %cst_193 = arith.constant 1.000000e+00 : f32
    %880 = vector.broadcast %cst_193 : f32 to vector<8x32xf32>
    %881 = arith.subf %879, %880 : vector<8x32xf32>
    %882 = vector.extract_strided_slice %874 {offsets = [0, 96], sizes = [8, 32], strides = [1, 1]} : vector<8x128xf32> to vector<8x32xf32>
    %883 = arith.mulf %816, %876 : vector<8x32xf32>
    %884 = arith.mulf %875, %881 : vector<8x32xf32>
    %885 = arith.addf %883, %884 : vector<8x32xf32>
    %886 = math.tanh %885 : vector<8x32xf32>
    %887 = arith.mulf %882, %886 : vector<8x32xf32>
    %888 = tpu.concatenate %841, %864 in 1 : vector<8x32xf32>, vector<8x32xf32> -> vector<8x64xf32>
    %889 = arith.truncf %888 : vector<8x64xf32> to vector<8x64xbf16>
    %cst_194 = arith.constant dense<0.000000e+00> : vector<8x128xf32>
    %890 = tpu.matmul %889, %7, %cst_194 {dimension_numbers = #tpu.dot_dimension_numbers<[1], [0], [0], [1], [0, 0, 1, 1], [], []>} : vector<8x64xbf16>, vector<64x128xbf16>, vector<8x128xf32> -> vector<8x128xf32>
    %891 = vector.broadcast %17 : vector<1x128xf32> to vector<8x128xf32>
    %892 = arith.addf %890, %891 : vector<8x128xf32>
    %893 = arith.negf %892 : vector<8x128xf32>
    %894 = math.exp %893 : vector<8x128xf32>
    %cst_195 = arith.constant 1.000000e+00 : f32
    %895 = vector.broadcast %cst_195 : f32 to vector<8x128xf32>
    %896 = arith.addf %895, %894 : vector<8x128xf32>
    %897 = arith.divf %895, %896 : vector<8x128xf32>
    %898 = vector.extract_strided_slice %897 {offsets = [0, 0], sizes = [8, 32], strides = [1, 1]} : vector<8x128xf32> to vector<8x32xf32>
    %899 = vector.extract_strided_slice %897 {offsets = [0, 32], sizes = [8, 32], strides = [1, 1]} : vector<8x128xf32> to vector<8x32xf32>
    %900 = vector.extract_strided_slice %897 {offsets = [0, 64], sizes = [8, 32], strides = [1, 1]} : vector<8x128xf32> to vector<8x32xf32>
    %cst_196 = arith.constant 2.000000e+00 : f32
    %901 = vector.broadcast %cst_196 : f32 to vector<8x32xf32>
    %902 = arith.mulf %901, %900 : vector<8x32xf32>
    %cst_197 = arith.constant 1.000000e+00 : f32
    %903 = vector.broadcast %cst_197 : f32 to vector<8x32xf32>
    %904 = arith.subf %902, %903 : vector<8x32xf32>
    %905 = vector.extract_strided_slice %897 {offsets = [0, 96], sizes = [8, 32], strides = [1, 1]} : vector<8x128xf32> to vector<8x32xf32>
    %906 = arith.mulf %862, %899 : vector<8x32xf32>
    %907 = arith.mulf %898, %904 : vector<8x32xf32>
    %908 = arith.addf %906, %907 : vector<8x32xf32>
    %909 = math.tanh %908 : vector<8x32xf32>
    %910 = arith.mulf %905, %909 : vector<8x32xf32>
    %911 = tpu.concatenate %864, %887 in 1 : vector<8x32xf32>, vector<8x32xf32> -> vector<8x64xf32>
    %912 = arith.truncf %911 : vector<8x64xf32> to vector<8x64xbf16>
    %cst_198 = arith.constant dense<0.000000e+00> : vector<8x128xf32>
    %913 = tpu.matmul %912, %9, %cst_198 {dimension_numbers = #tpu.dot_dimension_numbers<[1], [0], [0], [1], [0, 0, 1, 1], [], []>} : vector<8x64xbf16>, vector<64x128xbf16>, vector<8x128xf32> -> vector<8x128xf32>
    %914 = vector.broadcast %19 : vector<1x128xf32> to vector<8x128xf32>
    %915 = arith.addf %913, %914 : vector<8x128xf32>
    %916 = arith.negf %915 : vector<8x128xf32>
    %917 = math.exp %916 : vector<8x128xf32>
    %cst_199 = arith.constant 1.000000e+00 : f32
    %918 = vector.broadcast %cst_199 : f32 to vector<8x128xf32>
    %919 = arith.addf %918, %917 : vector<8x128xf32>
    %920 = arith.divf %918, %919 : vector<8x128xf32>
    %921 = vector.extract_strided_slice %920 {offsets = [0, 0], sizes = [8, 32], strides = [1, 1]} : vector<8x128xf32> to vector<8x32xf32>
    %922 = vector.extract_strided_slice %920 {offsets = [0, 32], sizes = [8, 32], strides = [1, 1]} : vector<8x128xf32> to vector<8x32xf32>
    %923 = vector.extract_strided_slice %920 {offsets = [0, 64], sizes = [8, 32], strides = [1, 1]} : vector<8x128xf32> to vector<8x32xf32>
    %cst_200 = arith.constant 2.000000e+00 : f32
    %924 = vector.broadcast %cst_200 : f32 to vector<8x32xf32>
    %925 = arith.mulf %924, %923 : vector<8x32xf32>
    %cst_201 = arith.constant 1.000000e+00 : f32
    %926 = vector.broadcast %cst_201 : f32 to vector<8x32xf32>
    %927 = arith.subf %925, %926 : vector<8x32xf32>
    %928 = vector.extract_strided_slice %920 {offsets = [0, 96], sizes = [8, 32], strides = [1, 1]} : vector<8x128xf32> to vector<8x32xf32>
    %929 = arith.mulf %885, %922 : vector<8x32xf32>
    %930 = arith.mulf %921, %927 : vector<8x32xf32>
    %931 = arith.addf %929, %930 : vector<8x32xf32>
    %932 = math.tanh %931 : vector<8x32xf32>
    %933 = arith.mulf %928, %932 : vector<8x32xf32>
    %934 = tpu.concatenate %910, %933 in 1 : vector<8x32xf32>, vector<8x32xf32> -> vector<8x64xf32>
    %935 = arith.truncf %934 : vector<8x64xf32> to vector<8x64xbf16>
    %cst_202 = arith.constant dense<0.000000e+00> : vector<8x128xf32>
    %936 = tpu.matmul %935, %9, %cst_202 {dimension_numbers = #tpu.dot_dimension_numbers<[1], [0], [0], [1], [0, 0, 1, 1], [], []>} : vector<8x64xbf16>, vector<64x128xbf16>, vector<8x128xf32> -> vector<8x128xf32>
    %937 = vector.broadcast %19 : vector<1x128xf32> to vector<8x128xf32>
    %938 = arith.addf %936, %937 : vector<8x128xf32>
    %939 = arith.negf %938 : vector<8x128xf32>
    %940 = math.exp %939 : vector<8x128xf32>
    %cst_203 = arith.constant 1.000000e+00 : f32
    %941 = vector.broadcast %cst_203 : f32 to vector<8x128xf32>
    %942 = arith.addf %941, %940 : vector<8x128xf32>
    %943 = arith.divf %941, %942 : vector<8x128xf32>
    %944 = vector.extract_strided_slice %943 {offsets = [0, 0], sizes = [8, 32], strides = [1, 1]} : vector<8x128xf32> to vector<8x32xf32>
    %945 = vector.extract_strided_slice %943 {offsets = [0, 32], sizes = [8, 32], strides = [1, 1]} : vector<8x128xf32> to vector<8x32xf32>
    %946 = vector.extract_strided_slice %943 {offsets = [0, 64], sizes = [8, 32], strides = [1, 1]} : vector<8x128xf32> to vector<8x32xf32>
    %cst_204 = arith.constant 2.000000e+00 : f32
    %947 = vector.broadcast %cst_204 : f32 to vector<8x32xf32>
    %948 = arith.mulf %947, %946 : vector<8x32xf32>
    %cst_205 = arith.constant 1.000000e+00 : f32
    %949 = vector.broadcast %cst_205 : f32 to vector<8x32xf32>
    %950 = arith.subf %948, %949 : vector<8x32xf32>
    %951 = vector.extract_strided_slice %943 {offsets = [0, 96], sizes = [8, 32], strides = [1, 1]} : vector<8x128xf32> to vector<8x32xf32>
    %952 = arith.mulf %931, %945 : vector<8x32xf32>
    %953 = arith.mulf %944, %950 : vector<8x32xf32>
    %954 = arith.addf %952, %953 : vector<8x32xf32>
    %955 = math.tanh %954 : vector<8x32xf32>
    %956 = arith.mulf %951, %955 : vector<8x32xf32>
    %c0_206 = arith.constant 0 : index
    %c0_207 = arith.constant 0 : index
    %957 = vector.load %arg3[%c0_206, %c0_207] : memref<1x32xf32, #tpu.memory_space<vmem>>, vector<1x32xf32>
    %958 = vector.broadcast %957 : vector<1x32xf32> to vector<8x32xf32>
    %959 = arith.mulf %956, %958 : vector<8x32xf32>
    %cst_208 = arith.constant dense<0.000000e+00> : vector<8xf32>
    %960 = vector.multi_reduction <add>, %959, %cst_208 [1] : vector<8x32xf32> to vector<8xf32>
    %961 = vector.shape_cast %960 : vector<8xf32> to vector<8x1xf32>
    %c0_209 = arith.constant 0 : index
    %c0_210 = arith.constant 0 : index
    %962 = vector.load %arg4[%c0_209, %c0_210] : memref<1x1xf32, #tpu.memory_space<vmem>>, vector<1x1xf32>
    %963 = vector.broadcast %962 : vector<1x1xf32> to vector<8x1xf32>
    %964 = arith.addf %961, %963 : vector<8x1xf32>
    %c0_211 = arith.constant 0 : index
    %c0_212 = arith.constant 0 : index
    %965 = vector.load %arg5[%c0_211, %c0_212] : memref<8x1xf32, #tpu.memory_space<vmem>>, vector<8x1xf32>
    tpu.vector_store %arg5[%c0_211, %c0_212], %964 {strides = array<i32>} : memref<8x1xf32, #tpu.memory_space<vmem>>, vector<8x1xf32>,
    return
  }
}

</mosaic_0001>

<bundles_post_ra>
// kernel: tpu_custom_call.1
= control target key start
LH: loop header
LB: loop body
LE: loop exit
PB: predicated region body
PF: predicated region fallthrough
CT: control target
= control target key end

     0   :  { %s4364_s0 = inlined_call_operand.hbm [shape: f32[8,8,32], index: 0, kind: input, shape index: {}]   ;;  %s4365_s1 = inlined_call_operand.hbm [shape: bf16[5,64,128], index: 1, kind: input, shape index: {}]   ;;  %s4366_s2 = inlined_call_operand.hbm [shape: f32[5,1,128], index: 2, kind: input, shape index: {}]   ;;  %s4367_s3 = inlined_call_operand.vmem [shape: f32[1,32], index: 3, kind: input, shape index: {}]   ;;  %s4368_s4 = inlined_call_operand.<no memory space> [shape: f32[1,1], index: 4, kind: input, shape index: {}]   ;;  %s4369_s5 = inlined_call_operand.vmem [shape: f32[8,1], index: 5, kind: output, shape index: {}]  }
   0x1   :  { %v10_v0 = vstv %s4368_s4 }
   0x2   :  { %11 = vst [vmem:[#allocation2] sm:$0x1] %v10_v0 }
   0x3   :  { %12 = vsyncpa [#allocation4], 0 }
   0x4   :  { %13 = vsyncpa [#allocation6], 0  ;;  %s31_s22 = sshll.u32 %s4365_s1, 4  ;;  %s3421_s23 = smov [#allocation5]   ;;  %s32_s22 = int_to_ptr.hbm [resolvable:$true] %s31_s22 }
   0x5   :  { %s33_s24 = sshll.u32 %s3421_s23, 4  ;;  %s18_s27 = sshll.u32 %s4364_s0, 4  ;;  %s34_s24 = int_to_ptr.vmem [resolvable:$true] %s33_s24  ;;  %s19_s27 = int_to_ptr.hbm [resolvable:$true] %s18_s27 }
   0x6   :  { %s3422_s28 = smov 64   ;;  %s3423_s29 = smov 4  }
   0x7   :  { %39 = dma.hbm_to_vmem [thread:$0]  %s32_s22, 2560, %s34_s24, [#allocation6], %s3422_s28, %s3422_s28, %s3423_s29  }
   0x8   :  { %s3424_s4 = smov [#allocation3]   ;;  %s3425_s6 = smov 128  }
   0x9   :  { %s20_s30 = sshll.u32 %s3424_s4, 4  ;;  %s3426_s7 = smov 8   ;;  %s21_s30 = int_to_ptr.vmem [resolvable:$true] %s20_s30 }
   0xa   :  { %26 = dma.hbm_to_vmem [thread:$0]  %s19_s27, 1024, %s21_s30, [#allocation4], %s3425_s6, %s3425_s6, %s3426_s7  }
   0xb   :  { %s44_s9 = sshll.u32 %s4366_s2, 4  ;;  %s3427_s10 = smov [#allocation7]   ;;  %s45_s9 = int_to_ptr.hbm [resolvable:$true] %s44_s9 }
   0xc   :  { %s46_s11 = sshll.u32 %s3427_s10, 4  ;;  %s3428_s0 = smov 16   ;;  %s47_s11 = int_to_ptr.vmem [resolvable:$true] %s46_s11 }
   0xd   :  { %s3429_s12 = smov 1  }
   0xe   :  { %52 = dma.hbm_to_vmem [thread:$0]  %s45_s9, 80, %s47_s11, [#allocation6], %s3428_s0, %s3428_s0, %s3429_s12  }
   0xf   :  { %3417 = dma.done.wait [#allocation4], 1024  }
  0x10   :  { %3418 = vsyncadd [#allocation4], 4294966272 }
  0x11   :  { %3419 = dma.done.wait [#allocation6], 2640  }
  0x12   :  { %3420 = vsyncadd [#allocation6], 4294964656  ;;  %v3476_v1 = vld [vmem:[#allocation5 + $0x18] sm:$0xff]  ;;  %v3479_v2 = vld [vmem:[#allocation5 + $0x10] sm:$0xff]  ;;  %vm124_vm0 = vcmask 261120   ;;  %vm154_vm1 = vcmask 523264  }
  0x13   :  { %162 = vmatpush.bf16.msra.mxu0 %v3476_v1  ;;  %224 = vmatpush.bf16.msra.mxu1 %v3476_v1  ;;  %v3484_v3 = vld [vmem:[#allocation5 + $0x8] sm:$0xff]  ;;  %v123_v4 = vld [vmem:[#allocation3] sm:$0xff]  ;;  %s3430_s2 = smov 32   ;;  %v3507_v33 = vld [vmem:[#allocation5 + $0x38] sm:$0xff]  ;;  %s3431_s15 = smov 96  }
  0x14   :  { %372 = vmatpush.bf16.msra.mxu3 %v3476_v1  ;;  %v3489_v5 = vld [vmem:[#allocation5] sm:$0xff]  ;;  %v125_v6 = vsel %vm124_vm0, %v123_v4, 0.0  ;;  %310 = vmatpush.bf16.msra.mxu2 %v3507_v33  ;;  %v3510_v34 = vld [vmem:[#allocation5 + $0x30] sm:$0xff]  ;;  %v3515_v35 = vld [vmem:[#allocation5 + $0x28] sm:$0xff] }
  0x15   :  { %v126_v7 = vpack.c.bf16 %v125_v6, %v125_v6  ;;  %v3498_v8 = vld [vmem:[#allocation7] ss:$0 sm:$0xff]  ;;  %v210_v42 = vld [vmem:[#allocation3 + $0x8] sm:$0xff]  ;;  %v3541_v46 = vld [vmem:[#allocation7 + $0x1] ss:$0 sm:$0xff] }
  0x16   :  { %v3524_v38 = vld [vmem:[#allocation5 + $0x20] sm:$0xff] }
  0x17   :  { %163 = vmatpush.bf16.msra.mxu0 %v3479_v2  ;;  %225 = vmatpush.bf16.msra.mxu1 %v3479_v2 }
  0x18   :  { %373 = vmatpush.bf16.msra.mxu3 %v3479_v2  ;;  %311 = vmatpush.bf16.msra.mxu2 %v3510_v34 }
  0x1b   :  { %164 = vmatpush.bf16.msra.mxu0 %v3484_v3  ;;  %226 = vmatpush.bf16.msra.mxu1 %v3484_v3 }
  0x1c   :  { %374 = vmatpush.bf16.msra.mxu3 %v3484_v3  ;;  %312 = vmatpush.bf16.msra.mxu2 %v3515_v35 }
  0x1f   :  { %165 = vmatpush.bf16.msra.mxu0 %v3489_v5  ;;  %227 = vmatpush.bf16.msra.mxu1 %v3489_v5 }
  0x20   :  { %375 = vmatpush.bf16.msra.mxu3 %v3489_v5  ;;  %313 = vmatpush.bf16.msra.mxu2 %v3524_v38 }
  0x22   :  { %2798 = vmatmul.msk.bf16.vlgmr.msra.gmra.mxu0 %vm154_vm1, %v126_v7 }
  0x23   :  { %435 = vmatpush.bf16.msrb.mxu0 %v3507_v33 }
  0x24   :  { %646 = vmatpush.bf16.msrb.mxu3 %v3507_v33  ;;  %583 = vmatpush.bf16.msrb.mxu2 %v3476_v1 }
  0x27   :  { %436 = vmatpush.bf16.msrb.mxu0 %v3510_v34 }
  0x28   :  { %647 = vmatpush.bf16.msrb.mxu3 %v3510_v34  ;;  %584 = vmatpush.bf16.msrb.mxu2 %v3479_v2 }
  0x2b   :  { %437 = vmatpush.bf16.msrb.mxu0 %v3515_v35 }
  0x2c   :  { %648 = vmatpush.bf16.msrb.mxu3 %v3515_v35  ;;  %585 = vmatpush.bf16.msrb.mxu2 %v3484_v3 }
  0x2f   :  { %438 = vmatpush.bf16.msrb.mxu0 %v3524_v38 }
  0x30   :  { %649 = vmatpush.bf16.msrb.mxu3 %v3524_v38  ;;  %586 = vmatpush.bf16.msrb.mxu2 %v3489_v5 }
  0x9f   :  { %v167_v9 = vpop.f32.mrf.mxu0 }
  0xa0   :  { %v168_v10 = vadd.f32 %v3498_v8, %v167_v9 }
  0xa2   :  { %v2799_v11 = vmul.f32 -1.442695, %v168_v10 }
  0xa4   :  { %3075 = vpow2.f32 %v2799_v11 }
  0xa7   :  { %v169_v12 = vpop.f32.mrf.mxu0 }
  0xaa   :  { %v3076_v13 = vpop.eup %3075 }
  0xab   :  { %v174_v14 = vadd.f32 1.0, %v3076_v13 }
  0xad   :  { %3077 = vrcp.f32 %v174_v14  ;;  %v186_v18 = vand.u32 2147483648, %v174_v14  ;;  %v184_v20 = vand.u32 2147483647, %v174_v14  ;;  %vm180_vm3 = vweird.f32 %v174_v14 }
  0xaf   :  { %v187_v22 = vor.u32 1.1754944e-38, %v186_v18  ;;  %vm185_vm5 = vcmp.eq.f32.partialorder %v184_v20, 8.507059e+37 }
  0xb3   :  { %v3078_v15 = vpop.eup %3077 }
  0xb4   :  { %v176_v16 = vmul.f32 %v3078_v15, %v174_v14  ;;  %vm181_vm2 = vweird.f32 %v3078_v15 }
  0xb5   :  { %vm182_vm4 = vmor %vm180_vm3, %vm181_vm2 }
  0xb6   :  { %v177_v17 = vsub.f32 1.0, %v176_v16 }
  0xb8   :  { %v178_v19 = vmul.f32 %v3078_v15, %v177_v17 }
  0xba   :  { %v179_v21 = vadd.f32 %v3078_v15, %v178_v19 }
  0xbc   :  { %v183_v23 = vsel %vm182_vm4, %v3078_v15, %v179_v21 }
  0xbd   :  { %v188_v24 = vsel %vm185_vm5, %v187_v22, %v183_v23 }
  0xbe   :  { %v190_v25 = vmul.f32 2.0, %v188_v24  ;;  %v192_v29 = vmul.f32 0.0, %v188_v24 }
  0xc0   :  { %v2800_v26 = vadd.f32 -1.0, %v190_v25 }
  0xc2   :  { %194 = vrot.lane.b32.xlu0 %v2800_v26, %s3422_s28 }
 0x134   :  { %v195_v27 = vpop.permute.xlu0 %194 }
 0x135   :  { %v197_v28 = vmul.f32 %v195_v27, %v188_v24 }
 0x137   :  { %199 = vrot.lane.b32.xlu0 %v197_v28, %s3430_s2 }
 0x1a9   :  { %v200_v30 = vpop.permute.xlu0 %199 }
 0x1aa   :  { %v3503_v31 = vadd.f32 %v200_v30, %v192_v29 }
 0x1ac   :  { %3079 = vtanh.f32 %v3503_v31 }
 0x1b2   :  { %v3080_v32 = vpop.eup %3079 }
 0x1b3   :  { %205 = vrot.lane.b32.xlu1 %v3080_v32, %s3422_s28 }
 0x225   :  { %v206_v36 = vpop.permute.xlu1 %205 }
 0x226   :  { %v208_v37 = vmul.f32 %v206_v36, %v188_v24 }
 0x228   :  { %271 = vrot.lane.b32.xlu2 %v208_v37, %s3430_s2  ;;  %212 = vrot.lane.b32.xlu1 %v208_v37, %s3422_s28 }
 0x282   :  { %v272_v39 = vpop.permute.xlu2 %271 }
 0x283   :  { %v274_v40 = vsel %vm124_vm0, %v272_v39, 0.0 }
 0x284   :  { %v275_v41 = vpack.c.bf16 %v274_v40, %v274_v40 }
 0x286   :  { %2820 = vmatmul.msk.bf16.vlgmr.msra.gmra.mxu2 %vm154_vm1, %v275_v41  ;;  %v3558_v41 = vld [vmem:[#allocation5 + $0x58] sm:$0xff] }
 0x287   :  { %857 = vmatpush.bf16.msra.mxu2 %v3476_v1  ;;  %521 = vmatpush.bf16.msrb.mxu1 %v3558_v41 }
 0x288   :  { %709 = vmatpush.bf16.msra.mxu0 %v3558_v41 }
 0x28b   :  { %858 = vmatpush.bf16.msra.mxu2 %v3479_v2 }
 0x28f   :  { %859 = vmatpush.bf16.msra.mxu2 %v3484_v3 }
 0x293   :  { %860 = vmatpush.bf16.msra.mxu2 %v3489_v5 }
 0x29a   :  { %v213_v43 = vpop.permute.xlu1 %212 }
 0x29b   :  { %v215_v44 = vsel %vm124_vm0, %v210_v42, %v213_v43 }
 0x29c   :  { %v216_v45 = vpack.c.bf16 %v215_v44, %v215_v44 }
 0x29e   :  { %2801 = vmatmul.msk.bf16.vlgmr.msra.gmra.mxu1 %vm154_vm1, %v216_v45  ;;  %v3566_v45 = vld [vmem:[#allocation5 + $0x50] sm:$0xff] }
 0x29f   :  { %522 = vmatpush.bf16.msrb.mxu1 %v3566_v45  ;;  %710 = vmatpush.bf16.msra.mxu0 %v3566_v45 }
 0x309   :  { %v315_v47 = vpop.f32.mrf.mxu2 }
 0x30a   :  { %v316_v48 = vadd.f32 %v3541_v46, %v315_v47  ;;  %v3570_v47 = vld [vmem:[#allocation5 + $0x48] sm:$0xff] }
 0x30b   :  { %523 = vmatpush.bf16.msrb.mxu1 %v3570_v47  ;;  %711 = vmatpush.bf16.msra.mxu0 %v3570_v47 }
 0x30c   :  { %v2821_v49 = vmul.f32 -1.442695, %v316_v48  ;;  %v3574_v48 = vld [vmem:[#allocation5 + $0x40] sm:$0xff] }
 0x30e   :  { %3081 = vpow2.f32 %v2821_v49  ;;  %v358_v49 = vld [vmem:[#allocation3 + $0x10] sm:$0xff] }
 0x30f   :  { %524 = vmatpush.bf16.msrb.mxu1 %v3574_v48  ;;  %712 = vmatpush.bf16.msra.mxu0 %v3574_v48 }
 0x311   :  { %v317_v50 = vpop.f32.mrf.mxu2 }
 0x314   :  { %v3082_v51 = vpop.eup %3081 }
 0x315   :  { %v322_v52 = vadd.f32 1.0, %v3082_v51 }
 0x317   :  { %3083 = vrcp.f32 %v322_v52  ;;  %v334_v59 = vand.u32 2147483648, %v322_v52  ;;  %v332_v61 = vand.u32 2147483647, %v322_v52  ;;  %vm328_vm7 = vweird.f32 %v322_v52 }
 0x319   :  { %v335_v0 = vor.u32 1.1754944e-38, %v334_v59  ;;  %vm333_vm9 = vcmp.eq.f32.partialorder %v332_v61, 8.507059e+37 }
 0x31b   :  { %v229_v53 = vpop.f32.mrf.mxu1 }
 0x31c   :  { %v230_v54 = vadd.f32 %v3498_v8, %v229_v53 }
 0x31d   :  { %v3084_v55 = vpop.eup %3083 }
 0x31e   :  { %v324_v56 = vmul.f32 %v3084_v55, %v322_v52  ;;  %v2802_v57 = vmul.f32 -1.442695, %v230_v54  ;;  %vm329_vm6 = vweird.f32 %v3084_v55 }
 0x31f   :  { %vm330_vm8 = vmor %vm328_vm7, %vm329_vm6 }
 0x320   :  { %v325_v58 = vsub.f32 1.0, %v324_v56  ;;  %3085 = vpow2.f32 %v2802_v57 }
 0x322   :  { %v326_v60 = vmul.f32 %v3084_v55, %v325_v58 }
 0x323   :  { %v231_v62 = vpop.f32.mrf.mxu1 }
 0x324   :  { %v327_v63 = vadd.f32 %v3084_v55, %v326_v60  ;;  %v3592_v60 = vld [vmem:[#allocation7 + $0x2] ss:$0 sm:$0xff] }
 0x326   :  { %v3086_v4 = vpop.eup %3085  ;;  %v331_v6 = vsel %vm330_vm8, %v3084_v55, %v327_v63 }
 0x327   :  { %v236_v7 = vadd.f32 1.0, %v3086_v4  ;;  %v336_v9 = vsel %vm333_vm9, %v335_v0, %v331_v6 }
 0x328   :  { %v338_v10 = vmul.f32 2.0, %v336_v9  ;;  %v340_v28 = vmul.f32 0.0, %v336_v9 }
 0x329   :  { %3087 = vrcp.f32 %v236_v7  ;;  %v248_v15 = vand.u32 2147483648, %v236_v7  ;;  %v246_v17 = vand.u32 2147483647, %v236_v7  ;;  %vm242_vm11 = vweird.f32 %v236_v7 }
 0x32a   :  { %v2822_v11 = vadd.f32 -1.0, %v338_v10 }
 0x32b   :  { %v249_v19 = vor.u32 1.1754944e-38, %v248_v15  ;;  %vm247_vm13 = vcmp.eq.f32.partialorder %v246_v17, 8.507059e+37 }
 0x32c   :  { %342 = vrot.lane.b32.xlu0 %v2822_v11, %s3422_s28 }
 0x32f   :  { %v3088_v12 = vpop.eup %3087 }
 0x330   :  { %v238_v13 = vmul.f32 %v3088_v12, %v236_v7  ;;  %vm243_vm10 = vweird.f32 %v3088_v12 }
 0x331   :  { %vm244_vm12 = vmor %vm242_vm11, %vm243_vm10 }
 0x332   :  { %v239_v14 = vsub.f32 1.0, %v238_v13 }
 0x334   :  { %v240_v16 = vmul.f32 %v3088_v12, %v239_v14 }
 0x336   :  { %v241_v18 = vadd.f32 %v3088_v12, %v240_v16 }
 0x338   :  { %v245_v20 = vsel %vm244_vm12, %v3088_v12, %v241_v18 }
 0x339   :  { %v250_v21 = vsel %vm247_vm13, %v249_v19, %v245_v20 }
 0x33a   :  { %v252_v22 = vmul.f32 2.0, %v250_v21  ;;  %v254_v36 = vmul.f32 %v250_v21, %v3503_v31 }
 0x33c   :  { %v2803_v23 = vadd.f32 -1.0, %v252_v22 }
 0x33e   :  { %256 = vrot.lane.b32.xlu2 %v2803_v23, %s3422_s28 }
 0x398   :  { %v257_v24 = vpop.permute.xlu2 %256 }
 0x399   :  { %v259_v25 = vmul.f32 %v257_v24, %v250_v21 }
 0x39b   :  { %261 = vrot.lane.b32.xlu1 %v259_v25, %s3430_s2 }
 0x39e   :  { %v343_v26 = vpop.permute.xlu0 %342 }
 0x39f   :  { %v345_v27 = vmul.f32 %v343_v26, %v336_v9 }
 0x3a1   :  { %347 = vrot.lane.b32.xlu2 %v345_v27, %s3430_s2 }
 0x3fb   :  { %v348_v29 = vpop.permute.xlu2 %347 }
 0x3fc   :  { %v3549_v30 = vadd.f32 %v348_v29, %v340_v28 }
 0x3fe   :  { %3089 = vtanh.f32 %v3549_v30 }
 0x404   :  { %v3090_v32 = vpop.eup %3089 }
 0x405   :  { %353 = vrot.lane.b32.xlu1 %v3090_v32, %s3422_s28 }
 0x40d   :  { %v262_v37 = vpop.permute.xlu1 %261 }
 0x40e   :  { %v3554_v39 = vadd.f32 %v262_v37, %v254_v36 }
 0x410   :  { %3091 = vtanh.f32 %v3554_v39 }
 0x416   :  { %v3092_v40 = vpop.eup %3091 }
 0x417   :  { %267 = vrot.lane.b32.xlu0 %v3092_v40, %s3422_s28 }
 0x477   :  { %v354_v42 = vpop.permute.xlu1 %353 }
 0x478   :  { %v356_v43 = vmul.f32 %v354_v42, %v336_v9 }
 0x47a   :  { %423 = vrot.lane.b32.xlu1 %v356_v43, %s3422_s28 }
 0x489   :  { %v268_v44 = vpop.permute.xlu0 %267 }
 0x48a   :  { %v270_v31 = vmul.f32 %v268_v44, %v250_v21 }
 0x48c   :  { %419 = vrot.lane.b32.xlu0 %v270_v31, %s3430_s2  ;;  %360 = vrot.lane.b32.xlu2 %v270_v31, %s3422_s28 }
 0x494   :  { %482 = vrot.lane.b32.xlu2 %v356_v43, %s3430_s2 }
 0x4e6   :  { %v361_v50 = vpop.permute.xlu2 %360 }
 0x4e7   :  { %v363_v51 = vsel %vm124_vm0, %v358_v49, %v361_v50 }
 0x4e8   :  { %v364_v52 = vpack.c.bf16 %v363_v51, %v363_v51 }
 0x4ea   :  { %2823 = vmatmul.msk.bf16.vlgmr.msra.gmra.mxu3 %vm154_vm1, %v364_v52 }
 0x4eb   :  { %920 = vmatpush.bf16.msra.mxu3 %v3507_v33 }
 0x4ec   :  { %v424_v56 = vpop.permute.xlu1 %423 }
 0x4ee   :  { %v483_v53 = vpop.permute.xlu2 %482 }
 0x4ef   :  { %v485_v54 = vsel %vm124_vm0, %v483_v53, 0.0  ;;  %921 = vmatpush.bf16.msra.mxu3 %v3510_v34 }
 0x4f0   :  { %v486_v55 = vpack.c.bf16 %v485_v54, %v485_v54 }
 0x4f2   :  { %2845 = vmatmul.msk.bf16.vlgmr.msrb.gmra.mxu1 %vm154_vm1, %v486_v55 }
 0x4f3   :  { %922 = vmatpush.bf16.msra.mxu3 %v3515_v35 }
 0x4f7   :  { %923 = vmatpush.bf16.msra.mxu3 %v3524_v38 }
 0x4fe   :  { %v420_v57 = vpop.permute.xlu0 %419 }
 0x4ff   :  { %v426_v58 = vsel %vm124_vm0, %v420_v57, %v424_v56 }
 0x500   :  { %v427_v59 = vpack.c.bf16 %v426_v58, %v426_v58 }
 0x502   :  { %2826 = vmatmul.msk.bf16.vlgmr.msrb.gmra.mxu0 %vm154_vm1, %v427_v59 }
 0x503   :  { %983 = vmatpush.bf16.msrb.mxu0 %v3558_v41 }
 0x507   :  { %984 = vmatpush.bf16.msrb.mxu0 %v3566_v45 }
 0x50b   :  { %985 = vmatpush.bf16.msrb.mxu0 %v3570_v47 }
 0x50f   :  { %986 = vmatpush.bf16.msrb.mxu0 %v3574_v48 }
 0x56d   :  { %v377_v61 = vpop.f32.mrf.mxu3 }
 0x56e   :  { %v378_v62 = vadd.f32 %v3498_v8, %v377_v61 }
 0x56f   :  { %v526_v63 = vpop.f32.mrf.mxu1 }
 0x570   :  { %v2824_v0 = vmul.f32 -1.442695, %v378_v62  ;;  %v527_v4 = vadd.f32 %v3592_v60, %v526_v63 }
 0x572   :  { %3093 = vpow2.f32 %v2824_v0  ;;  %v2846_v6 = vmul.f32 -1.442695, %v527_v4 }
 0x574   :  { %3095 = vpow2.f32 %v2846_v6 }
 0x575   :  { %v379_v7 = vpop.f32.mrf.mxu3 }
 0x577   :  { %v528_v9 = vpop.f32.mrf.mxu1 }
 0x578   :  { %v3094_v10 = vpop.eup %3093 }
 0x579   :  { %v384_v11 = vadd.f32 1.0, %v3094_v10 }
 0x57a   :  { %v3096_v12 = vpop.eup %3095 }
 0x57b   :  { %3097 = vrcp.f32 %v384_v11  ;;  %v533_v13 = vadd.f32 1.0, %v3096_v12  ;;  %v396_v22 = vand.u32 2147483648, %v384_v11  ;;  %v394_v25 = vand.u32 2147483647, %v384_v11 }
 0x57c   :  { %vm390_vm15 = vweird.f32 %v384_v11 }
 0x57d   :  { %3099 = vrcp.f32 %v533_v13  ;;  %v545_v27 = vand.u32 2147483648, %v533_v13  ;;  %v543_v32 = vand.u32 2147483647, %v533_v13  ;;  %v397_v36 = vor.u32 1.1754944e-38, %v396_v22 }
 0x57e   :  { %vm395_vm4 = vcmp.eq.f32.partialorder %v394_v25, 8.507059e+37  ;;  %vm539_vm5 = vweird.f32 %v533_v13 }
 0x57f   :  { %v440_v14 = vpop.f32.mrf.mxu0  ;;  %v546_v31 = vor.u32 1.1754944e-38, %v545_v27  ;;  %vm544_vm7 = vcmp.eq.f32.partialorder %v543_v32, 8.507059e+37 }
 0x580   :  { %v441_v15 = vadd.f32 %v3541_v46, %v440_v14 }
 0x581   :  { %v3098_v16 = vpop.eup %3097 }
 0x582   :  { %v386_v17 = vmul.f32 %v3098_v16, %v384_v11  ;;  %v2827_v18 = vmul.f32 -1.442695, %v441_v15  ;;  %vm391_vm14 = vweird.f32 %v3098_v16 }
 0x583   :  { %v3100_v19 = vpop.eup %3099  ;;  %vm392_vm3 = vmor %vm390_vm15, %vm391_vm14 }
 0x584   :  { %v387_v20 = vsub.f32 1.0, %v386_v17  ;;  %v535_v21 = vmul.f32 %v3100_v19, %v533_v13  ;;  %3101 = vpow2.f32 %v2827_v18  ;;  %vm540_vm2 = vweird.f32 %v3100_v19 }
 0x585   :  { %vm541_vm6 = vmor %vm539_vm5, %vm540_vm2 }
 0x586   :  { %v536_v23 = vsub.f32 1.0, %v535_v21  ;;  %v388_v24 = vmul.f32 %v3098_v16, %v387_v20 }
 0x587   :  { %v442_v26 = vpop.f32.mrf.mxu0 }
 0x588   :  { %v389_v28 = vadd.f32 %v3098_v16, %v388_v24  ;;  %v537_v29 = vmul.f32 %v3100_v19, %v536_v23 }
 0x58a   :  { %v3102_v37 = vpop.eup %3101  ;;  %v393_v40 = vsel %vm392_vm3, %v3098_v16, %v389_v28  ;;  %v538_v42 = vadd.f32 %v3100_v19, %v537_v29 }
 0x58b   :  { %v447_v43 = vadd.f32 1.0, %v3102_v37  ;;  %v398_v44 = vsel %vm395_vm4, %v397_v36, %v393_v40  ;;  %v3622_v37 = vld [vmem:[#allocation5 + $0x78] sm:$0xff]  ;;  %v3625_v40 = vld [vmem:[#allocation5 + $0x70] sm:$0xff] }
 0x58c   :  { %v400_v49 = vmul.f32 2.0, %v398_v44  ;;  %v542_v50 = vsel %vm541_vm6, %v3100_v19, %v538_v42  ;;  %v402_v19 = vmul.f32 %v398_v44, %v3554_v39  ;;  %795 = vmatpush.bf16.msra.mxu1 %v3622_v37  ;;  %v3628_v42 = vld [vmem:[#allocation5 + $0x68] sm:$0xff] }
 0x58d   :  { %3103 = vrcp.f32 %v447_v43  ;;  %v547_v51 = vsel %vm544_vm7, %v546_v31, %v542_v50  ;;  %v459_v58 = vand.u32 2147483648, %v447_v43  ;;  %v457_v61 = vand.u32 2147483647, %v447_v43 }
 0x58e   :  { %v2825_v52 = vadd.f32 -1.0, %v400_v49  ;;  %v549_v53 = vmul.f32 2.0, %v547_v51  ;;  %vm453_vm9 = vweird.f32 %v447_v43  ;;  %v551_v15 = vmul.f32 0.0, %v547_v51 }
 0x58f   :  { %v460_v63 = vor.u32 1.1754944e-38, %v459_v58  ;;  %vm458_vm11 = vcmp.eq.f32.partialorder %v457_v61, 8.507059e+37 }
 0x590   :  { %404 = vrot.lane.b32.xlu0 %v2825_v52, %s3422_s28  ;;  %v2847_v54 = vadd.f32 -1.0, %v549_v53  ;;  %796 = vmatpush.bf16.msra.mxu1 %v3625_v40  ;;  %v569_v52 = vld [vmem:[#allocation3 + $0x18] sm:$0xff] }
 0x592   :  { %553 = vrot.lane.b32.xlu2 %v2847_v54, %s3422_s28 }
 0x593   :  { %v3104_v55 = vpop.eup %3103 }
 0x594   :  { %v449_v56 = vmul.f32 %v3104_v55, %v447_v43  ;;  %vm454_vm8 = vweird.f32 %v3104_v55  ;;  %797 = vmatpush.bf16.msra.mxu1 %v3628_v42  ;;  %v3631_v43 = vld [vmem:[#allocation5 + $0x60] sm:$0xff] }
 0x595   :  { %vm455_vm10 = vmor %vm453_vm9, %vm454_vm8 }
 0x596   :  { %v450_v57 = vsub.f32 1.0, %v449_v56 }
 0x598   :  { %v451_v59 = vmul.f32 %v3104_v55, %v450_v57  ;;  %798 = vmatpush.bf16.msra.mxu1 %v3631_v43 }
 0x59a   :  { %v452_v62 = vadd.f32 %v3104_v55, %v451_v59 }
 0x59c   :  { %v456_v0 = vsel %vm455_vm10, %v3104_v55, %v452_v62  ;;  %1046 = vmatpush.bf16.msrb.mxu1 %v3622_v37 }
 0x59d   :  { %v461_v4 = vsel %vm458_vm11, %v460_v63, %v456_v0 }
 0x59e   :  { %v463_v6 = vmul.f32 2.0, %v461_v4  ;;  %v465_v23 = vmul.f32 %v461_v4, %v3549_v30 }
 0x5a0   :  { %v2828_v7 = vadd.f32 -1.0, %v463_v6  ;;  %1047 = vmatpush.bf16.msrb.mxu1 %v3625_v40 }
 0x5a2   :  { %467 = vrot.lane.b32.xlu1 %v2828_v7, %s3422_s28 }
 0x5a4   :  { %1048 = vmatpush.bf16.msrb.mxu1 %v3628_v42 }
 0x5a8   :  { %1049 = vmatpush.bf16.msrb.mxu1 %v3631_v43 }
 0x5ec   :  { %v554_v9 = vpop.permute.xlu2 %553 }
 0x5ed   :  { %v556_v10 = vmul.f32 %v554_v9, %v547_v51 }
 0x5ef   :  { %558 = vrot.lane.b32.xlu2 %v556_v10, %s3430_s2 }
 0x602   :  { %v405_v11 = vpop.permute.xlu0 %404 }
 0x603   :  { %v407_v12 = vmul.f32 %v405_v11, %v398_v44 }
 0x605   :  { %409 = vrot.lane.b32.xlu0 %v407_v12, %s3430_s2 }
 0x614   :  { %v468_v13 = vpop.permute.xlu1 %467 }
 0x615   :  { %v470_v14 = vmul.f32 %v468_v13, %v461_v4 }
 0x617   :  { %472 = vrot.lane.b32.xlu1 %v470_v14, %s3430_s2 }
 0x649   :  { %v559_v16 = vpop.permute.xlu2 %558 }
 0x64a   :  { %v3603_v17 = vadd.f32 %v559_v16, %v551_v15 }
 0x64c   :  { %3105 = vtanh.f32 %v3603_v17 }
 0x652   :  { %v3106_v18 = vpop.eup %3105 }
 0x653   :  { %564 = vrot.lane.b32.xlu2 %v3106_v18, %s3422_s28 }
 0x677   :  { %v410_v20 = vpop.permute.xlu0 %409 }
 0x678   :  { %v3608_v21 = vadd.f32 %v410_v20, %v402_v19 }
 0x67a   :  { %3107 = vtanh.f32 %v3608_v21 }
 0x680   :  { %v3108_v22 = vpop.eup %3107 }
 0x681   :  { %415 = vrot.lane.b32.xlu0 %v3108_v22, %s3422_s28 }
 0x689   :  { %v473_v24 = vpop.permute.xlu1 %472 }
 0x68a   :  { %v3613_v25 = vadd.f32 %v473_v24, %v465_v23 }
 0x68c   :  { %3109 = vtanh.f32 %v3613_v25 }
 0x692   :  { %v3110_v26 = vpop.eup %3109 }
 0x693   :  { %478 = vrot.lane.b32.xlu1 %v3110_v26, %s3422_s28 }
 0x6ad   :  { %v565_v28 = vpop.permute.xlu2 %564 }
 0x6ae   :  { %v567_v29 = vmul.f32 %v565_v28, %v547_v51 }
 0x6f3   :  { %v416_v27 = vpop.permute.xlu0 %415 }
 0x6f4   :  { %v418_v39 = vmul.f32 %v416_v27, %v398_v44 }
 0x6f6   :  { %630 = vrot.lane.b32.xlu1 %v418_v39, %s3430_s2 }
 0x6fe   :  { %756 = vrot.lane.b32.xlu1 %v567_v29, %s3430_s2 }
 0x705   :  { %v479_v32 = vpop.permute.xlu1 %478 }
 0x706   :  { %v481_v36 = vmul.f32 %v479_v32, %v461_v4 }
 0x708   :  { %693 = vrot.lane.b32.xlu2 %v481_v36, %s3430_s2  ;;  %v3013_v30 = vpack.i.bf16 %v481_v36, %v418_v39 }
 0x70a   :  { %3014 = vrot.lane.b32.xlu0 %v3013_v30, %s3422_s28 }
 0x712   :  { %697 = vrot.lane.b32.xlu0 %v567_v29, %s3422_s28 }
 0x762   :  { %v694_v59 = vpop.permute.xlu2 %693 }
 0x768   :  { %v631_v44 = vpop.permute.xlu1 %630 }
 0x770   :  { %v757_v31 = vpop.permute.xlu1 %756 }
 0x771   :  { %v759_v49 = vsel %vm124_vm0, %v757_v31, 0.0 }
 0x772   :  { %v760_v50 = vpack.c.bf16 %v759_v49, %v759_v49 }
 0x774   :  { %2873 = vmatmul.msk.bf16.vlgmr.msra.gmra.mxu1 %vm154_vm1, %v760_v50 }
 0x775   :  { %1320 = vmatpush.bf16.msra.mxu1 %v3558_v41 }
 0x779   :  { %1321 = vmatpush.bf16.msra.mxu1 %v3566_v45 }
 0x77c   :  { %v3015_v51 = vpop.permute.xlu0 %3014 }
 0x77d   :  { %v3017_v53 = vunpack.i.h.bf16 %v3015_v51  ;;  %v3016_v54 = vunpack.i.l.bf16 %v3015_v51  ;;  %1322 = vmatpush.bf16.msra.mxu1 %v3570_v47 }
 0x77f   :  { %v574_v55 = vsel %vm124_vm0, %v569_v52, %v3016_v54  ;;  %v637_v56 = vsel %vm124_vm0, %v631_v44, %v3017_v53 }
 0x780   :  { %v575_v57 = vpack.c.bf16 %v574_v55, %v574_v55  ;;  %v638_v58 = vpack.c.bf16 %v637_v56, %v637_v56 }
 0x781   :  { %1323 = vmatpush.bf16.msra.mxu1 %v3574_v48 }
 0x782   :  { %2848 = vmatmul.msk.bf16.vlgmr.msrb.gmra.mxu2 %vm154_vm1, %v575_v57  ;;  %2851 = vmatmul.msk.bf16.vlgmr.msrb.gmra.mxu3 %vm154_vm1, %v638_v58 }
 0x783   :  { %1194 = vmatpush.bf16.msrb.mxu3 %v3476_v1  ;;  %v3658_v1 = vld [vmem:[#allocation7 + $0x3] ss:$0 sm:$0xff] }
 0x784   :  { %v698_v61 = vpop.permute.xlu0 %697 }
 0x785   :  { %v700_v62 = vsel %vm124_vm0, %v694_v59, %v698_v61 }
 0x786   :  { %v701_v63 = vpack.c.bf16 %v700_v62, %v700_v62 }
 0x787   :  { %1195 = vmatpush.bf16.msrb.mxu3 %v3479_v2 }
 0x788   :  { %2854 = vmatmul.msk.bf16.vlgmr.msra.gmra.mxu0 %vm154_vm1, %v701_v63 }
 0x789   :  { %1257 = vmatpush.bf16.msra.mxu0 %v3507_v33 }
 0x78b   :  { %1196 = vmatpush.bf16.msrb.mxu3 %v3484_v3 }
 0x78d   :  { %1258 = vmatpush.bf16.msra.mxu0 %v3510_v34 }
 0x78f   :  { %1197 = vmatpush.bf16.msrb.mxu3 %v3489_v5 }
 0x791   :  { %1259 = vmatpush.bf16.msra.mxu0 %v3515_v35 }
 0x795   :  { %1260 = vmatpush.bf16.msra.mxu0 %v3524_v38 }
 0x7f1   :  { %v800_v0 = vpop.f32.mrf.mxu1 }
 0x7f2   :  { %v801_v4 = vadd.f32 %v3658_v1, %v800_v0 }
 0x7f4   :  { %v2874_v2 = vmul.f32 -1.442695, %v801_v4 }
 0x7f6   :  { %3111 = vpow2.f32 %v2874_v2 }
 0x7f9   :  { %v802_v6 = vpop.f32.mrf.mxu1 }
 0x7fc   :  { %v3112_v7 = vpop.eup %3111 }
 0x7fd   :  { %v3661_v9 = vadd.f32 1.0, %v3112_v7 }
 0x7ff   :  { %3113 = vrcp.f32 %v3661_v9  ;;  %vm813_vm13 = vweird.f32 %v3661_v9  ;;  %v817_v52 = vand.u32 2147483647, %v3661_v9  ;;  %v819_v56 = vand.u32 2147483648, %v3661_v9 }
 0x805   :  { %v588_v3 = vpop.f32.mrf.mxu2  ;;  %v651_v10 = vpop.f32.mrf.mxu3 }
 0x806   :  { %v589_v5 = vadd.f32 %v3498_v8, %v588_v3  ;;  %v652_v11 = vadd.f32 %v3541_v46, %v651_v10  ;;  %v714_v12 = vpop.f32.mrf.mxu0  ;;  %v3667_v16 = vpop.eup %3113 }
 0x807   :  { %v715_v13 = vadd.f32 %v3592_v60, %v714_v12  ;;  %v809_v19 = vmul.f32 %v3667_v16, %v3661_v9  ;;  %vm814_vm12 = vweird.f32 %v3667_v16 }
 0x808   :  { %v2849_v14 = vmul.f32 -1.442695, %v589_v5  ;;  %v2852_v15 = vmul.f32 -1.442695, %v652_v11  ;;  %vm3675_vm14 = vmor %vm813_vm13, %vm814_vm12  ;;  %vm818_vm13 = vcmp.eq.f32.partialorder %v817_v52, 8.507059e+37 }
 0x809   :  { %v2855_v18 = vmul.f32 -1.442695, %v715_v13  ;;  %v810_v24 = vsub.f32 1.0, %v809_v19 }
 0x80a   :  { %3115 = vpow2.f32 %v2849_v14 }
 0x80b   :  { %3117 = vpow2.f32 %v2852_v15  ;;  %v811_v32 = vmul.f32 %v3667_v16, %v810_v24 }
 0x80c   :  { %3119 = vpow2.f32 %v2855_v18 }
 0x80d   :  { %v590_v20 = vpop.f32.mrf.mxu2  ;;  %v653_v22 = vpop.f32.mrf.mxu3  ;;  %v812_v36 = vadd.f32 %v3667_v16, %v811_v32 }
 0x80e   :  { %v716_v23 = vpop.f32.mrf.mxu0 }
 0x80f   :  { %v816_v55 = vsel %vm3675_vm14, %v3667_v16, %v812_v36  ;;  %v820_v23 = vor.u32 1.1754944e-38, %v819_v56 }
 0x810   :  { %v3116_v8 = vpop.eup %3115 }
 0x811   :  { %v3118_v26 = vpop.eup %3117  ;;  %v595_v27 = vadd.f32 1.0, %v3116_v8 }
 0x812   :  { %v3120_v39 = vpop.eup %3119  ;;  %v658_v28 = vadd.f32 1.0, %v3118_v26 }
 0x813   :  { %3121 = vrcp.f32 %v595_v27  ;;  %v721_v29 = vadd.f32 1.0, %v3120_v39  ;;  %vm601_vm15 = vweird.f32 %v595_v27  ;;  %v605_v58 = vand.u32 2147483647, %v595_v27 }
 0x814   :  { %3123 = vrcp.f32 %v658_v28  ;;  %v607_v59 = vand.u32 2147483648, %v595_v27  ;;  %v670_v63 = vand.u32 2147483648, %v658_v28  ;;  %v668_v4 = vand.u32 2147483647, %v658_v28 }
 0x815   :  { %3125 = vrcp.f32 %v721_v29  ;;  %v733_v2 = vand.u32 2147483648, %v721_v29  ;;  %v731_v3 = vand.u32 2147483647, %v721_v29  ;;  %vm606_vm6 = vcmp.eq.f32.partialorder %v605_v58, 8.507059e+37 }
 0x816   :  { %v608_v9 = vor.u32 1.1754944e-38, %v607_v59  ;;  %vm664_vm7 = vweird.f32 %v658_v28  ;;  %v671_v11 = vor.u32 1.1754944e-38, %v670_v63  ;;  %vm727_vm9 = vweird.f32 %v721_v29 }
 0x817   :  { %vm669_vm10 = vcmp.eq.f32.partialorder %v668_v4, 8.507059e+37  ;;  %v734_v15 = vor.u32 1.1754944e-38, %v733_v2  ;;  %vm732_vm12 = vcmp.eq.f32.partialorder %v731_v3, 8.507059e+37 }
 0x819   :  { %v3122_v30 = vpop.eup %3121 }
 0x81a   :  { %v3124_v44 = vpop.eup %3123  ;;  %v597_v31 = vmul.f32 %v3122_v30, %v595_v27  ;;  %vm602_vm2 = vweird.f32 %v3122_v30  ;;  %v821_v27 = vsel %vm818_vm13, %v820_v23, %v816_v55 }
 0x81b   :  { %v3126_v49 = vpop.eup %3125  ;;  %v660_v50 = vmul.f32 %v3124_v44, %v658_v28  ;;  %vm665_vm3 = vweird.f32 %v3124_v44  ;;  %vm603_vm5 = vmor %vm601_vm15, %vm602_vm2  ;;  %v823_v28 = vmul.f32 2.0, %v821_v27  ;;  %v825_v58 = vmul.f32 0.0, %v821_v27 }
 0x81c   :  { %v598_v53 = vsub.f32 1.0, %v597_v31  ;;  %v723_v54 = vmul.f32 %v3126_v49, %v721_v29  ;;  %vm728_vm4 = vweird.f32 %v3126_v49  ;;  %vm666_vm8 = vmor %vm664_vm7, %vm665_vm3 }
 0x81d   :  { %v661_v57 = vsub.f32 1.0, %v660_v50  ;;  %vm729_vm11 = vmor %vm727_vm9, %vm728_vm4  ;;  %v2875_v29 = vadd.f32 -1.0, %v823_v28 }
 0x81e   :  { %v724_v61 = vsub.f32 1.0, %v723_v54  ;;  %v599_v62 = vmul.f32 %v3122_v30, %v598_v53 }
 0x81f   :  { %v662_v0 = vmul.f32 %v3124_v44, %v661_v57 }
 0x820   :  { %v600_v6 = vadd.f32 %v3122_v30, %v599_v62  ;;  %v725_v7 = vmul.f32 %v3126_v49, %v724_v61 }
 0x821   :  { %v663_v10 = vadd.f32 %v3124_v44, %v662_v0 }
 0x822   :  { %v604_v5 = vsel %vm603_vm5, %v3122_v30, %v600_v6  ;;  %v726_v12 = vadd.f32 %v3126_v49, %v725_v7 }
 0x823   :  { %v609_v13 = vsel %vm606_vm6, %v608_v9, %v604_v5  ;;  %v667_v14 = vsel %vm666_vm8, %v3124_v44, %v663_v10 }
 0x824   :  { %v611_v16 = vmul.f32 2.0, %v609_v13  ;;  %v672_v18 = vsel %vm669_vm10, %v671_v11, %v667_v14  ;;  %v730_v19 = vsel %vm729_vm11, %v3126_v49, %v726_v12  ;;  %v613_v52 = vmul.f32 %v609_v13, %v3608_v21  ;;  %v3723_v14 = vld [vmem:[#allocation5 + $0x90] sm:$0xff] }
 0x825   :  { %v674_v20 = vmul.f32 2.0, %v672_v18  ;;  %v735_v22 = vsel %vm732_vm12, %v734_v15, %v730_v19  ;;  %v676_v63 = vmul.f32 %v672_v18, %v3613_v25  ;;  %v3726_v15 = vld [vmem:[#allocation5 + $0x88] sm:$0xff] }
 0x826   :  { %v2850_v8 = vadd.f32 -1.0, %v611_v16  ;;  %v737_v24 = vmul.f32 2.0, %v735_v22  ;;  %v739_v55 = vmul.f32 %v735_v22, %v3603_v17  ;;  %v3729_v16 = vld [vmem:[#allocation5 + $0x80] sm:$0xff] }
 0x827   :  { %v2853_v26 = vadd.f32 -1.0, %v674_v20 }
 0x828   :  { %615 = vrot.lane.b32.xlu2 %v2850_v8, %s3422_s28  ;;  %v2856_v39 = vadd.f32 -1.0, %v737_v24 }
 0x829   :  { %678 = vrot.lane.b32.xlu0 %v2853_v26, %s3422_s28 }
 0x82a   :  { %741 = vrot.lane.b32.xlu1 %v2856_v39, %s3422_s28 }
 0x830   :  { %827 = vrot.lane.b32.xlu2 %v2875_v29, %s3422_s28 }
 0x882   :  { %v616_v32 = vpop.permute.xlu2 %615 }
 0x883   :  { %v618_v36 = vmul.f32 %v616_v32, %v609_v13 }
 0x885   :  { %620 = vrot.lane.b32.xlu0 %v618_v36, %s3430_s2 }
 0x88a   :  { %v828_v30 = vpop.permute.xlu2 %827 }
 0x88b   :  { %v830_v44 = vmul.f32 %v828_v30, %v821_v27 }
 0x88d   :  { %832 = vrot.lane.b32.xlu0 %v830_v44, %s3430_s2 }
 0x89b   :  { %v679_v31 = vpop.permute.xlu0 %678 }
 0x89c   :  { %v681_v49 = vmul.f32 %v679_v31, %v672_v18  ;;  %v742_v50 = vpop.permute.xlu1 %741  ;;  %v3746_v31 = vld [vmem:[#allocation5 + $0x18] sm:$0xff] }
 0x89d   :  { %v744_v51 = vmul.f32 %v742_v50, %v735_v22 }
 0x89e   :  { %683 = vrot.lane.b32.xlu1 %v681_v49, %s3430_s2 }
 0x89f   :  { %746 = vrot.lane.b32.xlu2 %v744_v51, %s3430_s2 }
 0x8f7   :  { %v621_v53 = vpop.permute.xlu0 %620 }
 0x8f8   :  { %v3695_v54 = vadd.f32 %v621_v53, %v613_v52  ;;  %v3758_v53 = vld [vmem:[#allocation5 + $0x8] sm:$0xff] }
 0x8f9   :  { %v747_v56 = vpop.permute.xlu2 %746 }
 0x8fa   :  { %3127 = vtanh.f32 %v3695_v54  ;;  %v3699_v57 = vadd.f32 %v747_v56, %v739_v55  ;;  %v3770_v55 = vld [vmem:[#allocation7] ss:$0 sm:$0xff] }
 0x8fc   :  { %3129 = vtanh.f32 %v3699_v57 }
 0x8ff   :  { %v833_v59 = vpop.permute.xlu0 %832 }
 0x900   :  { %v3128_v61 = vpop.eup %3127  ;;  %v3702_v62 = vadd.f32 %v833_v59, %v825_v58 }
 0x901   :  { %626 = vrot.lane.b32.xlu1 %v3128_v61, %s3422_s28  ;;  %v3773_v61 = vld [vmem:[#allocation7 + $0x4] ss:$0 sm:$0xff] }
 0x902   :  { %v3130_v21 = vpop.eup %3129  ;;  %3131 = vtanh.f32 %v3702_v62 }
 0x903   :  { %752 = vrot.lane.b32.xlu0 %v3130_v21, %s3422_s28 }
 0x908   :  { %v3132_v17 = vpop.eup %3131 }
 0x909   :  { %838 = vrot.lane.b32.xlu1 %v3132_v17, %s3422_s28 }
 0x910   :  { %v684_v0 = vpop.permute.xlu1 %683 }
 0x911   :  { %v3709_v4 = vadd.f32 %v684_v0, %v676_v63 }
 0x913   :  { %3133 = vtanh.f32 %v3709_v4 }
 0x919   :  { %v3134_v2 = vpop.eup %3133 }
 0x91a   :  { %689 = vrot.lane.b32.xlu2 %v3134_v2, %s3422_s28 }
 0x973   :  { %v627_v6 = vpop.permute.xlu1 %626 }
 0x974   :  { %v629_v7 = vmul.f32 %v627_v6, %v609_v13  ;;  %v690_v3 = vpop.permute.xlu2 %689  ;;  %v3720_v13 = vld [vmem:[#allocation5 + $0x98] sm:$0xff] }
 0x975   :  { %v692_v9 = vmul.f32 %v690_v3, %v672_v18  ;;  %v753_v5 = vpop.permute.xlu0 %752  ;;  %1132 = vmatpush.bf16.msrb.mxu2 %v3720_v13  ;;  %v843_v18 = vld [vmem:[#allocation3 + $0x20] sm:$0xff] }
 0x976   :  { %904 = vrot.lane.b32.xlu0 %v629_v7, %s3430_s2  ;;  %v755_v11 = vmul.f32 %v753_v5, %v735_v22 }
 0x977   :  { %967 = vrot.lane.b32.xlu1 %v692_v9, %s3430_s2  ;;  %v3018_v10 = vpack.i.bf16 %v692_v9, %v629_v7 }
 0x979   :  { %3019 = vrot.lane.b32.xlu2 %v3018_v10, %s3422_s28  ;;  %1133 = vmatpush.bf16.msrb.mxu2 %v3723_v14 }
 0x97b   :  { %v839_v25 = vpop.permute.xlu1 %838 }
 0x97c   :  { %v841_v12 = vmul.f32 %v839_v25, %v821_v27 }
 0x97d   :  { %1134 = vmatpush.bf16.msrb.mxu2 %v3726_v15 }
 0x97e   :  { %1030 = vrot.lane.b32.xlu0 %v755_v11, %s3430_s2 }
 0x97f   :  { %1034 = vrot.lane.b32.xlu1 %v841_v12, %s3422_s28 }
 0x981   :  { %971 = vrot.lane.b32.xlu2 %v755_v11, %s3422_s28  ;;  %1135 = vmatpush.bf16.msrb.mxu2 %v3729_v16 }
 0x989   :  { %1093 = vrot.lane.b32.xlu2 %v841_v12, %s3430_s2 }
 0x9d3   :  { %v3020_v19 = vpop.permute.xlu2 %3019 }
 0x9d4   :  { %v3021_v20 = vunpack.i.l.bf16 %v3020_v19  ;;  %v3022_v27 = vunpack.i.h.bf16 %v3020_v19 }
 0x9d6   :  { %v848_v22 = vsel %vm124_vm0, %v843_v18, %v3021_v20 }
 0x9d7   :  { %v849_v23 = vpack.c.bf16 %v848_v22, %v848_v22 }
 0x9d9   :  { %2876 = vmatmul.msk.bf16.vlgmr.msra.gmra.mxu2 %vm154_vm1, %v849_v23 }
 0x9da   :  { %1383 = vmatpush.bf16.msra.mxu2 %v3622_v37 }
 0x9db   :  { %v972_v8 = vpop.permute.xlu2 %971 }
 0x9de   :  { %1384 = vmatpush.bf16.msra.mxu2 %v3625_v40 }
 0x9e2   :  { %1385 = vmatpush.bf16.msra.mxu2 %v3628_v42 }
 0x9e3   :  { %v1094_v24 = vpop.permute.xlu2 %1093 }
 0x9e4   :  { %v1096_v26 = vsel %vm124_vm0, %v1094_v24, 0.0 }
 0x9e5   :  { %v1097_v39 = vpack.c.bf16 %v1096_v26, %v1096_v26 }
 0x9e6   :  { %1386 = vmatpush.bf16.msra.mxu2 %v3631_v43 }
 0x9e8   :  { %v905_v28 = vpop.permute.xlu0 %904 }
 0x9e9   :  { %v911_v29 = vsel %vm124_vm0, %v905_v28, %v3022_v27  ;;  %v968_v32 = vpop.permute.xlu1 %967  ;;  %2904 = vmatmul.msk.bf16.vlgmr.msrb.gmra.mxu2 %vm154_vm1, %v1097_v39 }
 0x9ea   :  { %v912_v36 = vpack.c.bf16 %v911_v29, %v911_v29  ;;  %v974_v30 = vsel %vm124_vm0, %v968_v32, %v972_v8  ;;  %1634 = vmatpush.bf16.msrb.mxu2 %v3558_v41  ;;  %v3752_v41 = vld [vmem:[#allocation5 + $0x10] sm:$0xff] }
 0x9eb   :  { %v975_v44 = vpack.c.bf16 %v974_v30, %v974_v30 }
 0x9ec   :  { %2879 = vmatmul.msk.bf16.vlgmr.msra.gmra.mxu3 %vm154_vm1, %v912_v36 }
 0x9ed   :  { %2882 = vmatmul.msk.bf16.vlgmr.msrb.gmra.mxu0 %vm154_vm1, %v975_v44  ;;  %1446 = vmatpush.bf16.msra.mxu3 %v3720_v13 }
 0x9ee   :  { %1508 = vmatpush.bf16.msrb.mxu0 %v3746_v31  ;;  %1635 = vmatpush.bf16.msrb.mxu2 %v3566_v45  ;;  %v3764_v45 = vld [vmem:[#allocation5] sm:$0xff] }
 0x9f0   :  { %v1031_v49 = vpop.permute.xlu0 %1030 }
 0x9f1   :  { %v1035_v50 = vpop.permute.xlu1 %1034  ;;  %1447 = vmatpush.bf16.msra.mxu3 %v3723_v14 }
 0x9f2   :  { %v1037_v51 = vsel %vm124_vm0, %v1031_v49, %v1035_v50  ;;  %1509 = vmatpush.bf16.msrb.mxu0 %v3752_v41  ;;  %1636 = vmatpush.bf16.msrb.mxu2 %v3570_v47 }
 0x9f3   :  { %v1038_v52 = vpack.c.bf16 %v1037_v51, %v1037_v51 }
 0x9f5   :  { %2885 = vmatmul.msk.bf16.vlgmr.msrb.gmra.mxu1 %vm154_vm1, %v1038_v52  ;;  %1448 = vmatpush.bf16.msra.mxu3 %v3726_v15 }
 0x9f6   :  { %1510 = vmatpush.bf16.msrb.mxu0 %v3758_v53  ;;  %1571 = vmatpush.bf16.msrb.mxu1 %v3507_v33 }
 0x9f7   :  { %1637 = vmatpush.bf16.msrb.mxu2 %v3574_v48 }
 0x9f9   :  { %1449 = vmatpush.bf16.msra.mxu3 %v3729_v16 }
 0x9fa   :  { %1511 = vmatpush.bf16.msrb.mxu0 %v3764_v45  ;;  %1572 = vmatpush.bf16.msrb.mxu1 %v3510_v34 }
 0x9fe   :  { %1573 = vmatpush.bf16.msrb.mxu1 %v3515_v35 }
 0xa02   :  { %1574 = vmatpush.bf16.msrb.mxu1 %v3524_v38 }
 0xa5c   :  { %v862_v47 = vpop.f32.mrf.mxu2 }
 0xa5d   :  { %v863_v56 = vadd.f32 %v3770_v55, %v862_v47 }
 0xa5f   :  { %v2877_v33 = vmul.f32 -1.442695, %v863_v56 }
 0xa61   :  { %3135 = vpow2.f32 %v2877_v33 }
 0xa64   :  { %v864_v48 = vpop.f32.mrf.mxu2 }
 0xa67   :  { %v3136_v58 = vpop.eup %3135 }
 0xa68   :  { %v869_v59 = vadd.f32 1.0, %v3136_v58 }
 0xa6a   :  { %3137 = vrcp.f32 %v869_v59  ;;  %v988_v21 = vpop.f32.mrf.mxu0  ;;  %v881_v11 = vand.u32 2147483648, %v869_v59  ;;  %v879_v20 = vand.u32 2147483647, %v869_v59  ;;  %vm875_vm15 = vweird.f32 %v869_v59 }
 0xa6b   :  { %v989_v34 = vadd.f32 %v3592_v60, %v988_v21 }
 0xa6c   :  { %v1137_v17 = vpop.f32.mrf.mxu2  ;;  %v882_v26 = vor.u32 1.1754944e-38, %v881_v11  ;;  %vm880_vm3 = vcmp.eq.f32.partialorder %v879_v20, 8.507059e+37 }
 0xa6d   :  { %v2883_v35 = vmul.f32 -1.442695, %v989_v34  ;;  %v1138_v38 = vadd.f32 %v3773_v61, %v1137_v17 }
 0xa6f   :  { %3139 = vpow2.f32 %v2883_v35  ;;  %v2905_v63 = vmul.f32 -1.442695, %v1138_v38  ;;  %v925_v0 = vpop.f32.mrf.mxu3 }
 0xa70   :  { %v3138_v2 = vpop.eup %3137  ;;  %v926_v6 = vadd.f32 %v3541_v46, %v925_v0 }
 0xa71   :  { %v871_v7 = vmul.f32 %v3138_v2, %v869_v59  ;;  %3141 = vpow2.f32 %v2905_v63  ;;  %vm876_vm14 = vweird.f32 %v3138_v2 }
 0xa72   :  { %v2880_v3 = vmul.f32 -1.442695, %v926_v6  ;;  %v990_v9 = vpop.f32.mrf.mxu0  ;;  %v1051_v10 = vpop.f32.mrf.mxu1  ;;  %vm877_vm2 = vmor %vm875_vm15, %vm876_vm14 }
 0xa73   :  { %v872_v5 = vsub.f32 1.0, %v871_v7  ;;  %v1052_v25 = vadd.f32 %v3658_v1, %v1051_v10 }
 0xa74   :  { %3143 = vpow2.f32 %v2880_v3  ;;  %v1139_v60 = vpop.f32.mrf.mxu2 }
 0xa75   :  { %v3140_v12 = vpop.eup %3139  ;;  %v2886_v18 = vmul.f32 -1.442695, %v1052_v25  ;;  %v873_v19 = vmul.f32 %v3138_v2, %v872_v5 }
 0xa76   :  { %v995_v22 = vadd.f32 1.0, %v3140_v12 }
 0xa77   :  { %v3142_v23 = vpop.eup %3141  ;;  %3145 = vpow2.f32 %v2886_v18  ;;  %v927_v46 = vpop.f32.mrf.mxu3  ;;  %v874_v8 = vadd.f32 %v3138_v2, %v873_v19 }
 0xa78   :  { %3147 = vrcp.f32 %v995_v22  ;;  %v3779_v24 = vadd.f32 1.0, %v3142_v23  ;;  %v1007_v33 = vand.u32 2147483648, %v995_v22  ;;  %v1005_v21 = vand.u32 2147483647, %v995_v22 }
 0xa79   :  { %v878_v27 = vsel %vm877_vm2, %v3138_v2, %v874_v8  ;;  %vm1001_vm5 = vweird.f32 %v995_v22 }
 0xa7a   :  { %v3144_v39 = vpop.eup %3143  ;;  %3149 = vrcp.f32 %v3779_v24  ;;  %v1053_v28 = vpop.f32.mrf.mxu1  ;;  %v3782_v29 = vsel %vm880_vm3, %v882_v26, %v878_v27  ;;  %v1008_v0 = vor.u32 1.1754944e-38, %v1007_v33  ;;  %vm1006_vm7 = vcmp.eq.f32.partialorder %v1005_v21, 8.507059e+37 }
 0xa7b   :  { %v932_v32 = vadd.f32 1.0, %v3144_v39  ;;  %v885_v36 = vmul.f32 2.0, %v3782_v29  ;;  %v1156_v3 = vand.u32 2147483648, %v3779_v24  ;;  %vm1150_vm14 = vweird.f32 %v3779_v24 }
 0xa7c   :  { %v1154_v8 = vand.u32 2147483647, %v3779_v24 }
 0xa7d   :  { %v3146_v30 = vpop.eup %3145  ;;  %3151 = vrcp.f32 %v932_v32  ;;  %v2878_v44 = vadd.f32 -1.0, %v885_v36  ;;  %v944_v35 = vand.u32 2147483648, %v932_v32  ;;  %v942_v5 = vand.u32 2147483647, %v932_v32 }
 0xa7e   :  { %v3148_v49 = vpop.eup %3147  ;;  %v1058_v50 = vadd.f32 1.0, %v3146_v30  ;;  %vm938_vm9 = vweird.f32 %v932_v32  ;;  %v1157_v30 = vor.u32 1.1754944e-38, %v1156_v3 }
 0xa7f   :  { %v997_v51 = vmul.f32 %v3148_v49, %v995_v22  ;;  %889 = vrot.lane.b32.xlu0 %v2878_v44, %s3422_s28  ;;  %vm1002_vm4 = vweird.f32 %v3148_v49  ;;  %v945_v11 = vor.u32 1.1754944e-38, %v944_v35  ;;  %vm943_vm13 = vcmp.eq.f32.partialorder %v942_v5, 8.507059e+37 }
 0xa80   :  { %v3150_v52 = vpop.eup %3149  ;;  %3153 = vrcp.f32 %v1058_v50  ;;  %vm1003_vm6 = vmor %vm1001_vm5, %vm1002_vm4  ;;  %v1070_v18 = vand.u32 2147483648, %v1058_v50  ;;  %v1068_v23 = vand.u32 2147483647, %v1058_v50  ;;  %vm1064_vm15 = vweird.f32 %v1058_v50 }
 0xa81   :  { %v998_v47 = vsub.f32 1.0, %v997_v51  ;;  %v1146_v56 = vmul.f32 %v3150_v52, %v3779_v24  ;;  %vm1151_vm10 = vweird.f32 %v3150_v52  ;;  %vm1155_vm5 = vcmp.eq.f32.partialorder %v1154_v8, 8.507059e+37 }
 0xa82   :  { %vm1152_vm2 = vmor %vm1150_vm14, %vm1151_vm10  ;;  %v1071_v28 = vor.u32 1.1754944e-38, %v1070_v18  ;;  %vm1069_vm4 = vcmp.eq.f32.partialorder %v1068_v23, 8.507059e+37 }
 0xa83   :  { %v3152_v48 = vpop.eup %3151  ;;  %v1147_v58 = vsub.f32 1.0, %v1146_v56  ;;  %v999_v59 = vmul.f32 %v3148_v49, %v998_v47 }
 0xa84   :  { %v934_v34 = vmul.f32 %v3152_v48, %v932_v32  ;;  %vm939_vm8 = vweird.f32 %v3152_v48 }
 0xa85   :  { %v1000_v17 = vadd.f32 %v3148_v49, %v999_v59  ;;  %v1148_v2 = vmul.f32 %v3150_v52, %v1147_v58  ;;  %vm940_vm11 = vmor %vm938_vm9, %vm939_vm8 }
 0xa86   :  { %v3154_v38 = vpop.eup %3153  ;;  %v935_v63 = vsub.f32 1.0, %v934_v34 }
 0xa87   :  { %v1060_v6 = vmul.f32 %v3154_v38, %v1058_v50  ;;  %v1004_v7 = vsel %vm1003_vm6, %v3148_v49, %v1000_v17  ;;  %v1149_v19 = vadd.f32 %v3150_v52, %v1148_v2  ;;  %vm1065_vm12 = vweird.f32 %v3154_v38 }
 0xa88   :  { %v3788_v9 = vsel %vm1006_vm7, %v1008_v0, %v1004_v7  ;;  %v936_v10 = vmul.f32 %v3152_v48, %v935_v63  ;;  %vm1066_vm3 = vmor %vm1064_vm15, %vm1065_vm12  ;;  %v887_v63 = vmul.f32 %v3782_v29, %v3695_v54 }
 0xa89   :  { %v1061_v25 = vsub.f32 1.0, %v1060_v6  ;;  %v1011_v60 = vmul.f32 2.0, %v3788_v9  ;;  %v1153_v32 = vsel %vm1152_vm2, %v3150_v52, %v1149_v19  ;;  %v1013_v7 = vmul.f32 %v3788_v9, %v3699_v57 }
 0xa8a   :  { %v937_v12 = vadd.f32 %v3152_v48, %v936_v10  ;;  %v3800_v51 = vsel %vm1155_vm5, %v1157_v30, %v1153_v32 }
 0xa8b   :  { %v2884_v20 = vadd.f32 -1.0, %v1011_v60  ;;  %v1062_v22 = vmul.f32 %v3154_v38, %v1061_v25  ;;  %v1160_v47 = vmul.f32 2.0, %v3800_v51 }
 0xa8c   :  { %v941_v46 = vsel %vm940_vm11, %v3152_v48, %v937_v12 }
 0xa8d   :  { %1015 = vrot.lane.b32.xlu2 %v2884_v20, %s3422_s28  ;;  %v3794_v26 = vsel %vm943_vm13, %v945_v11, %v941_v46  ;;  %v1063_v27 = vadd.f32 %v3154_v38, %v1062_v22  ;;  %v2906_v56 = vadd.f32 -1.0, %v1160_v47 }
 0xa8e   :  { %v948_v39 = vmul.f32 2.0, %v3794_v26  ;;  %v950_v57 = vmul.f32 %v3794_v26, %v3709_v4 }
 0xa8f   :  { %v1067_v36 = vsel %vm1066_vm3, %v3154_v38, %v1063_v27 }
 0xa90   :  { %v2881_v44 = vadd.f32 -1.0, %v948_v39  ;;  %v3797_v49 = vsel %vm1069_vm4, %v1071_v28, %v1067_v36 }
 0xa91   :  { %v1074_v24 = vmul.f32 2.0, %v3797_v49  ;;  %v1076_v5 = vmul.f32 %v3797_v49, %v3702_v62  ;;  %v1162_v62 = vmul.f32 0.0, %v3800_v51 }
 0xa92   :  { %952 = vrot.lane.b32.xlu1 %v2881_v44, %s3422_s28 }
 0xa93   :  { %v2887_v50 = vadd.f32 -1.0, %v1074_v24 }
 0xa95   :  { %1078 = vrot.lane.b32.xlu0 %v2887_v50, %s3422_s28 }
 0xa9a   :  { %1164 = vrot.lane.b32.xlu1 %v2906_v56, %s3422_s28 }
 0xae7   :  { %v1016_v52 = vpop.permute.xlu2 %1015 }
 0xae8   :  { %v1018_v33 = vmul.f32 %v1016_v52, %v3788_v9 }
 0xaea   :  { %1020 = vrot.lane.b32.xlu1 %v1018_v33, %s3430_s2 }
 0xaf1   :  { %v890_v48 = vpop.permute.xlu0 %889 }
 0xaf2   :  { %v892_v58 = vmul.f32 %v890_v48, %v3782_v29 }
 0xaf4   :  { %894 = vrot.lane.b32.xlu2 %v892_v58, %s3430_s2 }
 0xb04   :  { %v953_v59 = vpop.permute.xlu1 %952 }
 0xb05   :  { %v955_v21 = vmul.f32 %v953_v59, %v3794_v26 }
 0xb07   :  { %v1079_v34 = vpop.permute.xlu0 %1078  ;;  %957 = vrot.lane.b32.xlu0 %v955_v21, %s3430_s2 }
 0xb08   :  { %v1081_v17 = vmul.f32 %v1079_v34, %v3797_v49 }
 0xb0a   :  { %1083 = vrot.lane.b32.xlu2 %v1081_v17, %s3430_s2 }
 0xb0c   :  { %v1165_v35 = vpop.permute.xlu1 %1164 }
 0xb0d   :  { %v1167_v38 = vmul.f32 %v1165_v35, %v3800_v51 }
 0xb0f   :  { %1169 = vrot.lane.b32.xlu0 %v1167_v38, %s3430_s2 }
 0xb4e   :  { %v895_v0 = vpop.permute.xlu2 %894 }
 0xb4f   :  { %v3818_v2 = vadd.f32 %v895_v0, %v887_v63  ;;  %v3871_v63 = vld [vmem:[#allocation5 + $0x38] sm:$0xff] }
 0xb51   :  { %3155 = vtanh.f32 %v3818_v2 }
 0xb57   :  { %v3156_v6 = vpop.eup %3155 }
 0xb58   :  { %900 = vrot.lane.b32.xlu1 %v3156_v6, %s3422_s28 }
 0xb5c   :  { %v1021_v3 = vpop.permute.xlu1 %1020 }
 0xb5d   :  { %v3824_v10 = vadd.f32 %v1021_v3, %v1013_v7  ;;  %v3903_v7 = vld [vmem:[#allocation7 + $0x1] ss:$0 sm:$0xff] }
 0xb5f   :  { %3157 = vtanh.f32 %v3824_v10 }
 0xb64   :  { %v1084_v54 = vpop.permute.xlu2 %1083 }
 0xb65   :  { %v3158_v25 = vpop.eup %3157  ;;  %v3829_v60 = vadd.f32 %v1084_v54, %v1076_v5  ;;  %v3906_v54 = vld [vmem:[#allocation7 + $0x2] ss:$0 sm:$0xff] }
 0xb66   :  { %1026 = vrot.lane.b32.xlu0 %v3158_v25, %s3422_s28 }
 0xb67   :  { %3159 = vtanh.f32 %v3829_v60 }
 0xb6d   :  { %v3160_v11 = vpop.eup %3159 }
 0xb6e   :  { %1089 = vrot.lane.b32.xlu1 %v3160_v11, %s3422_s28 }
 0xb79   :  { %v958_v12 = vpop.permute.xlu0 %957 }
 0xb7a   :  { %v3836_v18 = vadd.f32 %v958_v12, %v950_v57 }
 0xb7c   :  { %3161 = vtanh.f32 %v3836_v18 }
 0xb81   :  { %v1170_v19 = vpop.permute.xlu0 %1169 }
 0xb82   :  { %v3162_v20 = vpop.eup %3161  ;;  %v3840_v22 = vadd.f32 %v1170_v19, %v1162_v62 }
 0xb83   :  { %963 = vrot.lane.b32.xlu2 %v3162_v20, %s3422_s28 }
 0xb84   :  { %3163 = vtanh.f32 %v3840_v22 }
 0xb8a   :  { %v3164_v23 = vpop.eup %3163 }
 0xb8b   :  { %1175 = vrot.lane.b32.xlu2 %v3164_v23, %s3422_s28 }
 0xbca   :  { %v901_v46 = vpop.permute.xlu1 %900 }
 0xbcb   :  { %v903_v39 = vmul.f32 %v901_v46, %v3782_v29 }
 0xbd8   :  { %v1027_v4 = vpop.permute.xlu0 %1026 }
 0xbd9   :  { %v1029_v8 = vmul.f32 %v1027_v4, %v3788_v9 }
 0xbdb   :  { %1308 = vrot.lane.b32.xlu2 %v1029_v8, %s3422_s28 }
 0xbdd   :  { %v964_v27 = vpop.permute.xlu2 %963 }
 0xbde   :  { %v966_v28 = vmul.f32 %v964_v27, %v3794_v26  ;;  %v1180_v26 = vld [vmem:[#allocation3 + $0x28] sm:$0xff] }
 0xbe0   :  { %v3028_v32 = vpack.i.bf16 %v966_v28, %v903_v39  ;;  %v1090_v36 = vpop.permute.xlu1 %1089 }
 0xbe1   :  { %v1092_v30 = vmul.f32 %v1090_v36, %v3797_v49 }
 0xbe2   :  { %3029 = vrot.lane.b32.xlu1 %v3028_v32, %s3430_s2  ;;  %3024 = vrot.lane.b32.xlu0 %v3028_v32, %s3422_s28 }
 0xbe3   :  { %1430 = vrot.lane.b32.xlu2 %v1092_v30, %s3430_s2 }
 0xbe5   :  { %v1176_v9 = vpop.permute.xlu2 %1175 }
 0xbe6   :  { %v1178_v44 = vmul.f32 %v1176_v9, %v3800_v51 }
 0xbea   :  { %1371 = vrot.lane.b32.xlu1 %v1092_v30, %s3422_s28  ;;  %1367 = vrot.lane.b32.xlu0 %v1029_v8, %s3430_s2 }
 0xbf2   :  { %1434 = vrot.lane.b32.xlu0 %v1178_v44, %s3422_s28 }
 0xc35   :  { %v1309_v52 = vpop.permute.xlu2 %1308 }
 0xc54   :  { %v3030_v29 = vpop.permute.xlu1 %3029  ;;  %v3025_v24 = vpop.permute.xlu0 %3024 }
 0xc55   :  { %v3032_v50 = vunpack.i.h.bf16 %v3030_v29  ;;  %v3031_v49 = vunpack.i.l.bf16 %v3030_v29  ;;  %v3027_v47 = vunpack.i.h.bf16 %v3025_v24  ;;  %v3026_v56 = vunpack.i.l.bf16 %v3025_v24 }
 0xc57   :  { %v1311_v33 = vsel %vm124_vm0, %v3032_v50, %v1309_v52  ;;  %v1248_v48 = vsel %vm124_vm0, %v3031_v49, %v3027_v47  ;;  %v1185_v58 = vsel %vm124_vm0, %v1180_v26, %v3026_v56 }
 0xc58   :  { %v1312_v59 = vpack.c.bf16 %v1311_v33, %v1311_v33  ;;  %v1249_v21 = vpack.c.bf16 %v1248_v48, %v1248_v48  ;;  %v1186_v34 = vpack.c.bf16 %v1185_v58, %v1185_v58 }
 0xc5a   :  { %2907 = vmatmul.msk.bf16.vlgmr.msrb.gmra.mxu3 %vm154_vm1, %v1186_v34  ;;  %2910 = vmatmul.msk.bf16.vlgmr.msra.gmra.mxu0 %vm154_vm1, %v1249_v21 }
 0xc5b   :  { %2913 = vmatmul.msk.bf16.vlgmr.msra.gmra.mxu1 %vm154_vm1, %v1312_v59  ;;  %1697 = vmatpush.bf16.msrb.mxu3 %v3622_v37  ;;  %v1431_v37 = vpop.permute.xlu2 %1430 }
 0xc5c   :  { %v1372_v51 = vpop.permute.xlu1 %1371  ;;  %v1368_v17 = vpop.permute.xlu0 %1367  ;;  %1760 = vmatpush.bf16.msra.mxu0 %v3720_v13  ;;  %1822 = vmatpush.bf16.msra.mxu1 %v3746_v31 }
 0xc5d   :  { %v1374_v35 = vsel %vm124_vm0, %v1368_v17, %v1372_v51 }
 0xc5e   :  { %v1375_v38 = vpack.c.bf16 %v1374_v35, %v1374_v35 }
 0xc5f   :  { %1698 = vmatpush.bf16.msrb.mxu3 %v3625_v40  ;;  %v3878_v40 = vld [vmem:[#allocation5 + $0x30] sm:$0xff] }
 0xc60   :  { %2916 = vmatmul.msk.bf16.vlgmr.msra.gmra.mxu2 %vm154_vm1, %v1375_v38  ;;  %1761 = vmatpush.bf16.msra.mxu0 %v3723_v14 }
 0xc61   :  { %1823 = vmatpush.bf16.msra.mxu1 %v3752_v41  ;;  %1885 = vmatpush.bf16.msra.mxu2 %v3871_v63 }
 0xc63   :  { %1699 = vmatpush.bf16.msrb.mxu3 %v3628_v42  ;;  %v3884_v42 = vld [vmem:[#allocation5 + $0x28] sm:$0xff] }
 0xc64   :  { %v1435_v0 = vpop.permute.xlu0 %1434  ;;  %1762 = vmatpush.bf16.msra.mxu0 %v3726_v15  ;;  %v3888_v15 = vld [vmem:[#allocation5 + $0x58] sm:$0xff] }
 0xc65   :  { %v1437_v31 = vsel %vm124_vm0, %v1431_v37, %v1435_v0  ;;  %1824 = vmatpush.bf16.msra.mxu1 %v3758_v53  ;;  %1886 = vmatpush.bf16.msra.mxu2 %v3878_v40  ;;  %v3891_v53 = vld [vmem:[#allocation5 + $0x20] sm:$0xff] }
 0xc66   :  { %v1438_v41 = vpack.c.bf16 %v1437_v31, %v1437_v31 }
 0xc67   :  { %1700 = vmatpush.bf16.msrb.mxu3 %v3631_v43  ;;  %v3894_v43 = vld [vmem:[#allocation5 + $0x50] sm:$0xff] }
 0xc68   :  { %1763 = vmatpush.bf16.msra.mxu0 %v3729_v16  ;;  %v3897_v16 = vld [vmem:[#allocation5 + $0x48] sm:$0xff] }
 0xc69   :  { %1825 = vmatpush.bf16.msra.mxu1 %v3764_v45  ;;  %1887 = vmatpush.bf16.msra.mxu2 %v3884_v42  ;;  %v3900_v45 = vld [vmem:[#allocation5 + $0x40] sm:$0xff] }
 0xc6a   :  { %2919 = vmatmul.msk.bf16.vlgmr.msra.gmra.mxu3 %vm154_vm1, %v1438_v41 }
 0xc6b   :  { %1948 = vmatpush.bf16.msra.mxu3 %v3888_v15 }
 0xc6d   :  { %1888 = vmatpush.bf16.msra.mxu2 %v3891_v53 }
 0xc6f   :  { %1949 = vmatpush.bf16.msra.mxu3 %v3894_v43 }
 0xc73   :  { %1950 = vmatpush.bf16.msra.mxu3 %v3897_v16 }
 0xc77   :  { %1951 = vmatpush.bf16.msra.mxu3 %v3900_v45 }
 0xcd7   :  { %v1262_v6 = vpop.f32.mrf.mxu0 }
 0xcd8   :  { %v1263_v3 = vadd.f32 %v3903_v7, %v1262_v6  ;;  %v1325_v5 = vpop.f32.mrf.mxu1 }
 0xcd9   :  { %v1326_v25 = vadd.f32 %v3906_v54, %v1325_v5 }
 0xcda   :  { %v2911_v11 = vmul.f32 -1.442695, %v1263_v3 }
 0xcdb   :  { %v2914_v57 = vmul.f32 -1.442695, %v1326_v25 }
 0xcdc   :  { %3165 = vpow2.f32 %v2911_v11 }
 0xcdd   :  { %3167 = vpow2.f32 %v2914_v57  ;;  %v1199_v12 = vpop.f32.mrf.mxu3 }
 0xcde   :  { %v1200_v62 = vadd.f32 %v3770_v55, %v1199_v12 }
 0xcdf   :  { %v1264_v19 = vpop.f32.mrf.mxu0 }
 0xce0   :  { %v2908_v20 = vmul.f32 -1.442695, %v1200_v62  ;;  %v1327_v23 = vpop.f32.mrf.mxu1 }
 0xce2   :  { %v3166_v46 = vpop.eup %3165  ;;  %3169 = vpow2.f32 %v2908_v20 }
 0xce3   :  { %v3168_v4 = vpop.eup %3167  ;;  %v1269_v8 = vadd.f32 1.0, %v3166_v46  ;;  %v1388_v27 = vpop.f32.mrf.mxu2 }
 0xce4   :  { %v1332_v39 = vadd.f32 1.0, %v3168_v4  ;;  %v1389_v28 = vadd.f32 %v3658_v1, %v1388_v27 }
 0xce5   :  { %3171 = vrcp.f32 %v1269_v8  ;;  %v1201_v32 = vpop.f32.mrf.mxu3  ;;  %v1279_v33 = vand.u32 2147483647, %v1269_v8  ;;  %v1281_v59 = vand.u32 2147483648, %v1269_v8  ;;  %vm1275_vm8 = vweird.f32 %v1269_v8 }
 0xce6   :  { %3173 = vrcp.f32 %v1332_v39  ;;  %v2917_v36 = vmul.f32 -1.442695, %v1389_v28  ;;  %v1342_v58 = vand.u32 2147483647, %v1332_v39  ;;  %v1344_v34 = vand.u32 2147483648, %v1332_v39 }
 0xce7   :  { %vm1338_vm9 = vweird.f32 %v1332_v39  ;;  %vm1280_vm11 = vcmp.eq.f32.partialorder %v1279_v33, 8.507059e+37  ;;  %v1282_v31 = vor.u32 1.1754944e-38, %v1281_v59 }
 0xce8   :  { %v3170_v30 = vpop.eup %3169  ;;  %3175 = vpow2.f32 %v2917_v36  ;;  %vm1343_vm13 = vcmp.eq.f32.partialorder %v1342_v58, 8.507059e+37  ;;  %v1345_v6 = vor.u32 1.1754944e-38, %v1344_v34 }
 0xce9   :  { %v1206_v9 = vadd.f32 1.0, %v3170_v30 }
 0xceb   :  { %v3172_v44 = vpop.eup %3171  ;;  %3177 = vrcp.f32 %v1206_v9  ;;  %v1390_v29 = vpop.f32.mrf.mxu2  ;;  %v1216_v57 = vand.u32 2147483647, %v1206_v9  ;;  %v1218_v12 = vand.u32 2147483648, %v1206_v9  ;;  %vm1212_vm15 = vweird.f32 %v1206_v9 }
 0xcec   :  { %v3174_v26 = vpop.eup %3173  ;;  %v1271_v24 = vmul.f32 %v3172_v44, %v1269_v8  ;;  %vm1276_vm6 = vweird.f32 %v3172_v44 }
 0xced   :  { %v1334_v50 = vmul.f32 %v3174_v26, %v1332_v39  ;;  %v1451_v49 = vpop.f32.mrf.mxu3  ;;  %vm1339_vm7 = vweird.f32 %v3174_v26  ;;  %vm1277_vm10 = vmor %vm1275_vm8, %vm1276_vm6  ;;  %v1219_v36 = vor.u32 1.1754944e-38, %v1218_v12  ;;  %vm1217_vm3 = vcmp.eq.f32.partialorder %v1216_v57, 8.507059e+37 }
 0xcee   :  { %v3176_v47 = vpop.eup %3175  ;;  %v1272_v56 = vsub.f32 1.0, %v1271_v24  ;;  %v1452_v52 = vadd.f32 %v3773_v61, %v1451_v49  ;;  %vm1340_vm12 = vmor %vm1338_vm9, %vm1339_vm7 }
 0xcef   :  { %v1335_v1 = vsub.f32 1.0, %v1334_v50  ;;  %v3912_v48 = vadd.f32 1.0, %v3176_v47 }
 0xcf0   :  { %v2920_v21 = vmul.f32 -1.442695, %v1452_v52  ;;  %v1273_v51 = vmul.f32 %v3172_v44, %v1272_v56 }
 0xcf1   :  { %v3178_v17 = vpop.eup %3177  ;;  %3179 = vrcp.f32 %v3912_v48  ;;  %v1336_v35 = vmul.f32 %v3174_v26, %v1335_v1  ;;  %vm1401_vm5 = vweird.f32 %v3912_v48 }
 0xcf2   :  { %v1208_v38 = vmul.f32 %v3178_v17, %v1206_v9  ;;  %3181 = vpow2.f32 %v2920_v21  ;;  %v1274_v37 = vadd.f32 %v3172_v44, %v1273_v51  ;;  %vm1213_vm14 = vweird.f32 %v3178_v17 }
 0xcf3   :  { %v1337_v0 = vadd.f32 %v3174_v26, %v1336_v35  ;;  %vm1214_vm2 = vmor %vm1212_vm15, %vm1213_vm14  ;;  %v1405_v9 = vand.u32 2147483647, %v3912_v48 }
 0xcf4   :  { %v1209_v41 = vsub.f32 1.0, %v1208_v38  ;;  %v1278_v3 = vsel %vm1277_vm10, %v3172_v44, %v1274_v37 }
 0xcf5   :  { %v1453_v5 = vpop.f32.mrf.mxu3  ;;  %v1341_v25 = vsel %vm1340_vm12, %v3174_v26, %v1337_v0  ;;  %v3915_v11 = vsel %vm1280_vm11, %v1282_v31, %v1278_v3  ;;  %v1407_v26 = vand.u32 2147483648, %v3912_v48  ;;  %vm1406_vm7 = vcmp.eq.f32.partialorder %v1405_v9, 8.507059e+37 }
 0xcf6   :  { %v3917_v62 = vsel %vm1343_vm13, %v1345_v6, %v1341_v25  ;;  %v1285_v19 = vmul.f32 2.0, %v3915_v11  ;;  %v1210_v20 = vmul.f32 %v3178_v17, %v1209_v41 }
 0xcf7   :  { %v3180_v23 = vpop.eup %3179  ;;  %v1348_v46 = vmul.f32 2.0, %v3917_v62  ;;  %v1408_v56 = vor.u32 1.1754944e-38, %v1407_v26 }
 0xcf8   :  { %v3182_v4 = vpop.eup %3181  ;;  %v1397_v8 = vmul.f32 %v3180_v23, %v3912_v48  ;;  %v2912_v27 = vadd.f32 -1.0, %v1285_v19  ;;  %v1211_v39 = vadd.f32 %v3178_v17, %v1210_v20  ;;  %vm1402_vm4 = vweird.f32 %v3180_v23 }
 0xcf9   :  { %v1458_v28 = vadd.f32 1.0, %v3182_v4  ;;  %v2915_v32 = vadd.f32 -1.0, %v1348_v46  ;;  %vm1403_vm6 = vmor %vm1401_vm5, %vm1402_vm4  ;;  %v1350_v4 = vmul.f32 %v3917_v62, %v3824_v10 }
 0xcfa   :  { %v1398_v30 = vsub.f32 1.0, %v1397_v8  ;;  %1289 = vrot.lane.b32.xlu1 %v2912_v27, %s3422_s28  ;;  %v1215_v44 = vsel %vm1214_vm2, %v3178_v17, %v1211_v39 }
 0xcfb   :  { %3183 = vrcp.f32 %v1458_v28  ;;  %1352 = vrot.lane.b32.xlu2 %v2915_v32, %s3422_s28  ;;  %v3924_v29 = vsel %vm1217_vm3, %v1219_v36, %v1215_v44  ;;  %v1470_v51 = vand.u32 2147483648, %v1458_v28  ;;  %v1468_v48 = vand.u32 2147483647, %v1458_v28 }
 0xcfc   :  { %v1222_v24 = vmul.f32 2.0, %v3924_v29  ;;  %v1399_v50 = vmul.f32 %v3180_v23, %v1398_v30  ;;  %vm1464_vm9 = vweird.f32 %v1458_v28  ;;  %v1224_v39 = vmul.f32 %v3924_v29, %v3818_v2 }
 0xcfd   :  { %v1471_v38 = vor.u32 1.1754944e-38, %v1470_v51  ;;  %vm1469_vm11 = vcmp.eq.f32.partialorder %v1468_v48, 8.507059e+37  ;;  %v1287_v2 = vmul.f32 %v3915_v11, %v3836_v18 }
 0xcfe   :  { %v2909_v49 = vadd.f32 -1.0, %v1222_v24  ;;  %v1400_v47 = vadd.f32 %v3180_v23, %v1399_v50 }
 0xd00   :  { %1226 = vrot.lane.b32.xlu0 %v2909_v49, %s3422_s28  ;;  %v1404_v52 = vsel %vm1403_vm6, %v3180_v23, %v1400_v47 }
 0xd01   :  { %v3184_v33 = vpop.eup %3183  ;;  %v3931_v1 = vsel %vm1406_vm7, %v1408_v56, %v1404_v52 }
 0xd02   :  { %v1460_v58 = vmul.f32 %v3184_v33, %v1458_v28  ;;  %v1411_v59 = vmul.f32 2.0, %v3931_v1  ;;  %vm1465_vm8 = vweird.f32 %v3184_v33 }
 0xd03   :  { %vm1466_vm10 = vmor %vm1464_vm9, %vm1465_vm8 }
 0xd04   :  { %v1461_v21 = vsub.f32 1.0, %v1460_v58  ;;  %v2918_v34 = vadd.f32 -1.0, %v1411_v59 }
 0xd06   :  { %1415 = vrot.lane.b32.xlu1 %v2918_v34, %s3422_s28  ;;  %v1462_v17 = vmul.f32 %v3184_v33, %v1461_v21 }
 0xd08   :  { %v1463_v35 = vadd.f32 %v3184_v33, %v1462_v17 }
 0xd0a   :  { %v1467_v37 = vsel %vm1466_vm10, %v3184_v33, %v1463_v35 }
 0xd0b   :  { %v3935_v0 = vsel %vm1469_vm11, %v1471_v38, %v1467_v37 }
 0xd0c   :  { %v1474_v31 = vmul.f32 2.0, %v3935_v0  ;;  %v1476_v10 = vmul.f32 %v3935_v0, %v3840_v22  ;;  %v1413_v22 = vmul.f32 %v3931_v1, %v3829_v60 }
 0xd0e   :  { %v2921_v41 = vadd.f32 -1.0, %v1474_v31  ;;  %v3997_v31 = vld [vmem:[#allocation5 + $0x70] sm:$0xff] }
 0xd10   :  { %1478 = vrot.lane.b32.xlu2 %v2921_v41, %s3422_s28 }
 0xd55   :  { %v1353_v6 = vpop.permute.xlu2 %1352 }
 0xd56   :  { %v1355_v3 = vmul.f32 %v1353_v6, %v3917_v62 }
 0xd58   :  { %1357 = vrot.lane.b32.xlu1 %v1355_v3, %s3430_s2 }
 0xd6a   :  { %v1479_v5 = vpop.permute.xlu2 %1478 }
 0xd6b   :  { %v1481_v25 = vmul.f32 %v1479_v5, %v3935_v0 }
 0xd6c   :  { %v1290_v57 = vpop.permute.xlu1 %1289 }
 0xd6d   :  { %v1292_v12 = vmul.f32 %v1290_v57, %v3915_v11  ;;  %1483 = vrot.lane.b32.xlu1 %v1481_v25, %s3430_s2  ;;  %v4004_v25 = vld [vmem:[#allocation5 + $0x60] sm:$0xff] }
 0xd6f   :  { %1294 = vrot.lane.b32.xlu0 %v1292_v12, %s3430_s2 }
 0xd72   :  { %v1227_v19 = vpop.permute.xlu0 %1226 }
 0xd73   :  { %v1229_v20 = vmul.f32 %v1227_v19, %v3924_v29 }
 0xd75   :  { %1231 = vrot.lane.b32.xlu2 %v1229_v20, %s3430_s2 }
 0xd78   :  { %v1416_v23 = vpop.permute.xlu1 %1415 }
 0xd79   :  { %v1418_v46 = vmul.f32 %v1416_v23, %v3931_v1 }
 0xd7b   :  { %1420 = vrot.lane.b32.xlu0 %v1418_v46, %s3430_s2 }
 0xdca   :  { %v1358_v8 = vpop.permute.xlu1 %1357 }
 0xdcb   :  { %v3951_v27 = vadd.f32 %v1358_v8, %v1350_v4 }
 0xdcd   :  { %3185 = vtanh.f32 %v3951_v27 }
 0xdcf   :  { %v1232_v28 = vpop.permute.xlu2 %1231 }
 0xdd0   :  { %v3956_v32 = vadd.f32 %v1232_v28, %v1224_v39 }
 0xdd2   :  { %3187 = vtanh.f32 %v3956_v32 }
 0xdd3   :  { %v3186_v36 = vpop.eup %3185 }
 0xdd4   :  { %1363 = vrot.lane.b32.xlu0 %v3186_v36, %s3422_s28 }
 0xdd8   :  { %v3188_v30 = vpop.eup %3187 }
 0xdd9   :  { %1237 = vrot.lane.b32.xlu1 %v3188_v30, %s3422_s28 }
 0xddf   :  { %v1484_v44 = vpop.permute.xlu1 %1483 }
 0xde0   :  { %v3963_v26 = vadd.f32 %v1484_v44, %v1476_v10 }
 0xde1   :  { %v1295_v24 = vpop.permute.xlu0 %1294 }
 0xde2   :  { %3189 = vtanh.f32 %v3963_v26  ;;  %v3968_v50 = vadd.f32 %v1295_v24, %v1287_v2 }
 0xde4   :  { %3191 = vtanh.f32 %v3968_v50 }
 0xde8   :  { %v3190_v9 = vpop.eup %3189 }
 0xde9   :  { %1489 = vrot.lane.b32.xlu0 %v3190_v9, %s3422_s28 }
 0xdea   :  { %v3192_v49 = vpop.eup %3191 }
 0xdeb   :  { %1300 = vrot.lane.b32.xlu2 %v3192_v49, %s3422_s28 }
 0xded   :  { %v1421_v47 = vpop.permute.xlu0 %1420 }
 0xdee   :  { %v3975_v56 = vadd.f32 %v1421_v47, %v1413_v22 }
 0xdf0   :  { %3193 = vtanh.f32 %v3975_v56 }
 0xdf6   :  { %v3194_v18 = vpop.eup %3193 }
 0xdf7   :  { %1426 = vrot.lane.b32.xlu2 %v3194_v18, %s3422_s28 }
 0xe45   :  { %v1301_v52 = vpop.permute.xlu2 %1300 }
 0xe46   :  { %v1303_v33 = vmul.f32 %v1301_v52, %v3915_v11  ;;  %v1364_v58 = vpop.permute.xlu0 %1363 }
 0xe47   :  { %v1366_v21 = vmul.f32 %v1364_v58, %v3917_v62 }
 0xe48   :  { %1618 = vrot.lane.b32.xlu1 %v1303_v33, %s3430_s2 }
 0xe4b   :  { %v1238_v59 = vpop.permute.xlu1 %1237 }
 0xe4c   :  { %v1240_v34 = vmul.f32 %v1238_v59, %v3924_v29  ;;  %v1494_v29 = vld [vmem:[#allocation3 + $0x30] sm:$0xff] }
 0xe4e   :  { %1555 = vrot.lane.b32.xlu0 %v1240_v34, %s3430_s2  ;;  %v3033_v60 = vpack.i.bf16 %v1240_v34, %v1366_v21 }
 0xe50   :  { %1559 = vrot.lane.b32.xlu1 %v1303_v33, %s3422_s28  ;;  %3034 = vrot.lane.b32.xlu2 %v3033_v60, %s3422_s28 }
 0xe51   :  { %v1427_v51 = vpop.permute.xlu2 %1426 }
 0xe52   :  { %v1429_v17 = vmul.f32 %v1427_v51, %v3931_v1  ;;  %v3994_v1 = vld [vmem:[#allocation5 + $0x78] sm:$0xff] }
 0xe56   :  { %1685 = vrot.lane.b32.xlu0 %v1429_v17, %s3422_s28 }
 0xe58   :  { %1744 = vrot.lane.b32.xlu1 %v1429_v17, %s3430_s2  ;;  %1681 = vrot.lane.b32.xlu2 %v1366_v21, %s3430_s2 }
 0xe5b   :  { %v1490_v11 = vpop.permute.xlu0 %1489 }
 0xe5c   :  { %v1492_v62 = vmul.f32 %v1490_v11, %v3935_v0  ;;  %v4000_v0 = vld [vmem:[#allocation5 + $0x68] sm:$0xff] }
 0xe60   :  { %1748 = vrot.lane.b32.xlu2 %v1492_v62, %s3422_s28 }
 0xeaa   :  { %v3035_v48 = vpop.permute.xlu2 %3034 }
 0xeab   :  { %v3037_v35 = vunpack.i.h.bf16 %v3035_v48  ;;  %v3036_v41 = vunpack.i.l.bf16 %v3035_v48 }
 0xead   :  { %v1499_v38 = vsel %vm124_vm0, %v1494_v29, %v3037_v35 }
 0xeae   :  { %v1500_v37 = vpack.c.bf16 %v1499_v38, %v1499_v38 }
 0xeb0   :  { %2922 = vmatmul.msk.bf16.vlgmr.msrb.gmra.mxu0 %vm154_vm1, %v1500_v37 }
 0xeb1   :  { %2011 = vmatpush.bf16.msrb.mxu0 %v3994_v1 }
 0xeb2   :  { %v1682_v57 = vpop.permute.xlu2 %1681 }
 0xeb5   :  { %2012 = vmatpush.bf16.msrb.mxu0 %v3997_v31 }
 0xeb9   :  { %2013 = vmatpush.bf16.msrb.mxu0 %v4000_v0 }
 0xeba   :  { %v1619_v6 = vpop.permute.xlu1 %1618  ;;  %v1749_v8 = vpop.permute.xlu2 %1748 }
 0xebb   :  { %v1625_v3 = vsel %vm124_vm0, %v1619_v6, %v3036_v41 }
 0xebc   :  { %v1626_v5 = vpack.c.bf16 %v1625_v3, %v1625_v3 }
 0xebd   :  { %2014 = vmatpush.bf16.msrb.mxu0 %v4004_v25 }
 0xebe   :  { %2928 = vmatmul.msk.bf16.vlgmr.msrb.gmra.mxu2 %vm154_vm1, %v1626_v5 }
 0xebf   :  { %2138 = vmatpush.bf16.msrb.mxu2 %v3871_v63 }
 0xec0   :  { %v1556_v12 = vpop.permute.xlu0 %1555 }
 0xec2   :  { %v1560_v19 = vpop.permute.xlu1 %1559 }
 0xec3   :  { %v1562_v20 = vsel %vm124_vm0, %v1556_v12, %v1560_v19  ;;  %2139 = vmatpush.bf16.msrb.mxu2 %v3878_v40 }
 0xec4   :  { %v1563_v23 = vpack.c.bf16 %v1562_v20, %v1562_v20 }
 0xec6   :  { %2925 = vmatmul.msk.bf16.vlgmr.msrb.gmra.mxu1 %vm154_vm1, %v1563_v23 }
 0xec7   :  { %2074 = vmatpush.bf16.msrb.mxu1 %v3720_v13  ;;  %2140 = vmatpush.bf16.msrb.mxu2 %v3884_v42  ;;  %v4021_v13 = vld [vmem:[#allocation5 + $0x88] sm:$0xff]  ;;  %v4026_v42 = vld [vmem:[#allocation5 + $0x80] sm:$0xff] }
 0xec8   :  { %v1686_v46 = vpop.permute.xlu0 %1685 }
 0xec9   :  { %v1688_v4 = vsel %vm124_vm0, %v1682_v57, %v1686_v46  ;;  %v4041_v57 = vld [vmem:[#allocation7 + $0x3] ss:$0 sm:$0xff] }
 0xeca   :  { %v1689_v39 = vpack.c.bf16 %v1688_v4, %v1688_v4  ;;  %v1745_v63 = vpop.permute.xlu1 %1744 }
 0xecb   :  { %v1751_v28 = vsel %vm124_vm0, %v1745_v63, %v1749_v8  ;;  %2075 = vmatpush.bf16.msrb.mxu1 %v3723_v14  ;;  %2141 = vmatpush.bf16.msrb.mxu2 %v3891_v53 }
 0xecc   :  { %v1752_v40 = vpack.c.bf16 %v1751_v28, %v1751_v28  ;;  %2931 = vmatmul.msk.bf16.vlgmr.msrb.gmra.mxu3 %vm154_vm1, %v1689_v39 }
 0xecd   :  { %2201 = vmatpush.bf16.msrb.mxu3 %v3888_v15 }
 0xece   :  { %2934 = vmatmul.msk.bf16.vlgmr.msra.gmra.mxu0 %vm154_vm1, %v1752_v40 }
 0xecf   :  { %2076 = vmatpush.bf16.msrb.mxu1 %v4021_v13  ;;  %2264 = vmatpush.bf16.msra.mxu0 %v3994_v1 }
 0xed1   :  { %2202 = vmatpush.bf16.msrb.mxu3 %v3894_v43 }
 0xed3   :  { %2077 = vmatpush.bf16.msrb.mxu1 %v4026_v42  ;;  %2265 = vmatpush.bf16.msra.mxu0 %v3997_v31 }
 0xed5   :  { %2203 = vmatpush.bf16.msrb.mxu3 %v3897_v16 }
 0xed7   :  { %2266 = vmatpush.bf16.msra.mxu0 %v4000_v0 }
 0xed9   :  { %2204 = vmatpush.bf16.msrb.mxu3 %v3900_v45 }
 0xedb   :  { %2267 = vmatpush.bf16.msra.mxu0 %v4004_v25 }
 0xf2d   :  { %v1513_v14 = vpop.f32.mrf.mxu0 }
 0xf2e   :  { %v1514_v53 = vadd.f32 %v3770_v55, %v1513_v14 }
 0xf30   :  { %v2923_v36 = vmul.f32 -1.442695, %v1514_v53 }
 0xf32   :  { %3195 = vpow2.f32 %v2923_v36 }
 0xf35   :  { %v1515_v30 = vpop.f32.mrf.mxu0 }
 0xf38   :  { %v3196_v10 = vpop.eup %3195 }
 0xf39   :  { %v1520_v44 = vadd.f32 1.0, %v3196_v10 }
 0xf3b   :  { %3197 = vrcp.f32 %v1520_v44  ;;  %v1530_v33 = vand.u32 2147483647, %v1520_v44  ;;  %v1532_v58 = vand.u32 2147483648, %v1520_v44  ;;  %vm1526_vm13 = vweird.f32 %v1520_v44 }
 0xf3d   :  { %v1533_v60 = vor.u32 1.1754944e-38, %v1532_v58  ;;  %vm1531_vm15 = vcmp.eq.f32.partialorder %v1530_v33, 8.507059e+37 }
 0xf41   :  { %v3198_v2 = vpop.eup %3197  ;;  %v1639_v24 = vpop.f32.mrf.mxu2 }
 0xf42   :  { %v1522_v9 = vmul.f32 %v3198_v2, %v1520_v44  ;;  %v1640_v49 = vadd.f32 %v3906_v54, %v1639_v24  ;;  %vm1527_vm12 = vweird.f32 %v3198_v2 }
 0xf43   :  { %v1576_v22 = vpop.f32.mrf.mxu1  ;;  %vm1528_vm14 = vmor %vm1526_vm13, %vm1527_vm12 }
 0xf44   :  { %v1523_v47 = vsub.f32 1.0, %v1522_v9  ;;  %v2929_v18 = vmul.f32 -1.442695, %v1640_v49  ;;  %v1577_v52 = vadd.f32 %v3903_v7, %v1576_v22 }
 0xf46   :  { %3199 = vpow2.f32 %v2929_v18  ;;  %v2926_v55 = vmul.f32 -1.442695, %v1577_v52  ;;  %v1524_v59 = vmul.f32 %v3198_v2, %v1523_v47 }
 0xf48   :  { %3201 = vpow2.f32 %v2926_v55  ;;  %v1525_v21 = vadd.f32 %v3198_v2, %v1524_v59 }
 0xf49   :  { %v1641_v34 = vpop.f32.mrf.mxu2 }
 0xf4a   :  { %v1529_v51 = vsel %vm1528_vm14, %v3198_v2, %v1525_v21 }
 0xf4b   :  { %v1578_v17 = vpop.f32.mrf.mxu1  ;;  %v1765_v11 = vpop.f32.mrf.mxu0  ;;  %v4037_v62 = vsel %vm1531_vm15, %v1533_v60, %v1529_v51 }
 0xf4c   :  { %v3200_v29 = vpop.eup %3199  ;;  %v1766_v48 = vadd.f32 %v3773_v61, %v1765_v11  ;;  %v1536_v35 = vmul.f32 2.0, %v4037_v62 }
 0xf4d   :  { %v1646_v38 = vadd.f32 1.0, %v3200_v29 }
 0xf4e   :  { %v3202_v37 = vpop.eup %3201  ;;  %v2935_v41 = vmul.f32 -1.442695, %v1766_v48  ;;  %v2924_v6 = vadd.f32 -1.0, %v1536_v35 }
 0xf4f   :  { %3203 = vrcp.f32 %v1646_v38  ;;  %v1583_v3 = vadd.f32 1.0, %v3202_v37  ;;  %v1702_v5 = vpop.f32.mrf.mxu3  ;;  %v1658_v40 = vand.u32 2147483648, %v1646_v38  ;;  %v1656_v30 = vand.u32 2147483647, %v1646_v38 }
 0xf50   :  { %3205 = vpow2.f32 %v2935_v41  ;;  %v1703_v12 = vadd.f32 %v4041_v57, %v1702_v5  ;;  %1540 = vrot.lane.b32.xlu0 %v2924_v6, %s3422_s28  ;;  %vm1652_vm3 = vweird.f32 %v1646_v38 }
 0xf51   :  { %3207 = vrcp.f32 %v1583_v3  ;;  %v1595_v44 = vand.u32 2147483648, %v1583_v3  ;;  %v1593_v9 = vand.u32 2147483647, %v1583_v3  ;;  %v1659_v49 = vor.u32 1.1754944e-38, %v1658_v40 }
 0xf52   :  { %v2932_v19 = vmul.f32 -1.442695, %v1703_v12  ;;  %vm1657_vm6 = vcmp.eq.f32.partialorder %v1656_v30, 8.507059e+37  ;;  %vm1589_vm7 = vweird.f32 %v1583_v3 }
 0xf53   :  { %v1767_v20 = vpop.f32.mrf.mxu0  ;;  %v1596_v33 = vor.u32 1.1754944e-38, %v1595_v44  ;;  %vm1594_vm9 = vcmp.eq.f32.partialorder %v1593_v9, 8.507059e+37 }
 0xf54   :  { %3209 = vpow2.f32 %v2932_v19 }
 0xf55   :  { %v3204_v61 = vpop.eup %3203 }
 0xf56   :  { %v3206_v23 = vpop.eup %3205  ;;  %v1648_v46 = vmul.f32 %v3204_v61, %v1646_v38  ;;  %vm1653_vm2 = vweird.f32 %v3204_v61 }
 0xf57   :  { %v3208_v4 = vpop.eup %3207  ;;  %v1772_v8 = vadd.f32 1.0, %v3206_v23  ;;  %v1704_v39 = vpop.f32.mrf.mxu3  ;;  %vm1654_vm5 = vmor %vm1652_vm3, %vm1653_vm2 }
 0xf58   :  { %v1649_v63 = vsub.f32 1.0, %v1648_v46  ;;  %v1585_v28 = vmul.f32 %v3208_v4, %v1583_v3  ;;  %vm1590_vm4 = vweird.f32 %v3208_v4 }
 0xf59   :  { %3211 = vrcp.f32 %v1772_v8  ;;  %vm1591_vm8 = vmor %vm1589_vm7, %vm1590_vm4  ;;  %v1782_v11 = vand.u32 2147483647, %v1772_v8  ;;  %v1784_v29 = vand.u32 2147483648, %v1772_v8  ;;  %vm1778_vm11 = vweird.f32 %v1772_v8 }
 0xf5a   :  { %v3210_v14 = vpop.eup %3209  ;;  %v1586_v53 = vsub.f32 1.0, %v1585_v28  ;;  %v1650_v36 = vmul.f32 %v3204_v61, %v1649_v63 }
 0xf5b   :  { %v1709_v10 = vadd.f32 1.0, %v3210_v14  ;;  %vm1783_vm13 = vcmp.eq.f32.partialorder %v1782_v11, 8.507059e+37  ;;  %v1785_v6 = vor.u32 1.1754944e-38, %v1784_v29 }
 0xf5c   :  { %v1651_v2 = vadd.f32 %v3204_v61, %v1650_v36  ;;  %v1587_v24 = vmul.f32 %v3208_v4, %v1586_v53 }
 0xf5d   :  { %3213 = vrcp.f32 %v1709_v10  ;;  %v1721_v3 = vand.u32 2147483648, %v1709_v10  ;;  %v1719_v19 = vand.u32 2147483647, %v1709_v10  ;;  %vm1715_vm15 = vweird.f32 %v1709_v10 }
 0xf5e   :  { %v1655_v22 = vsel %vm1654_vm5, %v3204_v61, %v1651_v2  ;;  %v1588_v47 = vadd.f32 %v3208_v4, %v1587_v24 }
 0xf5f   :  { %v3212_v18 = vpop.eup %3211  ;;  %v4045_v52 = vsel %vm1657_vm6, %v1659_v49, %v1655_v22  ;;  %v1722_v46 = vor.u32 1.1754944e-38, %v1721_v3  ;;  %vm1720_vm3 = vcmp.eq.f32.partialorder %v1719_v19, 8.507059e+37  ;;  %v1538_v49 = vmul.f32 %v4037_v62, %v3956_v32 }
 0xf60   :  { %v1774_v58 = vmul.f32 %v3212_v18, %v1772_v8  ;;  %v1662_v55 = vmul.f32 2.0, %v4045_v52  ;;  %v1592_v59 = vsel %vm1591_vm8, %v3208_v4, %v1588_v47  ;;  %vm1779_vm10 = vweird.f32 %v3212_v18 }
 0xf61   :  { %v4048_v21 = vsel %vm1594_vm9, %v1596_v33, %v1592_v59  ;;  %vm1780_vm12 = vmor %vm1778_vm11, %vm1779_vm10  ;;  %v1664_v33 = vmul.f32 %v4045_v52, %v3951_v27 }
 0xf62   :  { %v1775_v34 = vsub.f32 1.0, %v1774_v58  ;;  %v2930_v60 = vadd.f32 -1.0, %v1662_v55  ;;  %v1599_v51 = vmul.f32 2.0, %v4048_v21  ;;  %v1601_v27 = vmul.f32 %v4048_v21, %v3968_v50 }
 0xf63   :  { %v3214_v17 = vpop.eup %3213 }
 0xf64   :  { %v1711_v48 = vmul.f32 %v3214_v17, %v1709_v10  ;;  %1666 = vrot.lane.b32.xlu2 %v2930_v60, %s3422_s28  ;;  %v2927_v35 = vadd.f32 -1.0, %v1599_v51  ;;  %v1776_v38 = vmul.f32 %v3212_v18, %v1775_v34  ;;  %vm1716_vm14 = vweird.f32 %v3214_v17 }
 0xf65   :  { %vm1717_vm2 = vmor %vm1715_vm15, %vm1716_vm14 }
 0xf66   :  { %v1712_v37 = vsub.f32 1.0, %v1711_v48  ;;  %1603 = vrot.lane.b32.xlu1 %v2927_v35, %s3422_s28  ;;  %v1777_v41 = vadd.f32 %v3212_v18, %v1776_v38 }
 0xf68   :  { %v1781_v5 = vsel %vm1780_vm12, %v3212_v18, %v1777_v41  ;;  %v1713_v12 = vmul.f32 %v3214_v17, %v1712_v37 }
 0xf69   :  { %v4053_v20 = vsel %vm1783_vm13, %v1785_v6, %v1781_v5 }
 0xf6a   :  { %v1788_v61 = vmul.f32 2.0, %v4053_v20  ;;  %v1714_v23 = vadd.f32 %v3214_v17, %v1713_v12  ;;  %v1790_v29 = vmul.f32 %v4053_v20, %v3963_v26 }
 0xf6c   :  { %v2936_v4 = vadd.f32 -1.0, %v1788_v61  ;;  %v1718_v39 = vsel %vm1717_vm2, %v3214_v17, %v1714_v23 }
 0xf6d   :  { %v1723_v8 = vsel %vm1720_vm3, %v1722_v46, %v1718_v39  ;;  %v4109_v39 = vld [vmem:[#allocation5 + $0x98] sm:$0xff] }
 0xf6e   :  { %1792 = vrot.lane.b32.xlu1 %v2936_v4, %s3422_s28  ;;  %v1725_v63 = vmul.f32 2.0, %v1723_v8  ;;  %v1727_v32 = vmul.f32 %v1723_v8, %v3975_v56 }
 0xf70   :  { %v2933_v28 = vadd.f32 -1.0, %v1725_v63 }
 0xf72   :  { %1729 = vrot.lane.b32.xlu0 %v2933_v28, %s3422_s28 }
 0xfbe   :  { %v1667_v40 = vpop.permute.xlu2 %1666 }
 0xfbf   :  { %v1669_v14 = vmul.f32 %v1667_v40, %v4045_v52 }
 0xfc1   :  { %1671 = vrot.lane.b32.xlu1 %v1669_v14, %s3430_s2 }
 0xfc2   :  { %v1541_v53 = vpop.permute.xlu0 %1540 }
 0xfc3   :  { %v1543_v36 = vmul.f32 %v1541_v53, %v4037_v62 }
 0xfc5   :  { %1545 = vrot.lane.b32.xlu2 %v1543_v36, %s3430_s2 }
 0xfd8   :  { %v1604_v30 = vpop.permute.xlu1 %1603 }
 0xfd9   :  { %v1606_v10 = vmul.f32 %v1604_v30, %v4048_v21 }
 0xfdb   :  { %1608 = vrot.lane.b32.xlu0 %v1606_v10, %s3430_s2 }
 0xfe0   :  { %v1793_v44 = vpop.permute.xlu1 %1792 }
 0xfe1   :  { %v1795_v2 = vmul.f32 %v1793_v44, %v4053_v20 }
 0xfe3   :  { %1797 = vrot.lane.b32.xlu0 %v1795_v2, %s3430_s2 }
 0xfe4   :  { %v1730_v24 = vpop.permute.xlu0 %1729 }
 0xfe5   :  { %v1732_v9 = vmul.f32 %v1730_v24, %v1723_v8 }
 0xfe7   :  { %1734 = vrot.lane.b32.xlu2 %v1732_v9, %s3430_s2 }
0x101f   :  { %v1546_v22 = vpop.permute.xlu2 %1545 }
0x1020   :  { %v4069_v47 = vadd.f32 %v1546_v22, %v1538_v49 }
0x1022   :  { %3215 = vtanh.f32 %v4069_v47 }
0x1028   :  { %v3216_v18 = vpop.eup %3215 }
0x1029   :  { %1551 = vrot.lane.b32.xlu1 %v3216_v18, %s3422_s28 }
0x1033   :  { %v1672_v58 = vpop.permute.xlu1 %1671 }
0x1034   :  { %v4075_v55 = vadd.f32 %v1672_v58, %v1664_v33 }
0x1036   :  { %3217 = vtanh.f32 %v4075_v55 }
0x103c   :  { %v3218_v59 = vpop.eup %3217 }
0x103d   :  { %1677 = vrot.lane.b32.xlu0 %v3218_v59, %s3422_s28 }
0x1041   :  { %v1735_v34 = vpop.permute.xlu2 %1734 }
0x1042   :  { %v4080_v60 = vadd.f32 %v1735_v34, %v1727_v32 }
0x1044   :  { %3219 = vtanh.f32 %v4080_v60 }
0x104a   :  { %v3220_v51 = vpop.eup %3219 }
0x104b   :  { %1740 = vrot.lane.b32.xlu1 %v3220_v51, %s3422_s28 }
0x104d   :  { %v1609_v17 = vpop.permute.xlu0 %1608 }
0x104e   :  { %v4086_v11 = vadd.f32 %v1609_v17, %v1601_v27 }
0x1050   :  { %3221 = vtanh.f32 %v4086_v11 }
0x1055   :  { %v1798_v56 = vpop.permute.xlu0 %1797 }
0x1056   :  { %v3222_v48 = vpop.eup %3221  ;;  %v4091_v35 = vadd.f32 %v1798_v56, %v1790_v29 }
0x1057   :  { %1614 = vrot.lane.b32.xlu2 %v3222_v48, %s3422_s28 }
0x1058   :  { %3223 = vtanh.f32 %v4091_v35 }
0x105e   :  { %v3224_v38 = vpop.eup %3223 }
0x105f   :  { %1803 = vrot.lane.b32.xlu2 %v3224_v38, %s3422_s28 }
0x109b   :  { %v1552_v50 = vpop.permute.xlu1 %1551 }
0x109c   :  { %v1554_v37 = vmul.f32 %v1552_v50, %v4037_v62 }
0x109e   :  { %1810 = vrot.lane.b32.xlu2 %v1554_v37, %s3422_s28 }
0x10af   :  { %v1678_v41 = vpop.permute.xlu0 %1677 }
0x10b0   :  { %v1680_v26 = vmul.f32 %v1678_v41, %v4045_v52  ;;  %v1808_v52 = vld [vmem:[#allocation3 + $0x38] sm:$0xff] }
0x10b1   :  { %v1615_v6 = vpop.permute.xlu2 %1614 }
0x10b2   :  { %v1617_v3 = vmul.f32 %v1615_v6, %v4048_v21 }
0x10b4   :  { %v3038_v5 = vpack.i.bf16 %v1617_v3, %v1554_v37  ;;  %v3043_v12 = vpack.i.bf16 %v1680_v26, %v1617_v3 }
0x10b6   :  { %3039 = vrot.lane.b32.xlu0 %v3038_v5, %s3430_s2  ;;  %3044 = vrot.lane.b32.xlu1 %v3043_v12, %s3422_s28 }
0x10b9   :  { %v1804_v62 = vpop.permute.xlu2 %1803 }
0x10ba   :  { %v1806_v23 = vmul.f32 %v1804_v62, %v4053_v20 }
0x10bd   :  { %v1741_v19 = vpop.permute.xlu1 %1740 }
0x10be   :  { %v1743_v61 = vmul.f32 %v1741_v19, %v1723_v8  ;;  %1995 = vrot.lane.b32.xlu0 %v1680_v26, %s3430_s2  ;;  %v4112_v8 = vld [vmem:[#allocation5 + $0x90] sm:$0xff] }
0x10c0   :  { %2058 = vrot.lane.b32.xlu2 %v1743_v61, %s3430_s2  ;;  %1999 = vrot.lane.b32.xlu1 %v1743_v61, %s3422_s28 }
0x10c6   :  { %2062 = vrot.lane.b32.xlu0 %v1806_v23, %s3422_s28 }
0x10f8   :  { %v1811_v21 = vpop.permute.xlu2 %1810 }
0x10f9   :  { %v1813_v46 = vsel %vm124_vm0, %v1808_v52, %v1811_v21  ;;  %v4148_v21 = vld [vmem:[#allocation7 + $0x4] ss:$0 sm:$0xff] }
0x10fa   :  { %v1814_v4 = vpack.c.bf16 %v1813_v46, %v1813_v46 }
0x10fc   :  { %2937 = vmatmul.msk.bf16.vlgmr.msra.gmra.mxu1 %vm154_vm1, %v1814_v4 }
0x10fd   :  { %2327 = vmatpush.bf16.msra.mxu1 %v4109_v39 }
0x1101   :  { %2328 = vmatpush.bf16.msra.mxu1 %v4112_v8 }
0x1105   :  { %2329 = vmatpush.bf16.msra.mxu1 %v4021_v13 }
0x1109   :  { %2330 = vmatpush.bf16.msra.mxu1 %v4026_v42 }
0x111a   :  { %v2059_v22 = vpop.permute.xlu2 %2058 }
0x1128   :  { %v3045_v20 = vpop.permute.xlu1 %3044  ;;  %v3040_v63 = vpop.permute.xlu0 %3039 }
0x1129   :  { %v3047_v28 = vunpack.i.h.bf16 %v3045_v20  ;;  %v3046_v40 = vunpack.i.l.bf16 %v3045_v20  ;;  %v3042_v14 = vunpack.i.h.bf16 %v3040_v63  ;;  %v3041_v53 = vunpack.i.l.bf16 %v3040_v63 }
0x112b   :  { %v1939_v36 = vsel %vm124_vm0, %v3042_v14, %v3047_v28  ;;  %v1876_v30 = vsel %vm124_vm0, %v3041_v53, %v3046_v40 }
0x112c   :  { %v1940_v10 = vpack.c.bf16 %v1939_v36, %v1939_v36  ;;  %v1877_v44 = vpack.c.bf16 %v1876_v30, %v1876_v30 }
0x112e   :  { %2940 = vmatmul.msk.bf16.vlgmr.msra.gmra.mxu2 %vm154_vm1, %v1877_v44  ;;  %2943 = vmatmul.msk.bf16.vlgmr.msra.gmra.mxu3 %vm154_vm1, %v1940_v10 }
0x112f   :  { %2391 = vmatpush.bf16.msra.mxu2 %v3888_v15  ;;  %2454 = vmatpush.bf16.msra.mxu3 %v3994_v1 }
0x1130   :  { %v1996_v2 = vpop.permute.xlu0 %1995 }
0x1132   :  { %v2000_v24 = vpop.permute.xlu1 %1999 }
0x1133   :  { %v2002_v9 = vsel %vm124_vm0, %v1996_v2, %v2000_v24  ;;  %2392 = vmatpush.bf16.msra.mxu2 %v3894_v43  ;;  %2455 = vmatpush.bf16.msra.mxu3 %v3997_v31 }
0x1134   :  { %v2003_v49 = vpack.c.bf16 %v2002_v9, %v2002_v9 }
0x1136   :  { %2946 = vmatmul.msk.bf16.vlgmr.msrb.gmra.mxu0 %vm154_vm1, %v2003_v49 }
0x1137   :  { %2517 = vmatpush.bf16.msrb.mxu0 %v4109_v39  ;;  %2393 = vmatpush.bf16.msra.mxu2 %v3897_v16  ;;  %v3339_v16 = vld [vmem:[#allocation7] ss:$0 sm:$0xff] }
0x1138   :  { %v2063_v18 = vpop.permute.xlu0 %2062  ;;  %2456 = vmatpush.bf16.msra.mxu3 %v4000_v0 }
0x1139   :  { %v2065_v15 = vsel %vm124_vm0, %v2059_v22, %v2063_v18 }
0x113a   :  { %v2066_v33 = vpack.c.bf16 %v2065_v15, %v2065_v15 }
0x113b   :  { %2518 = vmatpush.bf16.msrb.mxu0 %v4112_v8  ;;  %2394 = vmatpush.bf16.msra.mxu2 %v3900_v45 }
0x113c   :  { %2949 = vmatmul.msk.bf16.vlgmr.msrb.gmra.mxu1 %vm154_vm1, %v2066_v33  ;;  %2457 = vmatpush.bf16.msra.mxu3 %v4004_v25 }
0x113d   :  { %2581 = vmatpush.bf16.msrb.mxu1 %v3994_v1 }
0x113f   :  { %2519 = vmatpush.bf16.msrb.mxu0 %v4021_v13 }
0x1141   :  { %2582 = vmatpush.bf16.msrb.mxu1 %v3997_v31 }
0x1143   :  { %2520 = vmatpush.bf16.msrb.mxu0 %v4026_v42 }
0x1145   :  { %2583 = vmatpush.bf16.msrb.mxu1 %v4000_v0 }
0x1149   :  { %2584 = vmatpush.bf16.msrb.mxu1 %v4004_v25 }
0x1179   :  { %v1827_v43 = vpop.f32.mrf.mxu1 }
0x117a   :  { %v1828_v58 = vadd.f32 %v3339_v16, %v1827_v43 }
0x117c   :  { %v2938_v45 = vmul.f32 -1.442695, %v1828_v58 }
0x117e   :  { %3225 = vpow2.f32 %v2938_v45 }
0x1181   :  { %v1829_v59 = vpop.f32.mrf.mxu1 }
0x1184   :  { %v3226_v32 = vpop.eup %3225 }
0x1185   :  { %v1834_v34 = vadd.f32 1.0, %v3226_v32 }
0x1187   :  { %3227 = vrcp.f32 %v1834_v34  ;;  %v1846_v17 = vand.u32 2147483648, %v1834_v34  ;;  %v1844_v29 = vand.u32 2147483647, %v1834_v34  ;;  %vm1840_vm5 = vweird.f32 %v1834_v34 }
0x1189   :  { %v1847_v0 = vor.u32 1.1754944e-38, %v1846_v17  ;;  %vm1845_vm7 = vcmp.eq.f32.partialorder %v1844_v29, 8.507059e+37 }
0x118d   :  { %v3228_v1 = vpop.eup %3227 }
0x118e   :  { %v1836_v51 = vmul.f32 %v3228_v1, %v1834_v34  ;;  %vm1841_vm4 = vweird.f32 %v3228_v1 }
0x118f   :  { %vm1842_vm6 = vmor %vm1840_vm5, %vm1841_vm4 }
0x1190   :  { %v1837_v27 = vsub.f32 1.0, %v1836_v51 }
0x1192   :  { %v1838_v31 = vmul.f32 %v3228_v1, %v1837_v27 }
0x1194   :  { %v1839_v56 = vadd.f32 %v3228_v1, %v1838_v31 }
0x1196   :  { %v1843_v25 = vsel %vm1842_vm6, %v3228_v1, %v1839_v56 }
0x1197   :  { %v4141_v48 = vsel %vm1845_vm7, %v1847_v0, %v1843_v25 }
0x1198   :  { %v1850_v38 = vmul.f32 2.0, %v4141_v48 }
0x119a   :  { %v2939_v50 = vadd.f32 -1.0, %v1850_v38 }
0x119c   :  { %1854 = vrot.lane.b32.xlu0 %v2939_v50, %s3422_s28 }
0x11b1   :  { %v1890_v37 = vpop.f32.mrf.mxu2  ;;  %v1953_v41 = vpop.f32.mrf.mxu3 }
0x11b2   :  { %v1891_v6 = vadd.f32 %v3903_v7, %v1890_v37  ;;  %v1954_v26 = vadd.f32 %v3906_v54, %v1953_v41 }
0x11b3   :  { %v2016_v3 = vpop.f32.mrf.mxu0 }
0x11b4   :  { %v2941_v5 = vmul.f32 -1.442695, %v1891_v6  ;;  %v2944_v12 = vmul.f32 -1.442695, %v1954_v26  ;;  %v2017_v19 = vadd.f32 %v4041_v57, %v2016_v3 }
0x11b6   :  { %3229 = vpow2.f32 %v2941_v5  ;;  %v2947_v61 = vmul.f32 -1.442695, %v2017_v19 }
0x11b7   :  { %3231 = vpow2.f32 %v2944_v12 }
0x11b8   :  { %3233 = vpow2.f32 %v2947_v61 }
0x11b9   :  { %v1892_v62 = vpop.f32.mrf.mxu2  ;;  %v1955_v23 = vpop.f32.mrf.mxu3 }
0x11ba   :  { %v2079_v52 = vpop.f32.mrf.mxu1 }
0x11bb   :  { %v2080_v46 = vadd.f32 %v4148_v21, %v2079_v52  ;;  %v2018_v4 = vpop.f32.mrf.mxu0 }
0x11bc   :  { %v3230_v7 = vpop.eup %3229 }
0x11bd   :  { %v3232_v20 = vpop.eup %3231  ;;  %v1897_v54 = vadd.f32 1.0, %v3230_v7  ;;  %v2950_v40 = vmul.f32 -1.442695, %v2080_v46 }
0x11be   :  { %v3234_v63 = vpop.eup %3233  ;;  %v1960_v28 = vadd.f32 1.0, %v3232_v20 }
0x11bf   :  { %3235 = vrcp.f32 %v1897_v54  ;;  %v2023_v14 = vadd.f32 1.0, %v3234_v63  ;;  %vm1903_vm8 = vweird.f32 %v1897_v54  ;;  %v1907_v22 = vand.u32 2147483647, %v1897_v54 }
0x11c0   :  { %3237 = vrcp.f32 %v1960_v28  ;;  %vm1966_vm9 = vweird.f32 %v1960_v28  ;;  %v1909_v33 = vand.u32 2147483648, %v1897_v54  ;;  %v1972_v16 = vand.u32 2147483648, %v1960_v28 }
0x11c1   :  { %3239 = vrcp.f32 %v2023_v14  ;;  %v1970_v59 = vand.u32 2147483647, %v1960_v28  ;;  %vm1908_vm12 = vcmp.eq.f32.partialorder %v1907_v22, 8.507059e+37  ;;  %vm2029_vm15 = vweird.f32 %v2023_v14 }
0x11c2   :  { %3241 = vpow2.f32 %v2950_v40  ;;  %v2081_v53 = vpop.f32.mrf.mxu1  ;;  %v1910_v51 = vor.u32 1.1754944e-38, %v1909_v33  ;;  %v2035_v27 = vand.u32 2147483648, %v2023_v14  ;;  %v1973_v17 = vor.u32 1.1754944e-38, %v1972_v16 }
0x11c3   :  { %v2033_v56 = vand.u32 2147483647, %v2023_v14  ;;  %vm1971_vm3 = vcmp.eq.f32.partialorder %v1970_v59, 8.507059e+37  ;;  %v1852_v22 = vmul.f32 %v4141_v48, %v4069_v47 }
0x11c4   :  { %v2036_v26 = vor.u32 1.1754944e-38, %v2035_v27 }
0x11c5   :  { %v3236_v36 = vpop.eup %3235  ;;  %vm2034_vm5 = vcmp.eq.f32.partialorder %v2033_v56, 8.507059e+37 }
0x11c6   :  { %v3238_v30 = vpop.eup %3237  ;;  %v1899_v10 = vmul.f32 %v3236_v36, %v1897_v54  ;;  %vm1904_vm10 = vweird.f32 %v3236_v36 }
0x11c7   :  { %v3240_v44 = vpop.eup %3239  ;;  %v1962_v2 = vmul.f32 %v3238_v30, %v1960_v28  ;;  %vm1967_vm11 = vweird.f32 %v3238_v30  ;;  %vm1905_vm14 = vmor %vm1903_vm8, %vm1904_vm10 }
0x11c8   :  { %v3242_v24 = vpop.eup %3241  ;;  %v1900_v9 = vsub.f32 1.0, %v1899_v10  ;;  %v2025_v49 = vmul.f32 %v3240_v44, %v2023_v14  ;;  %vm2030_vm13 = vweird.f32 %v3240_v44  ;;  %vm1968_vm2 = vmor %vm1966_vm9, %vm1967_vm11 }
0x11c9   :  { %v1963_v18 = vsub.f32 1.0, %v1962_v2  ;;  %v2086_v15 = vadd.f32 1.0, %v3242_v24  ;;  %vm2031_vm4 = vmor %vm2029_vm15, %vm2030_vm13 }
0x11ca   :  { %v2026_v43 = vsub.f32 1.0, %v2025_v49  ;;  %v1901_v58 = vmul.f32 %v3236_v36, %v1900_v9 }
0x11cb   :  { %3243 = vrcp.f32 %v2086_v15  ;;  %v1964_v45 = vmul.f32 %v3238_v30, %v1963_v18  ;;  %v2098_v62 = vand.u32 2147483648, %v2086_v15  ;;  %v2096_v52 = vand.u32 2147483647, %v2086_v15 }
0x11cc   :  { %v1902_v32 = vadd.f32 %v3236_v36, %v1901_v58  ;;  %v2027_v34 = vmul.f32 %v3240_v44, %v2026_v43  ;;  %vm2092_vm7 = vweird.f32 %v2086_v15 }
0x11cd   :  { %v1965_v1 = vadd.f32 %v3238_v30, %v1964_v45  ;;  %v2099_v7 = vor.u32 1.1754944e-38, %v2098_v62  ;;  %vm2097_vm9 = vcmp.eq.f32.partialorder %v2096_v52, 8.507059e+37 }
0x11ce   :  { %v1906_v31 = vsel %vm1905_vm14, %v3236_v36, %v1902_v32  ;;  %v2028_v29 = vadd.f32 %v3240_v44, %v2027_v34 }
0x11cf   :  { %v1969_v0 = vsel %vm1968_vm2, %v3238_v30, %v1965_v1  ;;  %v4153_v25 = vsel %vm1908_vm12, %v1910_v51, %v1906_v31 }
0x11d0   :  { %v4155_v38 = vsel %vm1971_vm3, %v1973_v17, %v1969_v0  ;;  %v1913_v50 = vmul.f32 2.0, %v4153_v25  ;;  %v2032_v37 = vsel %vm2031_vm4, %v3240_v44, %v2028_v29 }
0x11d1   :  { %v3244_v41 = vpop.eup %3243  ;;  %v1976_v6 = vmul.f32 2.0, %v4155_v38  ;;  %v4159_v19 = vsel %vm2034_vm5, %v2036_v26, %v2032_v37  ;;  %v1978_v43 = vmul.f32 %v4155_v38, %v4075_v55  ;;  %v1915_v55 = vmul.f32 %v4153_v25, %v4086_v11 }
0x11d2   :  { %v2088_v3 = vmul.f32 %v3244_v41, %v2086_v15  ;;  %v2942_v5 = vadd.f32 -1.0, %v1913_v50  ;;  %vm2093_vm6 = vweird.f32 %v3244_v41  ;;  %v2039_v46 = vmul.f32 2.0, %v4159_v19 }
0x11d3   :  { %v2945_v12 = vadd.f32 -1.0, %v1976_v6  ;;  %vm2094_vm8 = vmor %vm2092_vm7, %vm2093_vm6 }
0x11d4   :  { %v2089_v61 = vsub.f32 1.0, %v2088_v3  ;;  %1917 = vrot.lane.b32.xlu1 %v2942_v5, %s3422_s28  ;;  %v2948_v54 = vadd.f32 -1.0, %v2039_v46 }
0x11d5   :  { %1980 = vrot.lane.b32.xlu2 %v2945_v12, %s3422_s28 }
0x11d6   :  { %v2090_v23 = vmul.f32 %v3244_v41, %v2089_v61 }
0x11d8   :  { %v2091_v4 = vadd.f32 %v3244_v41, %v2090_v23 }
0x11da   :  { %v2095_v20 = vsel %vm2094_vm8, %v3244_v41, %v2091_v4 }
0x11db   :  { %v4164_v63 = vsel %vm2097_vm9, %v2099_v7, %v2095_v20 }
0x11dc   :  { %v2102_v28 = vmul.f32 2.0, %v4164_v63  ;;  %2043 = vrot.lane.b32.xlu1 %v2948_v54, %s3422_s28  ;;  %v2104_v59 = vmul.f32 %v4164_v63, %v4091_v35  ;;  %v2041_v35 = vmul.f32 %v4159_v19, %v4080_v60 }
0x11de   :  { %v2951_v40 = vadd.f32 -1.0, %v2102_v28 }
0x11e0   :  { %2106 = vrot.lane.b32.xlu2 %v2951_v40, %s3422_s28 }
0x120e   :  { %v1855_v14 = vpop.permute.xlu0 %1854 }
0x120f   :  { %v1857_v53 = vmul.f32 %v1855_v14, %v4141_v48 }
0x1211   :  { %1859 = vrot.lane.b32.xlu2 %v1857_v53, %s3430_s2 }
0x122f   :  { %v1981_v36 = vpop.permute.xlu2 %1980 }
0x1230   :  { %v1983_v30 = vmul.f32 %v1981_v36, %v4155_v38 }
0x1232   :  { %1985 = vrot.lane.b32.xlu1 %v1983_v30, %s3430_s2  ;;  %v3341_v30 = vld [vmem:[#allocation7 + $0x1] ss:$0 sm:$0xff] }
0x123a   :  { %v2107_v10 = vpop.permute.xlu2 %2106 }
0x123b   :  { %v2109_v44 = vmul.f32 %v2107_v10, %v4164_v63 }
0x123d   :  { %2111 = vrot.lane.b32.xlu1 %v2109_v44, %s3430_s2  ;;  %v4233_v44 = vld [vmem:[#allocation7 + $0x2] ss:$0 sm:$0xff] }
0x1246   :  { %v1918_v2 = vpop.permute.xlu1 %1917 }
0x1247   :  { %v1920_v24 = vmul.f32 %v1918_v2, %v4153_v25 }
0x1249   :  { %1922 = vrot.lane.b32.xlu0 %v1920_v24, %s3430_s2 }
0x124e   :  { %v2044_v9 = vpop.permute.xlu1 %2043 }
0x124f   :  { %v2046_v49 = vmul.f32 %v2044_v9, %v4159_v19 }
0x1251   :  { %2048 = vrot.lane.b32.xlu0 %v2046_v49, %s3430_s2 }
0x126b   :  { %v1860_v18 = vpop.permute.xlu2 %1859 }
0x126c   :  { %v1862_v15 = vadd.f32 %v1860_v18, %v1852_v22 }
0x126e   :  { %3245 = vtanh.f32 %v1862_v15 }
0x1274   :  { %v3246_v33 = vpop.eup %3245 }
0x1275   :  { %1865 = vrot.lane.b32.xlu1 %v3246_v33, %s3422_s28 }
0x12a4   :  { %v1986_v16 = vpop.permute.xlu1 %1985 }
0x12a5   :  { %v4184_v58 = vadd.f32 %v1986_v16, %v1978_v43 }
0x12a7   :  { %3247 = vtanh.f32 %v4184_v58 }
0x12ad   :  { %v3248_v45 = vpop.eup %3247 }
0x12ae   :  { %1991 = vrot.lane.b32.xlu0 %v3248_v45, %s3422_s28 }
0x12af   :  { %v2112_v47 = vpop.permute.xlu1 %2111 }
0x12b0   :  { %v4190_v32 = vadd.f32 %v2112_v47, %v2104_v59 }
0x12b2   :  { %3249 = vtanh.f32 %v4190_v32 }
0x12b8   :  { %v3250_v34 = vpop.eup %3249 }
0x12b9   :  { %2117 = vrot.lane.b32.xlu0 %v3250_v34, %s3422_s28 }
0x12bb   :  { %v1923_v1 = vpop.permute.xlu0 %1922 }
0x12bc   :  { %v4196_v51 = vadd.f32 %v1923_v1, %v1915_v55 }
0x12be   :  { %3251 = vtanh.f32 %v4196_v51 }
0x12c3   :  { %v2049_v27 = vpop.permute.xlu0 %2048 }
0x12c4   :  { %v3252_v17 = vpop.eup %3251  ;;  %v4201_v31 = vadd.f32 %v2049_v27, %v2041_v35 }
0x12c5   :  { %1928 = vrot.lane.b32.xlu2 %v3252_v17, %s3422_s28 }
0x12c6   :  { %3253 = vtanh.f32 %v4201_v31 }
0x12cc   :  { %v3254_v29 = vpop.eup %3253 }
0x12cd   :  { %2054 = vrot.lane.b32.xlu2 %v3254_v29, %s3422_s28 }
0x12e7   :  { %v1866_v11 = vpop.permute.xlu1 %1865 }
0x12e8   :  { %v1868_v0 = vmul.f32 %v1866_v11, %v4141_v48 }
0x131f   :  { %v1929_v56 = vpop.permute.xlu2 %1928 }
0x1320   :  { %v1931_v50 = vmul.f32 %v1929_v56, %v4153_v25  ;;  %v1992_v37 = vpop.permute.xlu0 %1991 }
0x1321   :  { %v1994_v60 = vmul.f32 %v1992_v37, %v4155_v38 }
0x1322   :  { %v3048_v41 = vpack.i.bf16 %v1868_v0, %v1931_v50 }
0x1323   :  { %2248 = vrot.lane.b32.xlu0 %v1994_v60, %s3430_s2  ;;  %v3053_v6 = vpack.i.bf16 %v1931_v50, %v1994_v60 }
0x1324   :  { %3049 = vrot.lane.b32.xlu1 %v3048_v41, %s3430_s2 }
0x1325   :  { %3054 = vrot.lane.b32.xlu2 %v3053_v6, %s3422_s28 }
0x1327   :  { %v2055_v26 = vpop.permute.xlu2 %2054 }
0x1328   :  { %v2057_v3 = vmul.f32 %v2055_v26, %v4159_v19 }
0x132b   :  { %v2118_v5 = vpop.permute.xlu0 %2117 }
0x132c   :  { %v2120_v12 = vmul.f32 %v2118_v5, %v4164_v63  ;;  %2252 = vrot.lane.b32.xlu1 %v2057_v3, %s3422_s28 }
0x132d   :  { %2311 = vrot.lane.b32.xlu2 %v2057_v3, %s3430_s2 }
0x132e   :  { %2315 = vrot.lane.b32.xlu0 %v2120_v12, %s3422_s28 }
0x137f   :  { %v3055_v48 = vpop.permute.xlu2 %3054 }
0x1380   :  { %v3057_v61 = vunpack.i.h.bf16 %v3055_v48  ;;  %v3056_v62 = vunpack.i.l.bf16 %v3055_v48 }
0x1387   :  { %v2312_v63 = vpop.permute.xlu2 %2311 }
0x1395   :  { %v2249_v25 = vpop.permute.xlu0 %2248 }
0x1396   :  { %v3050_v38 = vpop.permute.xlu1 %3049 }
0x1397   :  { %v3052_v23 = vunpack.i.h.bf16 %v3050_v38  ;;  %v3051_v52 = vunpack.i.l.bf16 %v3050_v38 }
0x1399   :  { %v2129_v46 = vsel %vm124_vm0, %v3052_v23, %v3057_v61  ;;  %v2192_v19 = vsel %vm124_vm0, %v3051_v52, %v3056_v62 }
0x139a   :  { %v2130_v4 = vpack.c.bf16 %v2129_v46, %v2129_v46  ;;  %v2193_v7 = vpack.c.bf16 %v2192_v19, %v2192_v19 }
0x139c   :  { %2952 = vmatmul.msk.bf16.vlgmr.msrb.gmra.mxu2 %vm154_vm1, %v2130_v4  ;;  %2955 = vmatmul.msk.bf16.vlgmr.msrb.gmra.mxu3 %vm154_vm1, %v2193_v7 }
0x139d   :  { %2644 = vmatpush.bf16.msrb.mxu2 %v4109_v39  ;;  %2708 = vmatpush.bf16.msrb.mxu3 %v4109_v39 }
0x139e   :  { %v2253_v20 = vpop.permute.xlu1 %2252 }
0x139f   :  { %v2255_v54 = vsel %vm124_vm0, %v2249_v25, %v2253_v20 }
0x13a0   :  { %v2316_v28 = vpop.permute.xlu0 %2315  ;;  %v2256_v40 = vpack.c.bf16 %v2255_v54, %v2255_v54 }
0x13a1   :  { %v2318_v14 = vsel %vm124_vm0, %v2312_v63, %v2316_v28  ;;  %2645 = vmatpush.bf16.msrb.mxu2 %v4112_v8  ;;  %2709 = vmatpush.bf16.msrb.mxu3 %v4112_v8 }
0x13a2   :  { %v2319_v53 = vpack.c.bf16 %v2318_v14, %v2318_v14  ;;  %2958 = vmatmul.msk.bf16.vlgmr.msra.gmra.mxu0 %vm154_vm1, %v2256_v40 }
0x13a4   :  { %2961 = vmatmul.msk.bf16.vlgmr.msra.gmra.mxu1 %vm154_vm1, %v2319_v53 }
0x13a5   :  { %2646 = vmatpush.bf16.msrb.mxu2 %v4021_v13  ;;  %2710 = vmatpush.bf16.msrb.mxu3 %v4021_v13 }
0x13a9   :  { %2647 = vmatpush.bf16.msrb.mxu2 %v4026_v42  ;;  %2711 = vmatpush.bf16.msrb.mxu3 %v4026_v42 }
0x141f   :  { %v2143_v39 = vpop.f32.mrf.mxu2  ;;  %v2206_v36 = vpop.f32.mrf.mxu3 }
0x1420   :  { %v2144_v10 = vadd.f32 %v3341_v30, %v2143_v39  ;;  %v2207_v8 = vadd.f32 %v4233_v44, %v2206_v36  ;;  %v2269_v2 = vpop.f32.mrf.mxu0 }
0x1421   :  { %v2332_v24 = vpop.f32.mrf.mxu1  ;;  %v2270_v9 = vadd.f32 %v4041_v57, %v2269_v2 }
0x1422   :  { %v2333_v49 = vadd.f32 %v4148_v21, %v2332_v24  ;;  %v2953_v22 = vmul.f32 -1.442695, %v2144_v10  ;;  %v2956_v13 = vmul.f32 -1.442695, %v2207_v8 }
0x1423   :  { %v2959_v18 = vmul.f32 -1.442695, %v2270_v9 }
0x1424   :  { %v2962_v15 = vmul.f32 -1.442695, %v2333_v49  ;;  %3255 = vpow2.f32 %v2953_v22 }
0x1425   :  { %3257 = vpow2.f32 %v2956_v13 }
0x1426   :  { %3259 = vpow2.f32 %v2962_v15 }
0x1427   :  { %3261 = vpow2.f32 %v2959_v18  ;;  %v2145_v42 = vpop.f32.mrf.mxu2  ;;  %v2208_v33 = vpop.f32.mrf.mxu3 }
0x1428   :  { %v2271_v43 = vpop.f32.mrf.mxu0 }
0x1429   :  { %v2334_v16 = vpop.f32.mrf.mxu1 }
0x142a   :  { %v3256_v45 = vpop.eup %3255 }
0x142b   :  { %v3258_v59 = vpop.eup %3257  ;;  %v2150_v47 = vadd.f32 1.0, %v3256_v45 }
0x142c   :  { %v3260_v34 = vpop.eup %3259  ;;  %v2213_v55 = vadd.f32 1.0, %v3258_v59 }
0x142d   :  { %v3262_v57 = vpop.eup %3261  ;;  %v4238_v1 = vadd.f32 1.0, %v3260_v34  ;;  %3263 = vrcp.f32 %v2150_v47  ;;  %v2160_v27 = vand.u32 2147483647, %v2150_v47  ;;  %vm2156_vm10 = vweird.f32 %v2150_v47 }
0x142e   :  { %3265 = vrcp.f32 %v2213_v55  ;;  %v2276_v35 = vadd.f32 1.0, %v3262_v57  ;;  %v2162_v37 = vand.u32 2147483648, %v2150_v47  ;;  %vm2219_vm12 = vweird.f32 %v2213_v55 }
0x142f   :  { %3267 = vrcp.f32 %v4238_v1  ;;  %vm4241_vm11 = vcmp.eq.f32.partialorder %v2160_v27, 8.507059e+37  ;;  %v2223_v26 = vand.u32 2147483647, %v2213_v55  ;;  %v2225_v3 = vand.u32 2147483648, %v2213_v55 }
0x1430   :  { %3269 = vrcp.f32 %v2276_v35  ;;  %vm2282_vm13 = vweird.f32 %v2276_v35  ;;  %v2286_v48 = vand.u32 2147483647, %v2276_v35  ;;  %v2288_v38 = vand.u32 2147483648, %v2276_v35 }
0x1431   :  { %v2163_v23 = vor.u32 1.1754944e-38, %v2162_v37  ;;  %vm4246_vm2 = vcmp.eq.f32.partialorder %v2223_v26, 8.507059e+37  ;;  %v2226_v54 = vor.u32 1.1754944e-38, %v2225_v3  ;;  %vm2345_vm7 = vweird.f32 %v4238_v1 }
0x1432   :  { %v2351_v40 = vand.u32 2147483648, %v4238_v1  ;;  %v2349_v30 = vand.u32 2147483647, %v4238_v1  ;;  %v2289_v10 = vor.u32 1.1754944e-38, %v2288_v38 }
0x1433   :  { %v3264_v17 = vpop.eup %3263 }
0x1434   :  { %v3266_v29 = vpop.eup %3265  ;;  %v2152_v11 = vmul.f32 %v3264_v17, %v2150_v47  ;;  %vm2157_vm14 = vweird.f32 %v3264_v17  ;;  %v2352_v18 = vor.u32 1.1754944e-38, %v2351_v40 }
0x1435   :  { %v3268_v56 = vpop.eup %3267  ;;  %v2215_v0 = vmul.f32 %v3266_v29, %v2213_v55  ;;  %vm2220_vm15 = vweird.f32 %v3266_v29  ;;  %vm2158_vm5 = vmor %vm2156_vm10, %vm2157_vm14  ;;  %vm2287_vm10 = vcmp.eq.f32.partialorder %v2286_v48, 8.507059e+37 }
0x1436   :  { %v3270_v60 = vpop.eup %3269  ;;  %v2341_v41 = vmul.f32 %v3268_v56, %v4238_v1  ;;  %v2153_v6 = vsub.f32 1.0, %v2152_v11  ;;  %vm2346_vm3 = vweird.f32 %v3268_v56  ;;  %vm2221_vm6 = vmor %vm2219_vm12, %vm2220_vm15 }
0x1437   :  { %v2216_v5 = vsub.f32 1.0, %v2215_v0  ;;  %v2278_v12 = vmul.f32 %v3270_v60, %v2276_v35  ;;  %vm2283_vm4 = vweird.f32 %v3270_v60  ;;  %vm4258_vm8 = vmor %vm2345_vm7, %vm2346_vm3 }
0x1438   :  { %v2342_v25 = vsub.f32 1.0, %v2341_v41  ;;  %v2154_v61 = vmul.f32 %v3264_v17, %v2153_v6  ;;  %vm2284_vm9 = vmor %vm2282_vm13, %vm2283_vm4 }
0x1439   :  { %v2279_v62 = vsub.f32 1.0, %v2278_v12  ;;  %v2217_v52 = vmul.f32 %v3266_v29, %v2216_v5 }
0x143a   :  { %v2155_v46 = vadd.f32 %v3264_v17, %v2154_v61  ;;  %v2343_v4 = vmul.f32 %v3268_v56, %v2342_v25 }
0x143b   :  { %v2280_v7 = vmul.f32 %v3270_v60, %v2279_v62  ;;  %v2218_v20 = vadd.f32 %v3266_v29, %v2217_v52 }
0x143c   :  { %v2159_v63 = vsel %vm2158_vm5, %v3264_v17, %v2155_v46  ;;  %v2344_v28 = vadd.f32 %v3268_v56, %v2343_v4 }
0x143d   :  { %v2281_v14 = vadd.f32 %v3270_v60, %v2280_v7  ;;  %v4256_v53 = vsel %vm4241_vm11, %v2163_v23, %v2159_v63  ;;  %v2222_v39 = vsel %vm2221_vm6, %v3266_v29, %v2218_v20  ;;  %vm2350_vm11 = vcmp.eq.f32.partialorder %v2349_v30, 8.507059e+37 }
0x143e   :  { %v2166_v8 = vmul.f32 2.0, %v4256_v53  ;;  %v2227_v2 = vsel %vm4246_vm2, %v2226_v54, %v2222_v39  ;;  %v2348_v49 = vsel %vm4258_vm8, %v3268_v56, %v2344_v28  ;;  %v2168_v26 = vmul.f32 %v4256_v53, %v4196_v51 }
0x143f   :  { %v2285_v24 = vsel %vm2284_vm9, %v3270_v60, %v2281_v14  ;;  %v2229_v9 = vmul.f32 2.0, %v2227_v2  ;;  %v2353_v33 = vsel %vm2350_vm11, %v2352_v18, %v2348_v49  ;;  %v2231_v17 = vmul.f32 %v2227_v2, %v4184_v58 }
0x1440   :  { %v2290_v22 = vsel %vm2287_vm10, %v2289_v10, %v2285_v24  ;;  %v2954_v13 = vadd.f32 -1.0, %v2166_v8  ;;  %v2355_v16 = vmul.f32 2.0, %v2353_v33  ;;  %v2357_v37 = vmul.f32 %v2353_v33, %v4190_v32 }
0x1441   :  { %v2292_v15 = vmul.f32 2.0, %v2290_v22  ;;  %v2957_v42 = vadd.f32 -1.0, %v2229_v9  ;;  %v2294_v11 = vmul.f32 %v2290_v22, %v4201_v31  ;;  %v4308_v9 = vld [vmem:[#allocation7 + $0x3] ss:$0 sm:$0xff] }
0x1442   :  { %2170 = vrot.lane.b32.xlu0 %v2954_v13, %s3422_s28  ;;  %v2963_v45 = vadd.f32 -1.0, %v2355_v16 }
0x1443   :  { %v2960_v43 = vadd.f32 -1.0, %v2292_v15  ;;  %2233 = vrot.lane.b32.xlu1 %v2957_v42, %s3422_s28 }
0x1445   :  { %2296 = vrot.lane.b32.xlu2 %v2960_v43, %s3422_s28 }
0x144b   :  { %2359 = vrot.lane.b32.xlu1 %v2963_v45, %s3422_s28 }
0x149f   :  { %v2297_v59 = vpop.permute.xlu2 %2296 }
0x14a0   :  { %v2299_v47 = vmul.f32 %v2297_v59, %v2290_v22 }
0x14a2   :  { %2301 = vrot.lane.b32.xlu0 %v2299_v47, %s3430_s2 }
0x14b4   :  { %v2171_v34 = vpop.permute.xlu0 %2170 }
0x14b5   :  { %v2173_v55 = vmul.f32 %v2171_v34, %v4256_v53  ;;  %v2234_v57 = vpop.permute.xlu1 %2233 }
0x14b6   :  { %v2236_v1 = vmul.f32 %v2234_v57, %v2227_v2 }
0x14b7   :  { %2175 = vrot.lane.b32.xlu1 %v2173_v55, %s3430_s2 }
0x14b8   :  { %2238 = vrot.lane.b32.xlu2 %v2236_v1, %s3430_s2 }
0x14bd   :  { %v2360_v35 = vpop.permute.xlu1 %2359 }
0x14be   :  { %v2362_v27 = vmul.f32 %v2360_v35, %v2353_v33 }
0x14c0   :  { %2364 = vrot.lane.b32.xlu2 %v2362_v27, %s3430_s2 }
0x1512   :  { %v2239_v29 = vpop.permute.xlu2 %2238 }
0x1513   :  { %v4280_v56 = vadd.f32 %v2239_v29, %v2231_v17 }
0x1514   :  { %v2302_v0 = vpop.permute.xlu0 %2301 }
0x1515   :  { %v4282_v50 = vadd.f32 %v2302_v0, %v2294_v11  ;;  %3271 = vtanh.f32 %v4280_v56 }
0x1517   :  { %3273 = vtanh.f32 %v4282_v50 }
0x151a   :  { %v2365_v60 = vpop.permute.xlu2 %2364 }
0x151b   :  { %v3272_v41 = vpop.eup %3271  ;;  %v4287_v6 = vadd.f32 %v2365_v60, %v2357_v37 }
0x151c   :  { %2244 = vrot.lane.b32.xlu0 %v3272_v41, %s3422_s28 }
0x151d   :  { %v3274_v58 = vpop.eup %3273  ;;  %3275 = vtanh.f32 %v4287_v6 }
0x151e   :  { %2307 = vrot.lane.b32.xlu1 %v3274_v58, %s3422_s28 }
0x1523   :  { %v3276_v31 = vpop.eup %3275 }
0x1524   :  { %2370 = vrot.lane.b32.xlu0 %v3276_v31, %s3422_s28 }
0x1529   :  { %v2176_v3 = vpop.permute.xlu1 %2175 }
0x152a   :  { %v2178_v5 = vadd.f32 %v2176_v3, %v2168_v26 }
0x152c   :  { %3277 = vtanh.f32 %v2178_v5 }
0x1532   :  { %v3278_v32 = vpop.eup %3277 }
0x1533   :  { %2181 = vrot.lane.b32.xlu2 %v3278_v32, %s3422_s28 }
0x158d   :  { %v2182_v12 = vpop.permute.xlu2 %2181 }
0x158e   :  { %v2245_v48 = vpop.permute.xlu0 %2244  ;;  %v2184_v25 = vmul.f32 %v2182_v12, %v4256_v53 }
0x158f   :  { %v2247_v38 = vmul.f32 %v2245_v48, %v2227_v2 }
0x1590   :  { %v2308_v61 = vpop.permute.xlu1 %2307 }
0x1591   :  { %v3058_v62 = vpack.i.bf16 %v2184_v25, %v2247_v38  ;;  %v2310_v23 = vmul.f32 %v2308_v61, %v2290_v22 }
0x1593   :  { %v3063_v52 = vpack.i.bf16 %v2247_v38, %v2310_v23  ;;  %2501 = vrot.lane.b32.xlu0 %v2310_v23, %s3430_s2  ;;  %3059 = vrot.lane.b32.xlu1 %v3058_v62, %s3430_s2 }
0x1595   :  { %3064 = vrot.lane.b32.xlu2 %v3063_v52, %s3422_s28 }
0x1596   :  { %v2371_v51 = vpop.permute.xlu0 %2370 }
0x1597   :  { %v2373_v46 = vmul.f32 %v2371_v51, %v2353_v33 }
0x159b   :  { %2505 = vrot.lane.b32.xlu1 %v2373_v46, %s3422_s28 }
0x15ef   :  { %v3065_v19 = vpop.permute.xlu2 %3064 }
0x15f0   :  { %v3067_v7 = vunpack.i.h.bf16 %v3065_v19  ;;  %v3066_v20 = vunpack.i.l.bf16 %v3065_v19 }
0x1605   :  { %v3060_v4 = vpop.permute.xlu1 %3059  ;;  %v2502_v39 = vpop.permute.xlu0 %2501 }
0x1606   :  { %v3062_v54 = vunpack.i.h.bf16 %v3060_v4  ;;  %v3061_v63 = vunpack.i.l.bf16 %v3060_v4 }
0x1608   :  { %v2382_v28 = vsel %vm124_vm0, %v3062_v54, %v3067_v7  ;;  %v2445_v40 = vsel %vm124_vm0, %v3061_v63, %v3066_v20 }
0x1609   :  { %v2383_v14 = vpack.c.bf16 %v2382_v28, %v2382_v28  ;;  %v2446_v53 = vpack.c.bf16 %v2445_v40, %v2445_v40 }
0x160b   :  { %2964 = vmatmul.msk.bf16.vlgmr.msra.gmra.mxu2 %vm154_vm1, %v2383_v14  ;;  %2967 = vmatmul.msk.bf16.vlgmr.msra.gmra.mxu3 %vm154_vm1, %v2446_v53 }
0x160d   :  { %v2506_v36 = vpop.permute.xlu1 %2505 }
0x160e   :  { %v2508_v30 = vsel %vm124_vm0, %v2502_v39, %v2506_v36 }
0x160f   :  { %v2509_v10 = vpack.c.bf16 %v2508_v30, %v2508_v30 }
0x1611   :  { %2970 = vmatmul.msk.bf16.vlgmr.msrb.gmra.mxu0 %vm154_vm1, %v2509_v10 }
0x168e   :  { %v2396_v8 = vpop.f32.mrf.mxu2  ;;  %v2459_v2 = vpop.f32.mrf.mxu3 }
0x168f   :  { %v2397_v24 = vadd.f32 %v4233_v44, %v2396_v8  ;;  %v2460_v49 = vadd.f32 %v4308_v9, %v2459_v2  ;;  %v2522_v22 = vpop.f32.mrf.mxu0 }
0x1690   :  { %v2523_v13 = vadd.f32 %v4148_v21, %v2522_v22 }
0x1691   :  { %v2965_v18 = vmul.f32 -1.442695, %v2397_v24  ;;  %v2968_v15 = vmul.f32 -1.442695, %v2460_v49 }
0x1692   :  { %v2971_v42 = vmul.f32 -1.442695, %v2523_v13 }
0x1693   :  { %3279 = vpow2.f32 %v2965_v18 }
0x1694   :  { %3281 = vpow2.f32 %v2968_v15 }
0x1695   :  { %3283 = vpow2.f32 %v2971_v42 }
0x1696   :  { %v2398_v33 = vpop.f32.mrf.mxu2  ;;  %v2461_v43 = vpop.f32.mrf.mxu3 }
0x1697   :  { %v2524_v16 = vpop.f32.mrf.mxu0 }
0x1699   :  { %v3280_v45 = vpop.eup %3279 }
0x169a   :  { %v3282_v59 = vpop.eup %3281  ;;  %v2403_v47 = vadd.f32 1.0, %v3280_v45 }
0x169b   :  { %v3284_v44 = vpop.eup %3283  ;;  %v2466_v34 = vadd.f32 1.0, %v3282_v59 }
0x169c   :  { %3285 = vrcp.f32 %v2403_v47  ;;  %v2529_v55 = vadd.f32 1.0, %v3284_v44  ;;  %vm2409_vm12 = vweird.f32 %v2403_v47  ;;  %v2413_v37 = vand.u32 2147483647, %v2403_v47 }
0x169d   :  { %3287 = vrcp.f32 %v2466_v34  ;;  %v2415_v60 = vand.u32 2147483648, %v2403_v47  ;;  %v2478_v31 = vand.u32 2147483648, %v2466_v34  ;;  %v2476_v5 = vand.u32 2147483647, %v2466_v34 }
0x169e   :  { %3289 = vrcp.f32 %v2529_v55  ;;  %v2541_v26 = vand.u32 2147483648, %v2529_v55  ;;  %v2539_v12 = vand.u32 2147483647, %v2529_v55  ;;  %vm2535_vm2 = vweird.f32 %v2529_v55 }
0x169f   :  { %v2416_v25 = vor.u32 1.1754944e-38, %v2415_v60  ;;  %vm2472_vm4 = vweird.f32 %v2466_v34  ;;  %vm2414_vm5 = vcmp.eq.f32.partialorder %v2413_v37, 8.507059e+37  ;;  %v2479_v23 = vor.u32 1.1754944e-38, %v2478_v31 }
0x16a0   :  { %v2542_v52 = vor.u32 1.1754944e-38, %v2541_v26  ;;  %vm2477_vm8 = vcmp.eq.f32.partialorder %v2476_v5, 8.507059e+37  ;;  %vm2540_vm9 = vcmp.eq.f32.partialorder %v2539_v12, 8.507059e+37 }
0x16a2   :  { %v3286_v57 = vpop.eup %3285 }
0x16a3   :  { %v3288_v1 = vpop.eup %3287  ;;  %v2405_v35 = vmul.f32 %v3286_v57, %v2403_v47  ;;  %vm2410_vm13 = vweird.f32 %v3286_v57 }
0x16a4   :  { %v3290_v27 = vpop.eup %3289  ;;  %v2468_v17 = vmul.f32 %v3288_v1, %v2466_v34  ;;  %vm2473_vm14 = vweird.f32 %v3288_v1  ;;  %vm2411_vm3 = vmor %vm2409_vm12, %vm2410_vm13 }
0x16a5   :  { %v2406_v29 = vsub.f32 1.0, %v2405_v35  ;;  %v2531_v11 = vmul.f32 %v3290_v27, %v2529_v55  ;;  %vm2536_vm15 = vweird.f32 %v3290_v27  ;;  %vm2474_vm6 = vmor %vm2472_vm4, %vm2473_vm14 }
0x16a6   :  { %v2469_v0 = vsub.f32 1.0, %v2468_v17  ;;  %vm2537_vm7 = vmor %vm2535_vm2, %vm2536_vm15 }
0x16a7   :  { %v2532_v41 = vsub.f32 1.0, %v2531_v11  ;;  %v2407_v58 = vmul.f32 %v3286_v57, %v2406_v29 }
0x16a8   :  { %v2470_v3 = vmul.f32 %v3288_v1, %v2469_v0 }
0x16a9   :  { %v2533_v32 = vmul.f32 %v3290_v27, %v2532_v41  ;;  %v2408_v48 = vadd.f32 %v3286_v57, %v2407_v58 }
0x16aa   :  { %v2471_v38 = vadd.f32 %v3288_v1, %v2470_v3 }
0x16ab   :  { %v2534_v61 = vadd.f32 %v3290_v27, %v2533_v32  ;;  %v2412_v62 = vsel %vm2411_vm3, %v3286_v57, %v2408_v48 }
0x16ac   :  { %v2417_v51 = vsel %vm2414_vm5, %v2416_v25, %v2412_v62  ;;  %v2475_v46 = vsel %vm2474_vm6, %v3288_v1, %v2471_v38 }
0x16ad   :  { %v2538_v19 = vsel %vm2537_vm7, %v3290_v27, %v2534_v61  ;;  %v2419_v4 = vmul.f32 2.0, %v2417_v51  ;;  %v2480_v7 = vsel %vm2477_vm8, %v2479_v23, %v2475_v46  ;;  %v2421_v13 = vmul.f32 %v2417_v51, %v4280_v56 }
0x16ae   :  { %v2543_v20 = vsel %vm2540_vm9, %v2542_v52, %v2538_v19  ;;  %v2482_v54 = vmul.f32 2.0, %v2480_v7  ;;  %v2484_v2 = vmul.f32 %v2480_v7, %v4282_v50  ;;  %vm2774_vm7 = vcmask 7168  }
0x16af   :  { %v2545_v63 = vmul.f32 2.0, %v2543_v20  ;;  %v2966_v28 = vadd.f32 -1.0, %v2419_v4  ;;  %v2547_v15 = vmul.f32 %v2543_v20, %v4287_v6 }
0x16b0   :  { %v2969_v40 = vadd.f32 -1.0, %v2482_v54 }
0x16b1   :  { %v2972_v14 = vadd.f32 -1.0, %v2545_v63  ;;  %2423 = vrot.lane.b32.xlu1 %v2966_v28, %s3422_s28 }
0x16b2   :  { %2486 = vrot.lane.b32.xlu2 %v2969_v40, %s3422_s28 }
0x16b3   :  { %2549 = vrot.lane.b32.xlu0 %v2972_v14, %s3422_s28 }
0x170c   :  { %v2487_v53 = vpop.permute.xlu2 %2486 }
0x170d   :  { %v2489_v39 = vmul.f32 %v2487_v53, %v2480_v7 }
0x170f   :  { %2491 = vrot.lane.b32.xlu2 %v2489_v39, %s3430_s2 }
0x1723   :  { %v2424_v36 = vpop.permute.xlu1 %2423 }
0x1724   :  { %v2426_v30 = vmul.f32 %v2424_v36, %v2417_v51 }
0x1725   :  { %v2550_v10 = vpop.permute.xlu0 %2549 }
0x1726   :  { %v2552_v8 = vmul.f32 %v2550_v10, %v2543_v20  ;;  %2428 = vrot.lane.b32.xlu1 %v2426_v30, %s3430_s2 }
0x1728   :  { %2554 = vrot.lane.b32.xlu0 %v2552_v8, %s3430_s2 }
0x1769   :  { %v2492_v24 = vpop.permute.xlu2 %2491 }
0x176a   :  { %v4320_v49 = vadd.f32 %v2492_v24, %v2484_v2 }
0x176c   :  { %3291 = vtanh.f32 %v4320_v49 }
0x1772   :  { %v3292_v22 = vpop.eup %3291 }
0x1773   :  { %2497 = vrot.lane.b32.xlu2 %v3292_v22, %s3422_s28 }
0x1798   :  { %v2429_v18 = vpop.permute.xlu1 %2428 }
0x1799   :  { %v2431_v42 = vadd.f32 %v2429_v18, %v2421_v13 }
0x179a   :  { %v2555_v33 = vpop.permute.xlu0 %2554 }
0x179b   :  { %v4326_v43 = vadd.f32 %v2555_v33, %v2547_v15  ;;  %3293 = vtanh.f32 %v2431_v42 }
0x179d   :  { %3295 = vtanh.f32 %v4326_v43 }
0x17a1   :  { %v3294_v50 = vpop.eup %3293 }
0x17a2   :  { %2434 = vrot.lane.b32.xlu1 %v3294_v50, %s3422_s28 }
0x17a3   :  { %v3296_v16 = vpop.eup %3295 }
0x17a4   :  { %2560 = vrot.lane.b32.xlu0 %v3296_v16, %s3422_s28 }
0x17cd   :  { %v2498_v45 = vpop.permute.xlu2 %2497 }
0x17ce   :  { %v2500_v59 = vmul.f32 %v2498_v45, %v2480_v7 }
0x17d0   :  { %2628 = vrot.lane.b32.xlu2 %v2500_v59, %s3430_s2 }
0x17d8   :  { %2569 = vrot.lane.b32.xlu2 %v2500_v59, %s3422_s28 }
0x1814   :  { %v2435_v56 = vpop.permute.xlu1 %2434 }
0x1815   :  { %v2437_v6 = vmul.f32 %v2435_v56, %v2417_v51 }
0x1816   :  { %v2561_v47 = vpop.permute.xlu0 %2560 }
0x1817   :  { %v2563_v44 = vmul.f32 %v2561_v47, %v2543_v20  ;;  %2565 = vrot.lane.b32.xlu1 %v2437_v6, %s3430_s2 }
0x1819   :  { %2632 = vrot.lane.b32.xlu0 %v2563_v44, %s3422_s28 }
0x182a   :  { %v2629_v34 = vpop.permute.xlu2 %2628 }
0x1832   :  { %v2570_v55 = vpop.permute.xlu2 %2569 }
0x1889   :  { %v2566_v57 = vpop.permute.xlu1 %2565 }
0x188a   :  { %v2572_v1 = vsel %vm124_vm0, %v2566_v57, %v2570_v55  ;;  %v3344_v55 = vld [vmem:[#allocation7 + $0x4] ss:$0 sm:$0xff] }
0x188b   :  { %v2633_v35 = vpop.permute.xlu0 %2632  ;;  %v2573_v27 = vpack.c.bf16 %v2572_v1, %v2572_v1 }
0x188c   :  { %v2635_v17 = vsel %vm124_vm0, %v2629_v34, %v2633_v35 }
0x188d   :  { %v2636_v29 = vpack.c.bf16 %v2635_v17, %v2635_v17  ;;  %2973 = vmatmul.msk.bf16.vlgmr.msrb.gmra.mxu1 %vm154_vm1, %v2573_v27 }
0x188f   :  { %2976 = vmatmul.msk.bf16.vlgmr.msrb.gmra.mxu2 %vm154_vm1, %v2636_v29 }
0x190a   :  { %v2586_v11 = vpop.f32.mrf.mxu1 }
0x190b   :  { %v2587_v0 = vadd.f32 %v4308_v9, %v2586_v11 }
0x190d   :  { %v2974_v37 = vmul.f32 -1.442695, %v2587_v0 }
0x190f   :  { %3297 = vpow2.f32 %v2974_v37 }
0x1912   :  { %v2649_v60 = vpop.f32.mrf.mxu2  ;;  %v2588_v41 = vpop.f32.mrf.mxu1 }
0x1913   :  { %v2650_v58 = vadd.f32 %v4148_v21, %v2649_v60 }
0x1915   :  { %v3298_v31 = vpop.eup %3297  ;;  %v2977_v26 = vmul.f32 -1.442695, %v2650_v58 }
0x1916   :  { %v2593_v3 = vadd.f32 1.0, %v3298_v31 }
0x1917   :  { %3299 = vpow2.f32 %v2977_v26 }
0x1918   :  { %3301 = vrcp.f32 %v2593_v3  ;;  %v2605_v61 = vand.u32 2147483648, %v2593_v3  ;;  %v2603_v62 = vand.u32 2147483647, %v2593_v3  ;;  %vm2599_vm11 = vweird.f32 %v2593_v3 }
0x191a   :  { %v2651_v5 = vpop.f32.mrf.mxu2  ;;  %v2606_v21 = vor.u32 1.1754944e-38, %v2605_v61  ;;  %vm2604_vm13 = vcmp.eq.f32.partialorder %v2603_v62, 8.507059e+37 }
0x191d   :  { %v3300_v32 = vpop.eup %3299 }
0x191e   :  { %v3302_v12 = vpop.eup %3301  ;;  %v2656_v48 = vadd.f32 1.0, %v3300_v32 }
0x191f   :  { %v2595_v25 = vmul.f32 %v3302_v12, %v2593_v3  ;;  %vm2600_vm10 = vweird.f32 %v3302_v12 }
0x1920   :  { %3303 = vrcp.f32 %v2656_v48  ;;  %vm2601_vm12 = vmor %vm2599_vm11, %vm2600_vm10  ;;  %v2668_v20 = vand.u32 2147483648, %v2656_v48  ;;  %v2666_v28 = vand.u32 2147483647, %v2656_v48  ;;  %vm2662_vm15 = vweird.f32 %v2656_v48 }
0x1921   :  { %v2596_v38 = vsub.f32 1.0, %v2595_v25  ;;  %v3073_v25 = vld [vmem:[%s4367_s3] ss:$0 sm:$0xff] }
0x1922   :  { %v2669_v14 = vor.u32 1.1754944e-38, %v2668_v20  ;;  %vm2667_vm3 = vcmp.eq.f32.partialorder %v2666_v28, 8.507059e+37 }
0x1923   :  { %v2597_v9 = vmul.f32 %v3302_v12, %v2596_v38 }
0x1925   :  { %v2598_v23 = vadd.f32 %v3302_v12, %v2597_v9 }
0x1926   :  { %v3304_v52 = vpop.eup %3303 }
0x1927   :  { %v2658_v51 = vmul.f32 %v3304_v52, %v2656_v48  ;;  %v2602_v46 = vsel %vm2601_vm12, %v3302_v12, %v2598_v23  ;;  %vm2663_vm14 = vweird.f32 %v3304_v52 }
0x1928   :  { %v2607_v19 = vsel %vm2604_vm13, %v2606_v21, %v2602_v46  ;;  %vm2664_vm2 = vmor %vm2662_vm15, %vm2663_vm14 }
0x1929   :  { %v2659_v4 = vsub.f32 1.0, %v2658_v51  ;;  %v2609_v7 = vmul.f32 2.0, %v2607_v19  ;;  %v2611_v22 = vmul.f32 %v2607_v19, %v4320_v49 }
0x192b   :  { %v2975_v54 = vadd.f32 -1.0, %v2609_v7  ;;  %v2660_v63 = vmul.f32 %v3304_v52, %v2659_v4  ;;  %v3074_v4 = vld [vmem:[#allocation2] ss:$0 sm:$0xff] }
0x192d   :  { %2613 = vrot.lane.b32.xlu0 %v2975_v54, %s3422_s28  ;;  %v2661_v40 = vadd.f32 %v3304_v52, %v2660_v63 }
0x192f   :  { %v2665_v53 = vsel %vm2664_vm2, %v3304_v52, %v2661_v40 }
0x1930   :  { %v2670_v39 = vsel %vm2667_vm3, %v2669_v14, %v2665_v53 }
0x1931   :  { %v2672_v36 = vmul.f32 2.0, %v2670_v39  ;;  %v2674_v42 = vmul.f32 %v2670_v39, %v4326_v43 }
0x1933   :  { %v2978_v30 = vadd.f32 -1.0, %v2672_v36 }
0x1935   :  { %2676 = vrot.lane.b32.xlu1 %v2978_v30, %s3422_s28 }
0x199f   :  { %v2614_v10 = vpop.permute.xlu0 %2613 }
0x19a0   :  { %v2616_v8 = vmul.f32 %v2614_v10, %v2607_v19 }
0x19a2   :  { %2618 = vrot.lane.b32.xlu2 %v2616_v8, %s3430_s2 }
0x19a7   :  { %v2677_v2 = vpop.permute.xlu1 %2676 }
0x19a8   :  { %v2679_v24 = vmul.f32 %v2677_v2, %v2670_v39 }
0x19aa   :  { %2681 = vrot.lane.b32.xlu0 %v2679_v24, %s3430_s2 }
0x19fc   :  { %v2619_v13 = vpop.permute.xlu2 %2618 }
0x19fd   :  { %v2621_v18 = vadd.f32 %v2619_v13, %v2611_v22 }
0x19ff   :  { %3305 = vtanh.f32 %v2621_v18 }
0x1a05   :  { %v3306_v15 = vpop.eup %3305 }
0x1a06   :  { %2624 = vrot.lane.b32.xlu1 %v3306_v15, %s3422_s28 }
0x1a1c   :  { %v2682_v33 = vpop.permute.xlu0 %2681 }
0x1a1d   :  { %v2684_v50 = vadd.f32 %v2682_v33, %v2674_v42 }
0x1a1f   :  { %3307 = vtanh.f32 %v2684_v50 }
0x1a25   :  { %v3308_v16 = vpop.eup %3307 }
0x1a26   :  { %2687 = vrot.lane.b32.xlu2 %v3308_v16, %s3422_s28 }
0x1a78   :  { %v2625_v45 = vpop.permute.xlu1 %2624 }
0x1a79   :  { %v2627_v59 = vmul.f32 %v2625_v45, %v2607_v19 }
0x1a7b   :  { %2692 = vrot.lane.b32.xlu0 %v2627_v59, %s3430_s2 }
0x1a80   :  { %v2688_v56 = vpop.permute.xlu2 %2687 }
0x1a81   :  { %v2690_v49 = vmul.f32 %v2688_v56, %v2670_v39 }
0x1a83   :  { %2696 = vrot.lane.b32.xlu1 %v2690_v49, %s3422_s28 }
0x1aed   :  { %v2693_v6 = vpop.permute.xlu0 %2692 }
0x1af5   :  { %v2697_v47 = vpop.permute.xlu1 %2696 }
0x1af6   :  { %v2699_v44 = vsel %vm124_vm0, %v2693_v6, %v2697_v47 }
0x1af7   :  { %v2700_v34 = vpack.c.bf16 %v2699_v44, %v2699_v44 }
0x1af9   :  { %2979 = vmatmul.msk.bf16.vlgmr.msrb.gmra.mxu3 %vm154_vm1, %v2700_v34 }
0x1b7c   :  { %v2713_v43 = vpop.f32.mrf.mxu3 }
0x1b7d   :  { %v2714_v57 = vadd.f32 %v3344_v55, %v2713_v43 }
0x1b7f   :  { %v2980_v1 = vmul.f32 -1.442695, %v2714_v57 }
0x1b81   :  { %3309 = vpow2.f32 %v2980_v1 }
0x1b84   :  { %v2715_v35 = vpop.f32.mrf.mxu3 }
0x1b87   :  { %v3310_v27 = vpop.eup %3309 }
0x1b88   :  { %v2720_v17 = vadd.f32 1.0, %v3310_v27 }
0x1b8a   :  { %3311 = vrcp.f32 %v2720_v17  ;;  %v2732_v37 = vand.u32 2147483648, %v2720_v17  ;;  %v2730_v41 = vand.u32 2147483647, %v2720_v17  ;;  %vm2726_vm5 = vweird.f32 %v2720_v17 }
0x1b8c   :  { %v2733_v31 = vor.u32 1.1754944e-38, %v2732_v37  ;;  %vm2731_vm1 = vcmp.eq.f32.partialorder %v2730_v41, 8.507059e+37 }
0x1b90   :  { %v3312_v29 = vpop.eup %3311 }
0x1b91   :  { %v2722_v11 = vmul.f32 %v3312_v29, %v2720_v17  ;;  %vm2727_vm4 = vweird.f32 %v3312_v29 }
0x1b92   :  { %vm2728_vm6 = vmor %vm2726_vm5, %vm2727_vm4 }
0x1b93   :  { %v2723_v0 = vsub.f32 1.0, %v2722_v11 }
0x1b95   :  { %v2724_v60 = vmul.f32 %v3312_v29, %v2723_v0 }
0x1b97   :  { %v2725_v58 = vadd.f32 %v3312_v29, %v2724_v60 }
0x1b99   :  { %v2729_v26 = vsel %vm2728_vm6, %v3312_v29, %v2725_v58 }
0x1b9a   :  { %v2734_v3 = vsel %vm2731_vm1, %v2733_v31, %v2729_v26 }
0x1b9b   :  { %v2736_v5 = vmul.f32 2.0, %v2734_v3  ;;  %v2738_v38 = vmul.f32 %v2734_v3, %v2684_v50 }
0x1b9d   :  { %v2981_v32 = vadd.f32 -1.0, %v2736_v5 }
0x1b9f   :  { %2740 = vrot.lane.b32.xlu2 %v2981_v32, %s3422_s28 }
0x1ba7   :  { %2758 = vrot.lane.b32.xlu2 %v3073_v25, %s3431_s15 }
0x1bf9   :  { %v2741_v12 = vpop.permute.xlu2 %2740 }
0x1bfa   :  { %v2743_v48 = vmul.f32 %v2741_v12, %v2734_v3 }
0x1bfc   :  { %2745 = vrot.lane.b32.xlu0 %v2743_v48, %s3430_s2 }
0x1c01   :  { %v2759_v52 = vpop.permute.xlu2 %2758 }
0x1c6e   :  { %v2746_v61 = vpop.permute.xlu0 %2745 }
0x1c6f   :  { %v2748_v9 = vadd.f32 %v2746_v61, %v2738_v38 }
0x1c71   :  { %3313 = vtanh.f32 %v2748_v9 }
0x1c77   :  { %v3314_v62 = vpop.eup %3313 }
0x1c78   :  { %2751 = vrot.lane.b32.xlu1 %v3314_v62, %s3422_s28 }
0x1cea   :  { %v2752_v23 = vpop.permute.xlu1 %2751 }
0x1ceb   :  { %v2754_v21 = vmul.f32 %v2752_v23, %v2734_v3 }
0x1ced   :  { %v2761_v51 = vmul.f32 %v2759_v52, %v2754_v21 }
0x1cef   :  { %2763 = vrot.lane.b32.xlu0 %v2761_v51, %s3430_s2 }
0x1d61   :  { %v2764_v46 = vpop.permute.xlu0 %2763 }
0x1d62   :  { %v2766_v19 = vsel %vm124_vm0, %v2764_v46, 0.0 }
0x1d63   :  { %2767 = vadd.xlane.f32.xlu1 %v2766_v19 }
0x1dd6   :  { %v2768_v7 = vpop.xlane.xlu1 %2767 }
0x1dd7   :  { %v2773_v20 = vadd.f32 %v3074_v4, %v2768_v7 }
0x1dd9   :  { %2775 = vst.msk [vmem:[%s4369_s5] sm:$0xff] %vm2774_vm7, %v2773_v20 }
0x1dda   :  { %2780 = vsyncpa [#allocation4], 1 }
0x1ddb   :  { %2781 = vsyncpa [#allocation6], 1 }

</bundles_post_ra>
